<compile_context>
chip_gen: v7x
topology: tpu7x:2x2x1
jax: 0.10.0
libtpu: 0.0.40
codegen_flags: <defaults>
</compile_context>

<pallas_src>
import jax
import jax.numpy as jnp
from jax import lax
from jax.experimental import pallas as pl
from jax.experimental.pallas import tpu as pltpu


BN_EPS = 1e-5


def _round_up(x, m):
    return (x + m - 1) // m * m


# --------------------------------------------------------------------------
# Kernels
# --------------------------------------------------------------------------
def _make_stats_kernel(n_convs, n_valid, tn, masked):
    """Kernel that recomputes conv/bn/relu layers 1..n_convs-1 plus
    conv_{n_convs} for one (batch, point-tile) block and writes the block's
    per-channel partial sum and sum-of-squares of the pre-BN conv output."""

    def kernel(*refs):
        i = 0
        x_ref = refs[i]; i += 1
        h = x_ref[...]                                        # (Cin, TN) bf16
        y = None
        for l in range(n_convs):
            w_ref = refs[i]; i += 1
            # 1x1 conv == W @ x on the MXU (bf16 operands, f32 accumulate).
            y = jnp.dot(w_ref[...], h, preferred_element_type=jnp.float32)
            if l < n_convs - 1:
                sc_ref, sh_ref = refs[i], refs[i + 1]; i += 2
                # BN folded into per-channel scale/shift (f32), then ReLU.
                h = jnp.maximum(y * sc_ref[...] + sh_ref[...], 0.0)
                h = h.astype(jnp.bfloat16)
        psum_ref, psq_ref = refs[i], refs[i + 1]
        if masked:
            # Zero the zero-padded point columns so they do not pollute the
            # batch statistics.
            col = tn * pl.program_id(1) + lax.broadcasted_iota(
                jnp.int32, (1, tn), 1)
            y = jnp.where(col < n_valid, y, 0.0)
        psum_ref[...] = jnp.sum(y, axis=1, keepdims=True)[None, None]
        psq_ref[...] = jnp.sum(y * y, axis=1, keepdims=True)[None, None]

    return kernel


def _fused_forward_kernel(x_ref, w1_ref, sc1_ref, sh1_ref,
                          w2_ref, sc2_ref, sh2_ref,
                          w3_ref, sc3_ref, sh3_ref,
                          w4_ref, b4_ref, o_ref):
    """Fully fused forward for one (batch, point-tile) block, NCW layout."""
    h = x_ref[...]                                            # (Cin, TN) bf16
    for w_ref, sc_ref, sh_ref in ((w1_ref, sc1_ref, sh1_ref),
                                  (w2_ref, sc2_ref, sh2_ref),
                                  (w3_ref, sc3_ref, sh3_ref)):
        y = jnp.dot(w_ref[...], h, preferred_element_type=jnp.float32)
        h = jnp.maximum(y * sc_ref[...] + sh_ref[...], 0.0).astype(jnp.bfloat16)
    y = jnp.dot(w4_ref[...], h, preferred_element_type=jnp.float32) + b4_ref[...]
    o_ref[...] = jnp.tanh(y).astype(o_ref.dtype)


# --------------------------------------------------------------------------
# Wrapper
# --------------------------------------------------------------------------
def pointgencon_forward(x, params, *, tn=512):
    """x: (B, C=bottleneck, N) float32 in NCW layout.  Returns (B, 3, N) f32."""
    (w1, b1, g1, be1,
     w2, b2, g2, be2,
     w3, b3, g3, be3,
     w4, b4) = params
    del b1, b2, b3    # cancelled exactly by BN mean subtraction

    B, C, N = x.shape
    c2, c3, c4 = w2.shape[0], w3.shape[0], w4.shape[0]

    tn = max(128, min(_round_up(tn, 128), _round_up(N, 128)))
    n_pad = _round_up(N, tn)
    nt = n_pad // tn
    masked = n_pad != N

    x_bf = x.astype(jnp.bfloat16)
    if masked:
        x_bf = jnp.pad(x_bf, ((0, 0), (0, 0), (0, n_pad - N)))

    w1b, w2b, w3b, w4b = (w.astype(jnp.bfloat16) for w in (w1, w2, w3, w4))
    b4c = b4.reshape(c4, 1).astype(jnp.float32)

    grid = (B, nt)
    dims = ("parallel", "parallel")
    x_spec = pl.BlockSpec((None, C, tn), lambda b, t: (b, 0, t))

    def _const_spec(shape):
        return pl.BlockSpec(shape, lambda b, t: tuple(0 for _ in shape))

    def _stats_spec(c):
        return pl.BlockSpec((1, 1, c, 1), lambda b, t: (b, t, 0, 0))

    n_points = B * N           # true per-channel count for batch statistics
    x_bytes = int(x_bf.size) * x_bf.dtype.itemsize

    def _bn_stats(n_convs, operands, c_out, macs_per_pt):
        kernel = _make_stats_kernel(n_convs, N, tn, masked)
        in_specs = [x_spec] + [_const_spec(op.shape) for op in operands[1:]]
        stats_shape = jax.ShapeDtypeStruct((B, nt, c_out, 1), jnp.float32)
        param_bytes = sum(int(op.size) * op.dtype.itemsize
                          for op in operands[1:])
        cost = pl.CostEstimate(
            flops=2 * B * n_pad * macs_per_pt,
            transcendentals=0,
            bytes_accessed=x_bytes + param_bytes + 2 * B * nt * c_out * 4)
        return pl.pallas_call(
            kernel,
            grid=grid,
            in_specs=in_specs,
            out_specs=(_stats_spec(c_out), _stats_spec(c_out)),
            out_shape=(stats_shape, stats_shape),
            compiler_params=pltpu.CompilerParams(dimension_semantics=dims),
            cost_estimate=cost,
        )(*operands)

    def _bn_affine(psum, psq, gamma, beta):
        mean = jnp.sum(psum, axis=(0, 1)) / n_points            # (C, 1)
        var = jnp.maximum(jnp.sum(psq, axis=(0, 1)) / n_points - mean * mean,
                          0.0)
        scale = gamma.reshape(-1, 1).astype(jnp.float32) * lax.rsqrt(var + BN_EPS)
        shift = beta.reshape(-1, 1).astype(jnp.float32) - mean * scale
        return scale, shift

    # ---- stats sweep 1: conv1 output ------------------------------------
    psum, psq = _bn_stats(1, (x_bf, w1b), C, C * C)
    sc1, sh1 = _bn_affine(psum, psq, g1, be1)

    # ---- stats sweep 2: conv2 output ------------------------------------
    psum, psq = _bn_stats(2, (x_bf, w1b, sc1, sh1, w2b), c2,
                          C * C + C * c2)
    sc2, sh2 = _bn_affine(psum, psq, g2, be2)

    # ---- stats sweep 3: conv3 output ------------------------------------
    psum, psq = _bn_stats(3, (x_bf, w1b, sc1, sh1, w2b, sc2, sh2, w3b), c3,
                          C * C + C * c2 + c2 * c3)
    sc3, sh3 = _bn_affine(psum, psq, g3, be3)

    # ---- final sweep: fused conv/bn/relu x3 + conv4 + tanh ---------------
    operands = (x_bf, w1b, sc1, sh1, w2b, sc2, sh2, w3b, sc3, sh3, w4b, b4c)
    in_specs = [x_spec] + [_const_spec(op.shape) for op in operands[1:]]
    macs = C * C + C * c2 + c2 * c3 + c3 * c4
    cost = pl.CostEstimate(
        flops=2 * B * n_pad * macs,
        transcendentals=c4 * B * n_pad,
        bytes_accessed=x_bytes + B * n_pad * c4 * 4)
    out_pad = pl.pallas_call(
        _fused_forward_kernel,
        grid=grid,
        in_specs=in_specs,
        out_specs=pl.BlockSpec((None, c4, tn), lambda b, t: (b, 0, t)),
        out_shape=jax.ShapeDtypeStruct((B, c4, n_pad), jnp.float32),
        compiler_params=pltpu.CompilerParams(dimension_semantics=dims),
        cost_estimate=cost,
    )(*operands)

    return out_pad[..., :N] if masked else out_pad


# --------------------------------------------------------------------------
# Parameters (PyTorch-shaped) and pure-JAX f32 reference
# --------------------------------------------------------------------------
def init_params(key, bottleneck_size=128):
    """Conv weights (Cout, Cin) (kernel dim squeezed), conv biases (Cout,),
    BN gamma=1 / beta=0 — matching PyTorch defaults."""
    c = bottleneck_size
    layer_dims = [(c, c), (c, c // 2), (c // 2, c // 4), (c // 4, 3)]
    params = []
    for i, (cin, cout) in enumerate(layer_dims):
        key, kw, kb = jax.random.split(key, 3)
        bound = cin ** -0.5
        w = jax.random.uniform(kw, (cout, cin), jnp.float32, -bound, bound)
        b = jax.random.uniform(kb, (cout,), jnp.float32, -bound, bound)
        params.extend([w, b])
        if i < 3:
            params.extend([jnp.ones((cout,), jnp.float32),
                           jnp.zeros((cout,), jnp.float32)])
    return tuple(params)


def pointgencon_reference(x, params):
    (w1, b1, g1, be1, w2, b2, g2, be2, w3, b3, g3, be3, w4, b4) = params

    def conv(h, w, b):
        return jnp.einsum('oc,bcn->bon', w, h) + b[None, :, None]

    def bn_relu(y, g, be):
        mean = jnp.mean(y, axis=(0, 2), keepdims=True)
        var = jnp.mean((y - mean) ** 2, axis=(0, 2), keepdims=True)
        yhat = (y - mean) * lax.rsqrt(var + BN_EPS)
        return jnp.maximum(yhat * g[None, :, None] + be[None, :, None], 0.0)

    h = bn_relu(conv(x, w1, b1), g1, be1)
    h = bn_relu(conv(h, w2, b2), g2, be2)
    h = bn_relu(conv(h, w3, b3), g3, be3)
    return jnp.tanh(conv(h, w4, b4))


# --------------------------------------------------------------------------
if __name__ == "__main__":
    bottleneck = 128
    key = jax.random.PRNGKey(0)
    params = init_params(key, bottleneck)

    fwd = jax.jit(pointgencon_forward)
    ref = jax.jit(pointgencon_reference)

    # Case 1: N a multiple of the tile size (fast path).
    # Case 2: ragged N exercising the pad + stats-masking path.
    for (B, N) in ((2, 512), (2, 200)):
        kx = jax.random.fold_in(key, N)
        x = jax.random.normal(kx, (B, bottleneck, N), jnp.float32)

        y = fwd(x, params)
        jax.block_until_ready(y)
        assert y.shape == (B, 3, N), y.shape

        y_ref = ref(x, params)
        err = float(jnp.max(jnp.abs(y - y_ref)))
        # Loose tolerance: kernel uses bf16 MXU operands (f32 accumulate).
        assert err < 0.15, f"max abs err {err} too large (B={B}, N={N})"

    print("KERNEL_OK")
</pallas_src>

<mosaic_0001>
module attributes {stable_mosaic.version = 11 : i64} {
  func.func @kernel(%arg0: i32, %arg1: i32, %arg2: memref<1x128x512xbf16, #tpu.memory_space<vmem>>, %arg3: memref<128x128xbf16, #tpu.memory_space<vmem>>, %arg4: memref<1x1x128x1xf32, #tpu.memory_space<vmem>>, %arg5: memref<1x1x128x1xf32, #tpu.memory_space<vmem>>) attributes {dimension_semantics = [#tpu.dimension_semantics<parallel>, #tpu.dimension_semantics<parallel>], iteration_bounds = array<i64: 2, 1>, scalar_prefetch = 0 : i64, scratch_operands = 0 : i64, tpu.core_type = #tpu.core_type<tc>, window_params = [{transform_indices = @transform_0, window_bounds = array<i64: 1, 128, 512>}, {pipeline_mode = #tpu.pipeline_mode<synchronous>, transform_indices = @transform_1, window_bounds = array<i64: 128, 128>}, {transform_indices = @transform_2, window_bounds = array<i64: 1, 1, 128, 1>}, {transform_indices = @transform_3, window_bounds = array<i64: 1, 1, 128, 1>}]} {
    %c0 = arith.constant 0 : index
    %c0_0 = arith.constant 0 : index
    %c0_1 = arith.constant 0 : index
    %0 = vector.load %arg2[%c0, %c0_0, %c0_1] : memref<1x128x512xbf16, #tpu.memory_space<vmem>>, vector<1x128x512xbf16>
    %1 = vector.shape_cast %0 : vector<1x128x512xbf16> to vector<128x512xbf16>
    %c0_2 = arith.constant 0 : index
    %c0_3 = arith.constant 0 : index
    %2 = vector.load %arg3[%c0_2, %c0_3] : memref<128x128xbf16, #tpu.memory_space<vmem>>, vector<128x128xbf16>
    %cst = arith.constant dense<0.000000e+00> : vector<128x512xf32>
    %3 = tpu.matmul %2, %1, %cst {dimension_numbers = #tpu.dot_dimension_numbers<[1], [0], [0], [1], [0, 0, 1, 1], [], []>} : vector<128x128xbf16>, vector<128x512xbf16>, vector<128x512xf32> -> vector<128x512xf32>
    %cst_4 = arith.constant dense<0.000000e+00> : vector<128xf32>
    %4 = vector.multi_reduction <add>, %3, %cst_4 [1] : vector<128x512xf32> to vector<128xf32>
    %5 = vector.shape_cast %4 : vector<128xf32> to vector<128x1xf32>
    %6 = vector.shape_cast %5 : vector<128x1xf32> to vector<1x1x128x1xf32>
    %c0_5 = arith.constant 0 : index
    %c0_6 = arith.constant 0 : index
    %c0_7 = arith.constant 0 : index
    %c0_8 = arith.constant 0 : index
    %7 = vector.load %arg4[%c0_5, %c0_6, %c0_7, %c0_8] : memref<1x1x128x1xf32, #tpu.memory_space<vmem>>, vector<1x1x128x1xf32>
    tpu.vector_store %arg4[%c0_5, %c0_6, %c0_7, %c0_8], %6 {strides = array<i32>} : memref<1x1x128x1xf32, #tpu.memory_space<vmem>>, vector<1x1x128x1xf32>,
    %8 = arith.mulf %3, %3 : vector<128x512xf32>
    %cst_9 = arith.constant dense<0.000000e+00> : vector<128xf32>
    %9 = vector.multi_reduction <add>, %8, %cst_9 [1] : vector<128x512xf32> to vector<128xf32>
    %10 = vector.shape_cast %9 : vector<128xf32> to vector<128x1xf32>
    %11 = vector.shape_cast %10 : vector<128x1xf32> to vector<1x1x128x1xf32>
    %c0_10 = arith.constant 0 : index
    %c0_11 = arith.constant 0 : index
    %c0_12 = arith.constant 0 : index
    %c0_13 = arith.constant 0 : index
    %12 = vector.load %arg5[%c0_10, %c0_11, %c0_12, %c0_13] : memref<1x1x128x1xf32, #tpu.memory_space<vmem>>, vector<1x1x128x1xf32>
    tpu.vector_store %arg5[%c0_10, %c0_11, %c0_12, %c0_13], %11 {strides = array<i32>} : memref<1x1x128x1xf32, #tpu.memory_space<vmem>>, vector<1x1x128x1xf32>,
    return
  }
  func.func @transform_0(%arg0: i32, %arg1: i32) -> (i32, i32, i32) {
    %c0_i32 = arith.constant 0 : i32
    %c0_i32_0 = arith.constant 0 : i32
    return %arg0, %c0_i32, %arg1 : i32, i32, i32
  }
  func.func @transform_1(%arg0: i32, %arg1: i32) -> (i32, i32) {
    %c0_i32 = arith.constant 0 : i32
    %c0_i32_0 = arith.constant 0 : i32
    %c0_i32_1 = arith.constant 0 : i32
    return %c0_i32, %c0_i32_0 : i32, i32
  }
  func.func @transform_2(%arg0: i32, %arg1: i32) -> (i32, i32, i32, i32) {
    %c0_i32 = arith.constant 0 : i32
    %c0_i32_0 = arith.constant 0 : i32
    %c0_i32_1 = arith.constant 0 : i32
    return %arg0, %arg1, %c0_i32, %c0_i32_0 : i32, i32, i32, i32
  }
  func.func @transform_3(%arg0: i32, %arg1: i32) -> (i32, i32, i32, i32) {
    %c0_i32 = arith.constant 0 : i32
    %c0_i32_0 = arith.constant 0 : i32
    %c0_i32_1 = arith.constant 0 : i32
    return %arg0, %arg1, %c0_i32, %c0_i32_0 : i32, i32, i32, i32
  }
}

module attributes {stable_mosaic.version = 11 : i64} {
  func.func @kernel(%arg0: i32, %arg1: i32, %arg2: memref<1x128x512xbf16, #tpu.memory_space<vmem>>, %arg3: memref<128x128xbf16, #tpu.memory_space<vmem>>, %arg4: memref<128x1xf32, #tpu.memory_space<vmem>>, %arg5: memref<128x1xf32, #tpu.memory_space<vmem>>, %arg6: memref<64x128xbf16, #tpu.memory_space<vmem>>, %arg7: memref<1x1x64x1xf32, #tpu.memory_space<vmem>>, %arg8: memref<1x1x64x1xf32, #tpu.memory_space<vmem>>) attributes {dimension_semantics = [#tpu.dimension_semantics<parallel>, #tpu.dimension_semantics<parallel>], iteration_bounds = array<i64: 2, 1>, scalar_prefetch = 0 : i64, scratch_operands = 0 : i64, tpu.core_type = #tpu.core_type<tc>, window_params = [{transform_indices = @transform_0, window_bounds = array<i64: 1, 128, 512>}, {pipeline_mode = #tpu.pipeline_mode<synchronous>, transform_indices = @transform_1, window_bounds = array<i64: 128, 128>}, {pipeline_mode = #tpu.pipeline_mode<synchronous>, transform_indices = @transform_2, window_bounds = array<i64: 128, 1>}, {pipeline_mode = #tpu.pipeline_mode<synchronous>, transform_indices = @transform_3, window_bounds = array<i64: 128, 1>}, {pipeline_mode = #tpu.pipeline_mode<synchronous>, transform_indices = @transform_4, window_bounds = array<i64: 64, 128>}, {transform_indices = @transform_5, window_bounds = array<i64: 1, 1, 64, 1>}, {transform_indices = @transform_6, window_bounds = array<i64: 1, 1, 64, 1>}]} {
    %c0 = arith.constant 0 : index
    %c0_0 = arith.constant 0 : index
    %c0_1 = arith.constant 0 : index
    %0 = vector.load %arg2[%c0, %c0_0, %c0_1] : memref<1x128x512xbf16, #tpu.memory_space<vmem>>, vector<1x128x512xbf16>
    %1 = vector.shape_cast %0 : vector<1x128x512xbf16> to vector<128x512xbf16>
    %c0_2 = arith.constant 0 : index
    %c0_3 = arith.constant 0 : index
    %2 = vector.load %arg3[%c0_2, %c0_3] : memref<128x128xbf16, #tpu.memory_space<vmem>>, vector<128x128xbf16>
    %cst = arith.constant dense<0.000000e+00> : vector<128x512xf32>
    %3 = tpu.matmul %2, %1, %cst {dimension_numbers = #tpu.dot_dimension_numbers<[1], [0], [0], [1], [0, 0, 1, 1], [], []>} : vector<128x128xbf16>, vector<128x512xbf16>, vector<128x512xf32> -> vector<128x512xf32>
    %c0_4 = arith.constant 0 : index
    %c0_5 = arith.constant 0 : index
    %4 = vector.load %arg4[%c0_4, %c0_5] : memref<128x1xf32, #tpu.memory_space<vmem>>, vector<128x1xf32>
    %5 = vector.broadcast %4 : vector<128x1xf32> to vector<128x512xf32>
    %6 = arith.mulf %3, %5 : vector<128x512xf32>
    %c0_6 = arith.constant 0 : index
    %c0_7 = arith.constant 0 : index
    %7 = vector.load %arg5[%c0_6, %c0_7] : memref<128x1xf32, #tpu.memory_space<vmem>>, vector<128x1xf32>
    %8 = vector.broadcast %7 : vector<128x1xf32> to vector<128x512xf32>
    %9 = arith.addf %6, %8 : vector<128x512xf32>
    %cst_8 = arith.constant 0.000000e+00 : f32
    %10 = vector.broadcast %cst_8 : f32 to vector<128x512xf32>
    %11 = arith.maximumf %9, %10 : vector<128x512xf32>
    %12 = arith.truncf %11 : vector<128x512xf32> to vector<128x512xbf16>
    %c0_9 = arith.constant 0 : index
    %c0_10 = arith.constant 0 : index
    %13 = vector.load %arg6[%c0_9, %c0_10] : memref<64x128xbf16, #tpu.memory_space<vmem>>, vector<64x128xbf16>
    %cst_11 = arith.constant dense<0.000000e+00> : vector<64x512xf32>
    %14 = tpu.matmul %13, %12, %cst_11 {dimension_numbers = #tpu.dot_dimension_numbers<[1], [0], [0], [1], [0, 0, 1, 1], [], []>} : vector<64x128xbf16>, vector<128x512xbf16>, vector<64x512xf32> -> vector<64x512xf32>
    %cst_12 = arith.constant dense<0.000000e+00> : vector<64xf32>
    %15 = vector.multi_reduction <add>, %14, %cst_12 [1] : vector<64x512xf32> to vector<64xf32>
    %16 = vector.shape_cast %15 : vector<64xf32> to vector<64x1xf32>
    %17 = vector.shape_cast %16 : vector<64x1xf32> to vector<1x1x64x1xf32>
    %c0_13 = arith.constant 0 : index
    %c0_14 = arith.constant 0 : index
    %c0_15 = arith.constant 0 : index
    %c0_16 = arith.constant 0 : index
    %18 = vector.load %arg7[%c0_13, %c0_14, %c0_15, %c0_16] : memref<1x1x64x1xf32, #tpu.memory_space<vmem>>, vector<1x1x64x1xf32>
    tpu.vector_store %arg7[%c0_13, %c0_14, %c0_15, %c0_16], %17 {strides = array<i32>} : memref<1x1x64x1xf32, #tpu.memory_space<vmem>>, vector<1x1x64x1xf32>,
    %19 = arith.mulf %14, %14 : vector<64x512xf32>
    %cst_17 = arith.constant dense<0.000000e+00> : vector<64xf32>
    %20 = vector.multi_reduction <add>, %19, %cst_17 [1] : vector<64x512xf32> to vector<64xf32>
    %21 = vector.shape_cast %20 : vector<64xf32> to vector<64x1xf32>
    %22 = vector.shape_cast %21 : vector<64x1xf32> to vector<1x1x64x1xf32>
    %c0_18 = arith.constant 0 : index
    %c0_19 = arith.constant 0 : index
    %c0_20 = arith.constant 0 : index
    %c0_21 = arith.constant 0 : index
    %23 = vector.load %arg8[%c0_18, %c0_19, %c0_20, %c0_21] : memref<1x1x64x1xf32, #tpu.memory_space<vmem>>, vector<1x1x64x1xf32>
    tpu.vector_store %arg8[%c0_18, %c0_19, %c0_20, %c0_21], %22 {strides = array<i32>} : memref<1x1x64x1xf32, #tpu.memory_space<vmem>>, vector<1x1x64x1xf32>,
    return
  }
  func.func @transform_0(%arg0: i32, %arg1: i32) -> (i32, i32, i32) {
    %c0_i32 = arith.constant 0 : i32
    %c0_i32_0 = arith.constant 0 : i32
    return %arg0, %c0_i32, %arg1 : i32, i32, i32
  }
  func.func @transform_1(%arg0: i32, %arg1: i32) -> (i32, i32) {
    %c0_i32 = arith.constant 0 : i32
    %c0_i32_0 = arith.constant 0 : i32
    %c0_i32_1 = arith.constant 0 : i32
    return %c0_i32, %c0_i32_0 : i32, i32
  }
  func.func @transform_2(%arg0: i32, %arg1: i32) -> (i32, i32) {
    %c0_i32 = arith.constant 0 : i32
    %c0_i32_0 = arith.constant 0 : i32
    %c0_i32_1 = arith.constant 0 : i32
    return %c0_i32, %c0_i32_0 : i32, i32
  }
  func.func @transform_3(%arg0: i32, %arg1: i32) -> (i32, i32) {
    %c0_i32 = arith.constant 0 : i32
    %c0_i32_0 = arith.constant 0 : i32
    %c0_i32_1 = arith.constant 0 : i32
    return %c0_i32, %c0_i32_0 : i32, i32
  }
  func.func @transform_4(%arg0: i32, %arg1: i32) -> (i32, i32) {
    %c0_i32 = arith.constant 0 : i32
    %c0_i32_0 = arith.constant 0 : i32
    %c0_i32_1 = arith.constant 0 : i32
    return %c0_i32, %c0_i32_0 : i32, i32
  }
  func.func @transform_5(%arg0: i32, %arg1: i32) -> (i32, i32, i32, i32) {
    %c0_i32 = arith.constant 0 : i32
    %c0_i32_0 = arith.constant 0 : i32
    %c0_i32_1 = arith.constant 0 : i32
    return %arg0, %arg1, %c0_i32, %c0_i32_0 : i32, i32, i32, i32
  }
  func.func @transform_6(%arg0: i32, %arg1: i32) -> (i32, i32, i32, i32) {
    %c0_i32 = arith.constant 0 : i32
    %c0_i32_0 = arith.constant 0 : i32
    %c0_i32_1 = arith.constant 0 : i32
    return %arg0, %arg1, %c0_i32, %c0_i32_0 : i32, i32, i32, i32
  }
}

module attributes {stable_mosaic.version = 11 : i64} {
  func.func @kernel(%arg0: i32, %arg1: i32, %arg2: memref<1x128x512xbf16, #tpu.memory_space<vmem>>, %arg3: memref<128x128xbf16, #tpu.memory_space<vmem>>, %arg4: memref<128x1xf32, #tpu.memory_space<vmem>>, %arg5: memref<128x1xf32, #tpu.memory_space<vmem>>, %arg6: memref<64x128xbf16, #tpu.memory_space<vmem>>, %arg7: memref<64x1xf32, #tpu.memory_space<vmem>>, %arg8: memref<64x1xf32, #tpu.memory_space<vmem>>, %arg9: memref<32x64xbf16, #tpu.memory_space<vmem>>, %arg10: memref<1x1x32x1xf32, #tpu.memory_space<vmem>>, %arg11: memref<1x1x32x1xf32, #tpu.memory_space<vmem>>) attributes {dimension_semantics = [#tpu.dimension_semantics<parallel>, #tpu.dimension_semantics<parallel>], iteration_bounds = array<i64: 2, 1>, scalar_prefetch = 0 : i64, scratch_operands = 0 : i64, tpu.core_type = #tpu.core_type<tc>, window_params = [{transform_indices = @transform_0, window_bounds = array<i64: 1, 128, 512>}, {pipeline_mode = #tpu.pipeline_mode<synchronous>, transform_indices = @transform_1, window_bounds = array<i64: 128, 128>}, {pipeline_mode = #tpu.pipeline_mode<synchronous>, transform_indices = @transform_2, window_bounds = array<i64: 128, 1>}, {pipeline_mode = #tpu.pipeline_mode<synchronous>, transform_indices = @transform_3, window_bounds = array<i64: 128, 1>}, {pipeline_mode = #tpu.pipeline_mode<synchronous>, transform_indices = @transform_4, window_bounds = array<i64: 64, 128>}, {pipeline_mode = #tpu.pipeline_mode<synchronous>, transform_indices = @transform_5, window_bounds = array<i64: 64, 1>}, {pipeline_mode = #tpu.pipeline_mode<synchronous>, transform_indices = @transform_6, window_bounds = array<i64: 64, 1>}, {pipeline_mode = #tpu.pipeline_mode<synchronous>, transform_indices = @transform_7, window_bounds = array<i64: 32, 64>}, {transform_indices = @transform_8, window_bounds = array<i64: 1, 1, 32, 1>}, {transform_indices = @transform_9, window_bounds = array<i64: 1, 1, 32, 1>}]} {
    %c0 = arith.constant 0 : index
    %c0_0 = arith.constant 0 : index
    %c0_1 = arith.constant 0 : index
    %0 = vector.load %arg2[%c0, %c0_0, %c0_1] : memref<1x128x512xbf16, #tpu.memory_space<vmem>>, vector<1x128x512xbf16>
    %1 = vector.shape_cast %0 : vector<1x128x512xbf16> to vector<128x512xbf16>
    %c0_2 = arith.constant 0 : index
    %c0_3 = arith.constant 0 : index
    %2 = vector.load %arg3[%c0_2, %c0_3] : memref<128x128xbf16, #tpu.memory_space<vmem>>, vector<128x128xbf16>
    %cst = arith.constant dense<0.000000e+00> : vector<128x512xf32>
    %3 = tpu.matmul %2, %1, %cst {dimension_numbers = #tpu.dot_dimension_numbers<[1], [0], [0], [1], [0, 0, 1, 1], [], []>} : vector<128x128xbf16>, vector<128x512xbf16>, vector<128x512xf32> -> vector<128x512xf32>
    %c0_4 = arith.constant 0 : index
    %c0_5 = arith.constant 0 : index
    %4 = vector.load %arg4[%c0_4, %c0_5] : memref<128x1xf32, #tpu.memory_space<vmem>>, vector<128x1xf32>
    %5 = vector.broadcast %4 : vector<128x1xf32> to vector<128x512xf32>
    %6 = arith.mulf %3, %5 : vector<128x512xf32>
    %c0_6 = arith.constant 0 : index
    %c0_7 = arith.constant 0 : index
    %7 = vector.load %arg5[%c0_6, %c0_7] : memref<128x1xf32, #tpu.memory_space<vmem>>, vector<128x1xf32>
    %8 = vector.broadcast %7 : vector<128x1xf32> to vector<128x512xf32>
    %9 = arith.addf %6, %8 : vector<128x512xf32>
    %cst_8 = arith.constant 0.000000e+00 : f32
    %10 = vector.broadcast %cst_8 : f32 to vector<128x512xf32>
    %11 = arith.maximumf %9, %10 : vector<128x512xf32>
    %12 = arith.truncf %11 : vector<128x512xf32> to vector<128x512xbf16>
    %c0_9 = arith.constant 0 : index
    %c0_10 = arith.constant 0 : index
    %13 = vector.load %arg6[%c0_9, %c0_10] : memref<64x128xbf16, #tpu.memory_space<vmem>>, vector<64x128xbf16>
    %cst_11 = arith.constant dense<0.000000e+00> : vector<64x512xf32>
    %14 = tpu.matmul %13, %12, %cst_11 {dimension_numbers = #tpu.dot_dimension_numbers<[1], [0], [0], [1], [0, 0, 1, 1], [], []>} : vector<64x128xbf16>, vector<128x512xbf16>, vector<64x512xf32> -> vector<64x512xf32>
    %c0_12 = arith.constant 0 : index
    %c0_13 = arith.constant 0 : index
    %15 = vector.load %arg7[%c0_12, %c0_13] : memref<64x1xf32, #tpu.memory_space<vmem>>, vector<64x1xf32>
    %16 = vector.broadcast %15 : vector<64x1xf32> to vector<64x512xf32>
    %17 = arith.mulf %14, %16 : vector<64x512xf32>
    %c0_14 = arith.constant 0 : index
    %c0_15 = arith.constant 0 : index
    %18 = vector.load %arg8[%c0_14, %c0_15] : memref<64x1xf32, #tpu.memory_space<vmem>>, vector<64x1xf32>
    %19 = vector.broadcast %18 : vector<64x1xf32> to vector<64x512xf32>
    %20 = arith.addf %17, %19 : vector<64x512xf32>
    %cst_16 = arith.constant 0.000000e+00 : f32
    %21 = vector.broadcast %cst_16 : f32 to vector<64x512xf32>
    %22 = arith.maximumf %20, %21 : vector<64x512xf32>
    %23 = arith.truncf %22 : vector<64x512xf32> to vector<64x512xbf16>
    %c0_17 = arith.constant 0 : index
    %c0_18 = arith.constant 0 : index
    %24 = vector.load %arg9[%c0_17, %c0_18] : memref<32x64xbf16, #tpu.memory_space<vmem>>, vector<32x64xbf16>
    %cst_19 = arith.constant dense<0.000000e+00> : vector<32x512xf32>
    %25 = tpu.matmul %24, %23, %cst_19 {dimension_numbers = #tpu.dot_dimension_numbers<[1], [0], [0], [1], [0, 0, 1, 1], [], []>} : vector<32x64xbf16>, vector<64x512xbf16>, vector<32x512xf32> -> vector<32x512xf32>
    %cst_20 = arith.constant dense<0.000000e+00> : vector<32xf32>
    %26 = vector.multi_reduction <add>, %25, %cst_20 [1] : vector<32x512xf32> to vector<32xf32>
    %27 = vector.shape_cast %26 : vector<32xf32> to vector<32x1xf32>
    %28 = vector.shape_cast %27 : vector<32x1xf32> to vector<1x1x32x1xf32>
    %c0_21 = arith.constant 0 : index
    %c0_22 = arith.constant 0 : index
    %c0_23 = arith.constant 0 : index
    %c0_24 = arith.constant 0 : index
    %29 = vector.load %arg10[%c0_21, %c0_22, %c0_23, %c0_24] : memref<1x1x32x1xf32, #tpu.memory_space<vmem>>, vector<1x1x32x1xf32>
    tpu.vector_store %arg10[%c0_21, %c0_22, %c0_23, %c0_24], %28 {strides = array<i32>} : memref<1x1x32x1xf32, #tpu.memory_space<vmem>>, vector<1x1x32x1xf32>,
    %30 = arith.mulf %25, %25 : vector<32x512xf32>
    %cst_25 = arith.constant dense<0.000000e+00> : vector<32xf32>
    %31 = vector.multi_reduction <add>, %30, %cst_25 [1] : vector<32x512xf32> to vector<32xf32>
    %32 = vector.shape_cast %31 : vector<32xf32> to vector<32x1xf32>
    %33 = vector.shape_cast %32 : vector<32x1xf32> to vector<1x1x32x1xf32>
    %c0_26 = arith.constant 0 : index
    %c0_27 = arith.constant 0 : index
    %c0_28 = arith.constant 0 : index
    %c0_29 = arith.constant 0 : index
    %34 = vector.load %arg11[%c0_26, %c0_27, %c0_28, %c0_29] : memref<1x1x32x1xf32, #tpu.memory_space<vmem>>, vector<1x1x32x1xf32>
    tpu.vector_store %arg11[%c0_26, %c0_27, %c0_28, %c0_29], %33 {strides = array<i32>} : memref<1x1x32x1xf32, #tpu.memory_space<vmem>>, vector<1x1x32x1xf32>,
    return
  }
  func.func @transform_0(%arg0: i32, %arg1: i32) -> (i32, i32, i32) {
    %c0_i32 = arith.constant 0 : i32
    %c0_i32_0 = arith.constant 0 : i32
    return %arg0, %c0_i32, %arg1 : i32, i32, i32
  }
  func.func @transform_1(%arg0: i32, %arg1: i32) -> (i32, i32) {
    %c0_i32 = arith.constant 0 : i32
    %c0_i32_0 = arith.constant 0 : i32
    %c0_i32_1 = arith.constant 0 : i32
    return %c0_i32, %c0_i32_0 : i32, i32
  }
  func.func @transform_2(%arg0: i32, %arg1: i32) -> (i32, i32) {
    %c0_i32 = arith.constant 0 : i32
    %c0_i32_0 = arith.constant 0 : i32
    %c0_i32_1 = arith.constant 0 : i32
    return %c0_i32, %c0_i32_0 : i32, i32
  }
  func.func @transform_3(%arg0: i32, %arg1: i32) -> (i32, i32) {
    %c0_i32 = arith.constant 0 : i32
    %c0_i32_0 = arith.constant 0 : i32
    %c0_i32_1 = arith.constant 0 : i32
    return %c0_i32, %c0_i32_0 : i32, i32
  }
  func.func @transform_4(%arg0: i32, %arg1: i32) -> (i32, i32) {
    %c0_i32 = arith.constant 0 : i32
    %c0_i32_0 = arith.constant 0 : i32
    %c0_i32_1 = arith.constant 0 : i32
    return %c0_i32, %c0_i32_0 : i32, i32
  }
  func.func @transform_5(%arg0: i32, %arg1: i32) -> (i32, i32) {
    %c0_i32 = arith.constant 0 : i32
    %c0_i32_0 = arith.constant 0 : i32
    %c0_i32_1 = arith.constant 0 : i32
    return %c0_i32, %c0_i32_0 : i32, i32
  }
  func.func @transform_6(%arg0: i32, %arg1: i32) -> (i32, i32) {
    %c0_i32 = arith.constant 0 : i32
    %c0_i32_0 = arith.constant 0 : i32
    %c0_i32_1 = arith.constant 0 : i32
    return %c0_i32, %c0_i32_0 : i32, i32
  }
  func.func @transform_7(%arg0: i32, %arg1: i32) -> (i32, i32) {
    %c0_i32 = arith.constant 0 : i32
    %c0_i32_0 = arith.constant 0 : i32
    %c0_i32_1 = arith.constant 0 : i32
    return %c0_i32, %c0_i32_0 : i32, i32
  }
  func.func @transform_8(%arg0: i32, %arg1: i32) -> (i32, i32, i32, i32) {
    %c0_i32 = arith.constant 0 : i32
    %c0_i32_0 = arith.constant 0 : i32
    %c0_i32_1 = arith.constant 0 : i32
    return %arg0, %arg1, %c0_i32, %c0_i32_0 : i32, i32, i32, i32
  }
  func.func @transform_9(%arg0: i32, %arg1: i32) -> (i32, i32, i32, i32) {
    %c0_i32 = arith.constant 0 : i32
    %c0_i32_0 = arith.constant 0 : i32
    %c0_i32_1 = arith.constant 0 : i32
    return %arg0, %arg1, %c0_i32, %c0_i32_0 : i32, i32, i32, i32
  }
}

module attributes {stable_mosaic.version = 11 : i64} {
  func.func @_fused_forward_kernel(%arg0: i32, %arg1: i32, %arg2: memref<1x128x512xbf16, #tpu.memory_space<vmem>>, %arg3: memref<128x128xbf16, #tpu.memory_space<vmem>>, %arg4: memref<128x1xf32, #tpu.memory_space<vmem>>, %arg5: memref<128x1xf32, #tpu.memory_space<vmem>>, %arg6: memref<64x128xbf16, #tpu.memory_space<vmem>>, %arg7: memref<64x1xf32, #tpu.memory_space<vmem>>, %arg8: memref<64x1xf32, #tpu.memory_space<vmem>>, %arg9: memref<32x64xbf16, #tpu.memory_space<vmem>>, %arg10: memref<32x1xf32, #tpu.memory_space<vmem>>, %arg11: memref<32x1xf32, #tpu.memory_space<vmem>>, %arg12: memref<3x32xbf16, #tpu.memory_space<vmem>>, %arg13: memref<3x1xf32, #tpu.memory_space<vmem>>, %arg14: memref<1x3x512xf32, #tpu.memory_space<vmem>>) attributes {dimension_semantics = [#tpu.dimension_semantics<parallel>, #tpu.dimension_semantics<parallel>], iteration_bounds = array<i64: 2, 1>, scalar_prefetch = 0 : i64, scratch_operands = 0 : i64, tpu.core_type = #tpu.core_type<tc>, window_params = [{transform_indices = @transform_0, window_bounds = array<i64: 1, 128, 512>}, {pipeline_mode = #tpu.pipeline_mode<synchronous>, transform_indices = @transform_1, window_bounds = array<i64: 128, 128>}, {pipeline_mode = #tpu.pipeline_mode<synchronous>, transform_indices = @transform_2, window_bounds = array<i64: 128, 1>}, {pipeline_mode = #tpu.pipeline_mode<synchronous>, transform_indices = @transform_3, window_bounds = array<i64: 128, 1>}, {pipeline_mode = #tpu.pipeline_mode<synchronous>, transform_indices = @transform_4, window_bounds = array<i64: 64, 128>}, {pipeline_mode = #tpu.pipeline_mode<synchronous>, transform_indices = @transform_5, window_bounds = array<i64: 64, 1>}, {pipeline_mode = #tpu.pipeline_mode<synchronous>, transform_indices = @transform_6, window_bounds = array<i64: 64, 1>}, {pipeline_mode = #tpu.pipeline_mode<synchronous>, transform_indices = @transform_7, window_bounds = array<i64: 32, 64>}, {pipeline_mode = #tpu.pipeline_mode<synchronous>, transform_indices = @transform_8, window_bounds = array<i64: 32, 1>}, {pipeline_mode = #tpu.pipeline_mode<synchronous>, transform_indices = @transform_9, window_bounds = array<i64: 32, 1>}, {pipeline_mode = #tpu.pipeline_mode<synchronous>, transform_indices = @transform_10, window_bounds = array<i64: 3, 32>}, {pipeline_mode = #tpu.pipeline_mode<synchronous>, transform_indices = @transform_11, window_bounds = array<i64: 3, 1>}, {transform_indices = @transform_12, window_bounds = array<i64: 1, 3, 512>}]} {
    %c0 = arith.constant 0 : index
    %c0_0 = arith.constant 0 : index
    %c0_1 = arith.constant 0 : index
    %0 = vector.load %arg2[%c0, %c0_0, %c0_1] : memref<1x128x512xbf16, #tpu.memory_space<vmem>>, vector<1x128x512xbf16>
    %1 = vector.shape_cast %0 : vector<1x128x512xbf16> to vector<128x512xbf16>
    %c0_2 = arith.constant 0 : index
    %c0_3 = arith.constant 0 : index
    %2 = vector.load %arg3[%c0_2, %c0_3] : memref<128x128xbf16, #tpu.memory_space<vmem>>, vector<128x128xbf16>
    %cst = arith.constant dense<0.000000e+00> : vector<128x512xf32>
    %3 = tpu.matmul %2, %1, %cst {dimension_numbers = #tpu.dot_dimension_numbers<[1], [0], [0], [1], [0, 0, 1, 1], [], []>} : vector<128x128xbf16>, vector<128x512xbf16>, vector<128x512xf32> -> vector<128x512xf32>
    %c0_4 = arith.constant 0 : index
    %c0_5 = arith.constant 0 : index
    %4 = vector.load %arg4[%c0_4, %c0_5] : memref<128x1xf32, #tpu.memory_space<vmem>>, vector<128x1xf32>
    %5 = vector.broadcast %4 : vector<128x1xf32> to vector<128x512xf32>
    %6 = arith.mulf %3, %5 : vector<128x512xf32>
    %c0_6 = arith.constant 0 : index
    %c0_7 = arith.constant 0 : index
    %7 = vector.load %arg5[%c0_6, %c0_7] : memref<128x1xf32, #tpu.memory_space<vmem>>, vector<128x1xf32>
    %8 = vector.broadcast %7 : vector<128x1xf32> to vector<128x512xf32>
    %9 = arith.addf %6, %8 : vector<128x512xf32>
    %cst_8 = arith.constant 0.000000e+00 : f32
    %10 = vector.broadcast %cst_8 : f32 to vector<128x512xf32>
    %11 = arith.maximumf %9, %10 : vector<128x512xf32>
    %12 = arith.truncf %11 : vector<128x512xf32> to vector<128x512xbf16>
    %c0_9 = arith.constant 0 : index
    %c0_10 = arith.constant 0 : index
    %13 = vector.load %arg6[%c0_9, %c0_10] : memref<64x128xbf16, #tpu.memory_space<vmem>>, vector<64x128xbf16>
    %cst_11 = arith.constant dense<0.000000e+00> : vector<64x512xf32>
    %14 = tpu.matmul %13, %12, %cst_11 {dimension_numbers = #tpu.dot_dimension_numbers<[1], [0], [0], [1], [0, 0, 1, 1], [], []>} : vector<64x128xbf16>, vector<128x512xbf16>, vector<64x512xf32> -> vector<64x512xf32>
    %c0_12 = arith.constant 0 : index
    %c0_13 = arith.constant 0 : index
    %15 = vector.load %arg7[%c0_12, %c0_13] : memref<64x1xf32, #tpu.memory_space<vmem>>, vector<64x1xf32>
    %16 = vector.broadcast %15 : vector<64x1xf32> to vector<64x512xf32>
    %17 = arith.mulf %14, %16 : vector<64x512xf32>
    %c0_14 = arith.constant 0 : index
    %c0_15 = arith.constant 0 : index
    %18 = vector.load %arg8[%c0_14, %c0_15] : memref<64x1xf32, #tpu.memory_space<vmem>>, vector<64x1xf32>
    %19 = vector.broadcast %18 : vector<64x1xf32> to vector<64x512xf32>
    %20 = arith.addf %17, %19 : vector<64x512xf32>
    %cst_16 = arith.constant 0.000000e+00 : f32
    %21 = vector.broadcast %cst_16 : f32 to vector<64x512xf32>
    %22 = arith.maximumf %20, %21 : vector<64x512xf32>
    %23 = arith.truncf %22 : vector<64x512xf32> to vector<64x512xbf16>
    %c0_17 = arith.constant 0 : index
    %c0_18 = arith.constant 0 : index
    %24 = vector.load %arg9[%c0_17, %c0_18] : memref<32x64xbf16, #tpu.memory_space<vmem>>, vector<32x64xbf16>
    %cst_19 = arith.constant dense<0.000000e+00> : vector<32x512xf32>
    %25 = tpu.matmul %24, %23, %cst_19 {dimension_numbers = #tpu.dot_dimension_numbers<[1], [0], [0], [1], [0, 0, 1, 1], [], []>} : vector<32x64xbf16>, vector<64x512xbf16>, vector<32x512xf32> -> vector<32x512xf32>
    %c0_20 = arith.constant 0 : index
    %c0_21 = arith.constant 0 : index
    %26 = vector.load %arg10[%c0_20, %c0_21] : memref<32x1xf32, #tpu.memory_space<vmem>>, vector<32x1xf32>
    %27 = vector.broadcast %26 : vector<32x1xf32> to vector<32x512xf32>
    %28 = arith.mulf %25, %27 : vector<32x512xf32>
    %c0_22 = arith.constant 0 : index
    %c0_23 = arith.constant 0 : index
    %29 = vector.load %arg11[%c0_22, %c0_23] : memref<32x1xf32, #tpu.memory_space<vmem>>, vector<32x1xf32>
    %30 = vector.broadcast %29 : vector<32x1xf32> to vector<32x512xf32>
    %31 = arith.addf %28, %30 : vector<32x512xf32>
    %cst_24 = arith.constant 0.000000e+00 : f32
    %32 = vector.broadcast %cst_24 : f32 to vector<32x512xf32>
    %33 = arith.maximumf %31, %32 : vector<32x512xf32>
    %34 = arith.truncf %33 : vector<32x512xf32> to vector<32x512xbf16>
    %c0_25 = arith.constant 0 : index
    %c0_26 = arith.constant 0 : index
    %35 = vector.load %arg12[%c0_25, %c0_26] : memref<3x32xbf16, #tpu.memory_space<vmem>>, vector<3x32xbf16>
    %cst_27 = arith.constant dense<0.000000e+00> : vector<3x512xf32>
    %36 = tpu.matmul %35, %34, %cst_27 {dimension_numbers = #tpu.dot_dimension_numbers<[1], [0], [0], [1], [0, 0, 1, 1], [], []>} : vector<3x32xbf16>, vector<32x512xbf16>, vector<3x512xf32> -> vector<3x512xf32>
    %c0_28 = arith.constant 0 : index
    %c0_29 = arith.constant 0 : index
    %37 = vector.load %arg13[%c0_28, %c0_29] : memref<3x1xf32, #tpu.memory_space<vmem>>, vector<3x1xf32>
    %38 = vector.broadcast %37 : vector<3x1xf32> to vector<3x512xf32>
    %39 = arith.addf %36, %38 : vector<3x512xf32>
    %40 = math.tanh %39 : vector<3x512xf32>
    %c0_30 = arith.constant 0 : index
    %c0_31 = arith.constant 0 : index
    %c0_32 = arith.constant 0 : index
    %41 = vector.load %arg14[%c0_30, %c0_31, %c0_32] : memref<1x3x512xf32, #tpu.memory_space<vmem>>, vector<1x3x512xf32>
    %42 = vector.shape_cast %41 : vector<1x3x512xf32> to vector<3x512xf32>
    %43 = vector.shape_cast %40 : vector<3x512xf32> to vector<1x3x512xf32>
    tpu.vector_store %arg14[%c0_30, %c0_31, %c0_32], %43 {strides = array<i32>} : memref<1x3x512xf32, #tpu.memory_space<vmem>>, vector<1x3x512xf32>,
    return
  }
  func.func @transform_0(%arg0: i32, %arg1: i32) -> (i32, i32, i32) {
    %c0_i32 = arith.constant 0 : i32
    %c0_i32_0 = arith.constant 0 : i32
    return %arg0, %c0_i32, %arg1 : i32, i32, i32
  }
  func.func @transform_1(%arg0: i32, %arg1: i32) -> (i32, i32) {
    %c0_i32 = arith.constant 0 : i32
    %c0_i32_0 = arith.constant 0 : i32
    %c0_i32_1 = arith.constant 0 : i32
    return %c0_i32, %c0_i32_0 : i32, i32
  }
  func.func @transform_2(%arg0: i32, %arg1: i32) -> (i32, i32) {
    %c0_i32 = arith.constant 0 : i32
    %c0_i32_0 = arith.constant 0 : i32
    %c0_i32_1 = arith.constant 0 : i32
    return %c0_i32, %c0_i32_0 : i32, i32
  }
  func.func @transform_3(%arg0: i32, %arg1: i32) -> (i32, i32) {
    %c0_i32 = arith.constant 0 : i32
    %c0_i32_0 = arith.constant 0 : i32
    %c0_i32_1 = arith.constant 0 : i32
    return %c0_i32, %c0_i32_0 : i32, i32
  }
  func.func @transform_4(%arg0: i32, %arg1: i32) -> (i32, i32) {
    %c0_i32 = arith.constant 0 : i32
    %c0_i32_0 = arith.constant 0 : i32
    %c0_i32_1 = arith.constant 0 : i32
    return %c0_i32, %c0_i32_0 : i32, i32
  }
  func.func @transform_5(%arg0: i32, %arg1: i32) -> (i32, i32) {
    %c0_i32 = arith.constant 0 : i32
    %c0_i32_0 = arith.constant 0 : i32
    %c0_i32_1 = arith.constant 0 : i32
    return %c0_i32, %c0_i32_0 : i32, i32
  }
  func.func @transform_6(%arg0: i32, %arg1: i32) -> (i32, i32) {
    %c0_i32 = arith.constant 0 : i32
    %c0_i32_0 = arith.constant 0 : i32
    %c0_i32_1 = arith.constant 0 : i32
    return %c0_i32, %c0_i32_0 : i32, i32
  }
  func.func @transform_7(%arg0: i32, %arg1: i32) -> (i32, i32) {
    %c0_i32 = arith.constant 0 : i32
    %c0_i32_0 = arith.constant 0 : i32
    %c0_i32_1 = arith.constant 0 : i32
    return %c0_i32, %c0_i32_0 : i32, i32
  }
  func.func @transform_8(%arg0: i32, %arg1: i32) -> (i32, i32) {
    %c0_i32 = arith.constant 0 : i32
    %c0_i32_0 = arith.constant 0 : i32
    %c0_i32_1 = arith.constant 0 : i32
    return %c0_i32, %c0_i32_0 : i32, i32
  }
  func.func @transform_9(%arg0: i32, %arg1: i32) -> (i32, i32) {
    %c0_i32 = arith.constant 0 : i32
    %c0_i32_0 = arith.constant 0 : i32
    %c0_i32_1 = arith.constant 0 : i32
    return %c0_i32, %c0_i32_0 : i32, i32
  }
  func.func @transform_10(%arg0: i32, %arg1: i32) -> (i32, i32) {
    %c0_i32 = arith.constant 0 : i32
    %c0_i32_0 = arith.constant 0 : i32
    %c0_i32_1 = arith.constant 0 : i32
    return %c0_i32, %c0_i32_0 : i32, i32
  }
  func.func @transform_11(%arg0: i32, %arg1: i32) -> (i32, i32) {
    %c0_i32 = arith.constant 0 : i32
    %c0_i32_0 = arith.constant 0 : i32
    %c0_i32_1 = arith.constant 0 : i32
    return %c0_i32, %c0_i32_0 : i32, i32
  }
  func.func @transform_12(%arg0: i32, %arg1: i32) -> (i32, i32, i32) {
    %c0_i32 = arith.constant 0 : i32
    %c0_i32_0 = arith.constant 0 : i32
    return %arg0, %c0_i32, %arg1 : i32, i32, i32
  }
}

</mosaic_0001>

<bundles_post_ra>
// kernel: pointgencon_forward.4
= control target key start
LH: loop header
LB: loop body
LE: loop exit
PB: predicated region body
PF: predicated region fallthrough
CT: control target
= control target key end

     0   :  { %s1296_s12 = smov 0   ;;  %s1298_s13 = smov 0   ;;  %s1478_s0 = inlined_call_operand.vmem [shape: bf16[2,128,512], index: 0, kind: input, shape index: {}]   ;;  %s1479_s1 = inlined_call_operand.vmem [shape: bf16[128,128], index: 1, kind: input, shape index: {}]   ;;  %s1480_s2 = inlined_call_operand.vmem [shape: f32[2,1,128,1], index: 2, kind: output, shape index: {0}]   ;;  %s1481_s3 = inlined_call_operand.vmem [shape: f32[2,1,128,1], index: 3, kind: output, shape index: {1}]  }
   0x1   :  { %s1300_s14 = smov 0  }
   0x2 LB: > { %s26_s15 = sadd.s32 1, %s1269_s13  ;;  %p1118_p0 = scmp.ge.s32.totalorder %s1273_s14, 1  ;;  %s1273_s14 = sphi %s1300_s14, %s14_s14   ;;  %s1269_s13 = sphi %s1298_s13, %s1483_s13   ;;  %s1265_s12 = sphi %s1296_s12, %s1482_s12  }
   0x3   : > { %p28_p1 = scmp.ge.s32.totalorder %s26_s15, 2  ;;  %p163_p2 = scmp.lt.s32.totalorder %s1273_s14, 3 }
   0x5   : > { %s1485_s15 = smov (%p28_p1, %s26_s15), 0  ;;  %p164_p3 = pnand %p1118_p0, %p163_p2 }
   0x6   : > { %p205_p4 = scmp.lt.s32.totalorder (!%p164_p3), %s1265_s12, 1  ;;  %v1275_v0 = vmov (!%p164_p3), 0   ;;  %v1243_v33 = vld [vmem:[%s1479_s1] sm:$0xff] (!%p164_p3)   ;;  %v1244_v34 = vld [vmem:[%s1479_s1 + $0x8] sm:$0xff] (!%p164_p3)   ;;  %v1245_v35 = vld [vmem:[%s1479_s1 + $0x10] sm:$0xff] (!%p164_p3)   ;;  %vm795_vm0 = vcmask (!%p164_p3), 7168  }
   0x7   : > { %167 = sbr.rel (%p164_p3) target bundleno = 477 (0x1dd), region = 28  ;;  %521 = vmatprep.mubr.bf16.mxu0 (!%p164_p3), %v1275_v0  ;;  %634 = vmatprep.mubr.bf16.mxu1 (!%p164_p3), %v1275_v0  ;;  %v1246_v36 = vld [vmem:[%s1479_s1 + $0x18] sm:$0xff] (!%p164_p3)   ;;  %v1247_v37 = vld [vmem:[%s1479_s1 + $0x20] sm:$0xff] (!%p164_p3)   ;;  %v1248_v38 = vld [vmem:[%s1479_s1 + $0x28] sm:$0xff] (!%p164_p3)  }
   0x8   : > { %v1249_v39 = vld [vmem:[%s1479_s1 + $0x30] sm:$0xff] (!%p164_p3)   ;;  %v1250_v40 = vld [vmem:[%s1479_s1 + $0x38] sm:$0xff] (!%p164_p3)  }
   0xe   : > { %s1487_s12 = smov (!%p205_p4, %s1265_s12), 1 }
   0xf   : > { %s1167_s16 = sshll.u32 %s1487_s12, 8  ;;  %s1168_s9 = sshll.u32 %s1487_s12, 7 }
  0x10   : > { %s1322_s19 = scalar_lea.vmem %s1478_s0, %s1167_s16  ;;  %s1398_s16 = scalar_lea.vmem %s1480_s2, %s1168_s9 }
  0x11   : > { %v1195_v1 = vld [vmem:[%s1322_s19 + $0x4] ss:$16 sps:$4 sm:$0xff]   ;;  %v1197_v2 = vld [vmem:[%s1322_s19 + $0xc] ss:$16 sps:$4 sm:$0xff]   ;;  %v1199_v3 = vld [vmem:[%s1322_s19] ss:$16 sps:$4 sm:$0xff]  }
  0x12   : > { %489 = vmatprep.subr.bf16.mxu0 %v1195_v1  ;;  %v1200_v4 = vld [vmem:[%s1322_s19 + $0x8] ss:$16 sps:$4 sm:$0xff]   ;;  %602 = vmatprep.subr.bf16.mxu1 %v1197_v2  ;;  %v1201_v5 = vld [vmem:[%s1322_s19 + $0x24] ss:$16 sps:$4 sm:$0xff]   ;;  %v1203_v6 = vld [vmem:[%s1322_s19 + $0x2c] ss:$16 sps:$4 sm:$0xff]  }
  0x13   : > { %490 = vmatpush1.bf16.msra.mxu0 %v1199_v3  ;;  %603 = vmatpush1.bf16.msra.mxu1 %v1200_v4  ;;  %v1205_v7 = vld [vmem:[%s1322_s19 + $0x20] ss:$16 sps:$4 sm:$0xff]   ;;  %v1206_v8 = vld [vmem:[%s1322_s19 + $0x28] ss:$16 sps:$4 sm:$0xff]   ;;  %v1207_v9 = vld [vmem:[%s1322_s19 + $0x44] ss:$16 sps:$4 sm:$0xff]  }
  0x14   : > { %491 = vmatprep.subr.bf16.mxu0 %v1201_v5  ;;  %604 = vmatprep.subr.bf16.mxu1 %v1203_v6  ;;  %v1209_v10 = vld [vmem:[%s1322_s19 + $0x4c] ss:$16 sps:$4 sm:$0xff]   ;;  %v1211_v11 = vld [vmem:[%s1322_s19 + $0x40] ss:$16 sps:$4 sm:$0xff]   ;;  %v1212_v12 = vld [vmem:[%s1322_s19 + $0x48] ss:$16 sps:$4 sm:$0xff]  }
  0x15   : > { %v1213_v13 = vld [vmem:[%s1322_s19 + $0x64] ss:$16 sps:$4 sm:$0xff]   ;;  %v1215_v14 = vld [vmem:[%s1322_s19 + $0x6c] ss:$16 sps:$4 sm:$0xff]   ;;  %v1217_v15 = vld [vmem:[%s1322_s19 + $0x60] ss:$16 sps:$4 sm:$0xff]  }
  0x16   : > { %v1218_v16 = vld [vmem:[%s1322_s19 + $0x68] ss:$16 sps:$4 sm:$0xff]   ;;  %v1219_v17 = vld [vmem:[%s1322_s19 + $0x84] ss:$16 sps:$4 sm:$0xff]   ;;  %v1221_v18 = vld [vmem:[%s1322_s19 + $0x8c] ss:$16 sps:$4 sm:$0xff]  }
  0x17   : > { %492 = vmatpush1.bf16.msra.mxu0 %v1205_v7  ;;  %605 = vmatpush1.bf16.msra.mxu1 %v1206_v8  ;;  %v1223_v19 = vld [vmem:[%s1322_s19 + $0x80] ss:$16 sps:$4 sm:$0xff]   ;;  %v1224_v20 = vld [vmem:[%s1322_s19 + $0x88] ss:$16 sps:$4 sm:$0xff]   ;;  %v1225_v21 = vld [vmem:[%s1322_s19 + $0xa4] ss:$16 sps:$4 sm:$0xff]  }
  0x18   : > { %493 = vmatprep.subr.bf16.mxu0 %v1207_v9  ;;  %606 = vmatprep.subr.bf16.mxu1 %v1209_v10  ;;  %v1227_v22 = vld [vmem:[%s1322_s19 + $0xac] ss:$16 sps:$4 sm:$0xff]   ;;  %v1229_v23 = vld [vmem:[%s1322_s19 + $0xa0] ss:$16 sps:$4 sm:$0xff]   ;;  %v1230_v24 = vld [vmem:[%s1322_s19 + $0xa8] ss:$16 sps:$4 sm:$0xff]  }
  0x19   : > { %v1231_v25 = vld [vmem:[%s1322_s19 + $0xc4] ss:$16 sps:$4 sm:$0xff]   ;;  %v1233_v26 = vld [vmem:[%s1322_s19 + $0xcc] ss:$16 sps:$4 sm:$0xff]   ;;  %v1235_v27 = vld [vmem:[%s1322_s19 + $0xc0] ss:$16 sps:$4 sm:$0xff]  }
  0x1a   : > { %v1236_v28 = vld [vmem:[%s1322_s19 + $0xc8] ss:$16 sps:$4 sm:$0xff]   ;;  %v1237_v29 = vld [vmem:[%s1322_s19 + $0xe4] ss:$16 sps:$4 sm:$0xff]   ;;  %v1239_v30 = vld [vmem:[%s1322_s19 + $0xec] ss:$16 sps:$4 sm:$0xff]  }
  0x1b   : > { %494 = vmatpush1.bf16.msra.mxu0 %v1211_v11  ;;  %607 = vmatpush1.bf16.msra.mxu1 %v1212_v12  ;;  %v1241_v31 = vld [vmem:[%s1322_s19 + $0xe0] ss:$16 sps:$4 sm:$0xff]   ;;  %v1242_v32 = vld [vmem:[%s1322_s19 + $0xe8] ss:$16 sps:$4 sm:$0xff]   ;;  %s1405_s19 = scalar_lea.vmem %s1481_s3, %s1168_s9 }
  0x1c   : > { %495 = vmatprep.subr.bf16.mxu0 %v1213_v13  ;;  %608 = vmatprep.subr.bf16.mxu1 %v1215_v14 }
  0x1f   : > { %496 = vmatpush1.bf16.msra.mxu0 %v1217_v15  ;;  %609 = vmatpush1.bf16.msra.mxu1 %v1218_v16 }
  0x20   : > { %497 = vmatprep.subr.bf16.mxu0 %v1219_v17  ;;  %610 = vmatprep.subr.bf16.mxu1 %v1221_v18 }
  0x23   : > { %498 = vmatpush1.bf16.msra.mxu0 %v1223_v19  ;;  %611 = vmatpush1.bf16.msra.mxu1 %v1224_v20 }
  0x24   : > { %499 = vmatprep.subr.bf16.mxu0 %v1225_v21  ;;  %612 = vmatprep.subr.bf16.mxu1 %v1227_v22 }
  0x27   : > { %500 = vmatpush1.bf16.msra.mxu0 %v1229_v23  ;;  %613 = vmatpush1.bf16.msra.mxu1 %v1230_v24 }
  0x28   : > { %501 = vmatprep.subr.bf16.mxu0 %v1231_v25  ;;  %614 = vmatprep.subr.bf16.mxu1 %v1233_v26 }
  0x2b   : > { %502 = vmatpush1.bf16.msra.mxu0 %v1235_v27  ;;  %615 = vmatpush1.bf16.msra.mxu1 %v1236_v28 }
  0x2c   : > { %503 = vmatprep.subr.bf16.mxu0 %v1237_v29  ;;  %616 = vmatprep.subr.bf16.mxu1 %v1239_v30 }
  0x2f   : > { %504 = vmatpush1.bf16.msra.mxu0 %v1241_v31  ;;  %617 = vmatpush1.bf16.msra.mxu1 %v1242_v32 }
  0x32   : > { %522 = vmatmul.mubr.bf16.vlgmr.msra.gmra.mrb[0].mxu0 %v1243_v33  ;;  %635 = vmatmul.mubr.bf16.vlgmr.msra.gmra.mrb[0].mxu1 %v1243_v33 }
  0x33   : > { %531 = vmatprep.mubr.bf16.mxu0 %v1275_v0  ;;  %644 = vmatprep.mubr.bf16.mxu1 %v1275_v0 }
  0x3a   : > { %532 = vmatmul.mubr.bf16.gmra.mrb[4].mxu0 %v1244_v34  ;;  %645 = vmatmul.mubr.bf16.gmra.mrb[4].mxu1 %v1244_v34 }
  0x3b   : > { %541 = vmatprep.mubr.bf16.mxu0 %v1275_v0  ;;  %654 = vmatprep.mubr.bf16.mxu1 %v1275_v0 }
  0x42   : > { %542 = vmatmul.mubr.bf16.gmra.mrb[8].mxu0 %v1245_v35  ;;  %655 = vmatmul.mubr.bf16.gmra.mrb[8].mxu1 %v1245_v35 }
  0x43   : > { %551 = vmatprep.mubr.bf16.mxu0 %v1275_v0  ;;  %664 = vmatprep.mubr.bf16.mxu1 %v1275_v0 }
  0x4a   : > { %552 = vmatmul.mubr.bf16.gmra.mrb[12].mxu0 %v1246_v36  ;;  %665 = vmatmul.mubr.bf16.gmra.mrb[12].mxu1 %v1246_v36 }
  0x4b   : > { %561 = vmatprep.mubr.bf16.mxu0 %v1275_v0  ;;  %674 = vmatprep.mubr.bf16.mxu1 %v1275_v0 }
  0x52   : > { %562 = vmatmul.mubr.bf16.gmra.mrb[16].mxu0 %v1247_v37  ;;  %675 = vmatmul.mubr.bf16.gmra.mrb[16].mxu1 %v1247_v37 }
  0x53   : > { %571 = vmatprep.mubr.bf16.mxu0 %v1275_v0  ;;  %684 = vmatprep.mubr.bf16.mxu1 %v1275_v0 }
  0x5a   : > { %572 = vmatmul.mubr.bf16.gmra.mrb[20].mxu0 %v1248_v38  ;;  %685 = vmatmul.mubr.bf16.gmra.mrb[20].mxu1 %v1248_v38 }
  0x5b   : > { %581 = vmatprep.mubr.bf16.mxu0 %v1275_v0  ;;  %694 = vmatprep.mubr.bf16.mxu1 %v1275_v0 }
  0x62   : > { %582 = vmatmul.mubr.bf16.gmra.mrb[24].mxu0 %v1249_v39  ;;  %695 = vmatmul.mubr.bf16.gmra.mrb[24].mxu1 %v1249_v39 }
  0x63   : > { %591 = vmatprep.mubr.bf16.mxu0 %v1275_v0  ;;  %704 = vmatprep.mubr.bf16.mxu1 %v1275_v0 }
  0x6a   : > { %592 = vmatmul.mubr.bf16.gmra.mrb[28].mxu0 %v1250_v40  ;;  %705 = vmatmul.mubr.bf16.gmra.mrb[28].mxu1 %v1250_v40 }
 0x105   : > { %v523_v41 = vpop.f32.mrb[0].mxu0  ;;  %v636_v42 = vpop.f32.mrb[0].mxu1 }
 0x106   : > { %v812_v43 = vmul.f32 %v523_v41, %v523_v41  ;;  %v525_v44 = vpop.f32.mrb[1].mxu0  ;;  %v638_v45 = vpop.f32.mrb[1].mxu1  ;;  %v814_v46 = vmul.f32 %v636_v42, %v636_v42 }
 0x107   : > { %v715_v47 = vadd.f32 %v525_v44, %v523_v41  ;;  %v813_v48 = vmul.f32 %v525_v44, %v525_v44  ;;  %v527_v49 = vpop.f32.mrb[2].mxu0  ;;  %v640_v50 = vpop.f32.mrb[2].mxu1  ;;  %v815_v57 = vmul.f32 %v638_v45, %v638_v45 }
 0x108   : > { %v816_v51 = vmul.f32 %v527_v49, %v527_v49  ;;  %v529_v52 = vpop.f32.mrb[3].mxu0  ;;  %v642_v53 = vpop.f32.mrb[3].mxu1  ;;  %v818_v59 = vmul.f32 %v640_v50, %v640_v50 }
 0x109   : > { %v876_v54 = vadd.f32 %v813_v48, %v812_v43  ;;  %v720_v55 = vadd.f32 %v529_v52, %v527_v49  ;;  %v817_v56 = vmul.f32 %v529_v52, %v529_v52  ;;  %v716_v58 = vadd.f32 %v715_v47, %v636_v42 }
 0x10a   : > { %v819_v0 = vmul.f32 %v642_v53, %v642_v53 }
 0x10b   : > { %v881_v60 = vadd.f32 %v817_v56, %v816_v51  ;;  %v721_v61 = vadd.f32 %v720_v55, %v640_v50  ;;  %v877_v62 = vadd.f32 %v876_v54, %v814_v46  ;;  %v717_v63 = vadd.f32 %v716_v58, %v638_v45 }
 0x10d   : > { %v646_v1 = vpop.f32.mrb[4].mxu1  ;;  %v533_v2 = vpop.f32.mrb[4].mxu0  ;;  %v882_v3 = vadd.f32 %v881_v60, %v818_v59  ;;  %v722_v4 = vadd.f32 %v721_v61, %v642_v53  ;;  %v878_v5 = vadd.f32 %v877_v62, %v815_v57  ;;  %718 = vadd.xlane.f32.xlu0 %v717_v63 }
 0x10e   : > { %v820_v6 = vmul.f32 %v533_v2, %v533_v2  ;;  %v535_v7 = vpop.f32.mrb[5].mxu0  ;;  %v648_v8 = vpop.f32.mrb[5].mxu1  ;;  %v822_v9 = vmul.f32 %v646_v1, %v646_v1 }
 0x10f   : > { %v725_v10 = vadd.f32 %v535_v7, %v533_v2  ;;  %v821_v11 = vmul.f32 %v535_v7, %v535_v7  ;;  %v537_v12 = vpop.f32.mrb[6].mxu0  ;;  %v650_v13 = vpop.f32.mrb[6].mxu1  ;;  %v883_v14 = vadd.f32 %v882_v3, %v819_v0  ;;  %v823_v21 = vmul.f32 %v648_v8, %v648_v8 }
 0x110   : > { %v824_v15 = vmul.f32 %v537_v12, %v537_v12  ;;  %v539_v16 = vpop.f32.mrb[7].mxu0  ;;  %v652_v17 = vpop.f32.mrb[7].mxu1  ;;  %v826_v23 = vmul.f32 %v650_v13, %v650_v13 }
 0x111   : > { %v886_v18 = vadd.f32 %v821_v11, %v820_v6  ;;  %v730_v19 = vadd.f32 %v539_v16, %v537_v12  ;;  %v825_v20 = vmul.f32 %v539_v16, %v539_v16  ;;  %884 = vadd.xlane.f32.xlu1 %v883_v14  ;;  %723 = vadd.xlane.f32.xlu0 %v722_v4 }
 0x112   : > { %v726_v22 = vadd.f32 %v725_v10, %v646_v1  ;;  %v827_v28 = vmul.f32 %v652_v17, %v652_v17 }
 0x113   : > { %v891_v24 = vadd.f32 %v825_v20, %v824_v15  ;;  %v887_v25 = vadd.f32 %v886_v18, %v822_v9  ;;  %v731_v26 = vadd.f32 %v730_v19, %v650_v13 }
 0x114   : > { %v727_v27 = vadd.f32 %v726_v22, %v648_v8 }
 0x115   : > { %v543_v29 = vpop.f32.mrb[8].mxu0  ;;  %v656_v30 = vpop.f32.mrb[8].mxu1  ;;  %v888_v31 = vadd.f32 %v887_v25, %v823_v21  ;;  %v732_v32 = vadd.f32 %v731_v26, %v652_v17  ;;  %v892_v33 = vadd.f32 %v891_v24, %v826_v23  ;;  %879 = vadd.xlane.f32.xlu0 %v878_v5 }
 0x116   : > { %728 = vadd.xlane.f32.xlu1 %v727_v27  ;;  %v828_v34 = vmul.f32 %v543_v29, %v543_v29  ;;  %v545_v35 = vpop.f32.mrb[9].mxu0  ;;  %v658_v36 = vpop.f32.mrb[9].mxu1  ;;  %v830_v40 = vmul.f32 %v656_v30, %v656_v30 }
 0x117   : > { %v735_v37 = vadd.f32 %v545_v35, %v543_v29  ;;  %v829_v38 = vmul.f32 %v545_v35, %v545_v35  ;;  %v547_v39 = vpop.f32.mrb[10].mxu0  ;;  %v660_v41 = vpop.f32.mrb[10].mxu1  ;;  %v893_v42 = vadd.f32 %v892_v33, %v827_v28  ;;  %v831_v45 = vmul.f32 %v658_v36, %v658_v36 }
 0x118   : > { %v832_v43 = vmul.f32 %v547_v39, %v547_v39  ;;  %v549_v44 = vpop.f32.mrb[11].mxu0  ;;  %v834_v46 = vmul.f32 %v660_v41, %v660_v41  ;;  %v662_v47 = vpop.f32.mrb[11].mxu1 }
 0x119   : > { %v896_v48 = vadd.f32 %v829_v38, %v828_v34  ;;  %v736_v49 = vadd.f32 %v735_v37, %v656_v30  ;;  %v740_v50 = vadd.f32 %v549_v44, %v547_v39  ;;  %v833_v51 = vmul.f32 %v549_v44, %v549_v44  ;;  %889 = vadd.xlane.f32.xlu0 %v888_v31 }
 0x11a   : > { %733 = vadd.xlane.f32.xlu1 %v732_v32  ;;  %v835_v56 = vmul.f32 %v662_v47, %v662_v47 }
 0x11b   : > { %v901_v52 = vadd.f32 %v833_v51, %v832_v43  ;;  %v741_v53 = vadd.f32 %v740_v50, %v660_v41  ;;  %v737_v54 = vadd.f32 %v736_v49, %v658_v36  ;;  %v897_v55 = vadd.f32 %v896_v48, %v830_v40 }
 0x11d   : > { %v553_v57 = vpop.f32.mrb[12].mxu0  ;;  %v666_v58 = vpop.f32.mrb[12].mxu1  ;;  %v898_v59 = vadd.f32 %v897_v55, %v831_v45  ;;  %v742_v60 = vadd.f32 %v741_v53, %v662_v47  ;;  %v902_v61 = vadd.f32 %v901_v52, %v834_v46  ;;  %738 = vadd.xlane.f32.xlu0 %v737_v54 }
 0x11e   : > { %894 = vadd.xlane.f32.xlu1 %v893_v42  ;;  %v836_v62 = vmul.f32 %v553_v57, %v553_v57  ;;  %v555_v63 = vpop.f32.mrb[13].mxu0  ;;  %v668_v0 = vpop.f32.mrb[13].mxu1  ;;  %v838_v4 = vmul.f32 %v666_v58, %v666_v58 }
 0x11f   : > { %v745_v1 = vadd.f32 %v555_v63, %v553_v57  ;;  %v837_v2 = vmul.f32 %v555_v63, %v555_v63  ;;  %v557_v3 = vpop.f32.mrb[14].mxu0  ;;  %v670_v5 = vpop.f32.mrb[14].mxu1  ;;  %v903_v6 = vadd.f32 %v902_v61, %v835_v56  ;;  %v839_v9 = vmul.f32 %v668_v0, %v668_v0 }
 0x120   : > { %v840_v7 = vmul.f32 %v557_v3, %v557_v3  ;;  %v559_v8 = vpop.f32.mrb[15].mxu0  ;;  %v842_v10 = vmul.f32 %v670_v5, %v670_v5  ;;  %v672_v11 = vpop.f32.mrb[15].mxu1 }
 0x121   : > { %v906_v12 = vadd.f32 %v837_v2, %v836_v62  ;;  %v746_v13 = vadd.f32 %v745_v1, %v666_v58  ;;  %v750_v14 = vadd.f32 %v559_v8, %v557_v3  ;;  %v841_v15 = vmul.f32 %v559_v8, %v559_v8  ;;  %899 = vadd.xlane.f32.xlu0 %v898_v59 }
 0x122   : > { %743 = vadd.xlane.f32.xlu1 %v742_v60  ;;  %v843_v20 = vmul.f32 %v672_v11, %v672_v11 }
 0x123   : > { %v911_v16 = vadd.f32 %v841_v15, %v840_v7  ;;  %v751_v17 = vadd.f32 %v750_v14, %v670_v5  ;;  %v747_v18 = vadd.f32 %v746_v13, %v668_v0  ;;  %v907_v19 = vadd.f32 %v906_v12, %v838_v4 }
 0x125   : > { %v563_v21 = vpop.f32.mrb[16].mxu0  ;;  %v676_v22 = vpop.f32.mrb[16].mxu1  ;;  %v908_v23 = vadd.f32 %v907_v19, %v839_v9  ;;  %v752_v24 = vadd.f32 %v751_v17, %v672_v11  ;;  %v912_v25 = vadd.f32 %v911_v16, %v842_v10  ;;  %748 = vadd.xlane.f32.xlu0 %v747_v18 }
 0x126   : > { %904 = vadd.xlane.f32.xlu1 %v903_v6  ;;  %v844_v26 = vmul.f32 %v563_v21, %v563_v21  ;;  %v565_v27 = vpop.f32.mrb[17].mxu0  ;;  %v678_v28 = vpop.f32.mrb[17].mxu1  ;;  %v846_v32 = vmul.f32 %v676_v22, %v676_v22 }
 0x127   : > { %v755_v29 = vadd.f32 %v565_v27, %v563_v21  ;;  %v845_v30 = vmul.f32 %v565_v27, %v565_v27  ;;  %v567_v31 = vpop.f32.mrb[18].mxu0  ;;  %v680_v33 = vpop.f32.mrb[18].mxu1  ;;  %v913_v34 = vadd.f32 %v912_v25, %v843_v20  ;;  %v847_v37 = vmul.f32 %v678_v28, %v678_v28 }
 0x128   : > { %v848_v35 = vmul.f32 %v567_v31, %v567_v31  ;;  %v569_v36 = vpop.f32.mrb[19].mxu0  ;;  %v850_v38 = vmul.f32 %v680_v33, %v680_v33  ;;  %v682_v39 = vpop.f32.mrb[19].mxu1 }
 0x129   : > { %v916_v40 = vadd.f32 %v845_v30, %v844_v26  ;;  %v756_v41 = vadd.f32 %v755_v29, %v676_v22  ;;  %v760_v42 = vadd.f32 %v569_v36, %v567_v31  ;;  %v849_v43 = vmul.f32 %v569_v36, %v569_v36  ;;  %909 = vadd.xlane.f32.xlu0 %v908_v23 }
 0x12a   : > { %753 = vadd.xlane.f32.xlu1 %v752_v24  ;;  %v851_v48 = vmul.f32 %v682_v39, %v682_v39 }
 0x12b   : > { %v921_v44 = vadd.f32 %v849_v43, %v848_v35  ;;  %v761_v45 = vadd.f32 %v760_v42, %v680_v33  ;;  %v757_v46 = vadd.f32 %v756_v41, %v678_v28  ;;  %v917_v47 = vadd.f32 %v916_v40, %v846_v32 }
 0x12d   : > { %v573_v49 = vpop.f32.mrb[20].mxu0  ;;  %v686_v50 = vpop.f32.mrb[20].mxu1  ;;  %v918_v51 = vadd.f32 %v917_v47, %v847_v37  ;;  %v762_v52 = vadd.f32 %v761_v45, %v682_v39  ;;  %v922_v53 = vadd.f32 %v921_v44, %v850_v38  ;;  %758 = vadd.xlane.f32.xlu0 %v757_v46 }
 0x12e   : > { %914 = vadd.xlane.f32.xlu1 %v913_v34  ;;  %v852_v54 = vmul.f32 %v573_v49, %v573_v49  ;;  %v575_v55 = vpop.f32.mrb[21].mxu0  ;;  %v688_v56 = vpop.f32.mrb[21].mxu1  ;;  %v854_v60 = vmul.f32 %v686_v50, %v686_v50 }
 0x12f   : > { %v765_v57 = vadd.f32 %v575_v55, %v573_v49  ;;  %v853_v58 = vmul.f32 %v575_v55, %v575_v55  ;;  %v577_v59 = vpop.f32.mrb[22].mxu0  ;;  %v690_v61 = vpop.f32.mrb[22].mxu1  ;;  %v923_v62 = vadd.f32 %v922_v53, %v851_v48  ;;  %v855_v1 = vmul.f32 %v688_v56, %v688_v56 }
 0x130   : > { %v856_v63 = vmul.f32 %v577_v59, %v577_v59  ;;  %v579_v0 = vpop.f32.mrb[23].mxu0  ;;  %v858_v2 = vmul.f32 %v690_v61, %v690_v61  ;;  %v692_v3 = vpop.f32.mrb[23].mxu1 }
 0x131   : > { %v926_v4 = vadd.f32 %v853_v58, %v852_v54  ;;  %v766_v5 = vadd.f32 %v765_v57, %v686_v50  ;;  %v770_v6 = vadd.f32 %v579_v0, %v577_v59  ;;  %v857_v7 = vmul.f32 %v579_v0, %v579_v0  ;;  %919 = vadd.xlane.f32.xlu0 %v918_v51 }
 0x132   : > { %763 = vadd.xlane.f32.xlu1 %v762_v52  ;;  %v859_v12 = vmul.f32 %v692_v3, %v692_v3 }
 0x133   : > { %v931_v8 = vadd.f32 %v857_v7, %v856_v63  ;;  %v771_v9 = vadd.f32 %v770_v6, %v690_v61  ;;  %v767_v10 = vadd.f32 %v766_v5, %v688_v56  ;;  %v927_v11 = vadd.f32 %v926_v4, %v854_v60 }
 0x135   : > { %v583_v13 = vpop.f32.mrb[24].mxu0  ;;  %v696_v14 = vpop.f32.mrb[24].mxu1  ;;  %v928_v15 = vadd.f32 %v927_v11, %v855_v1  ;;  %v772_v16 = vadd.f32 %v771_v9, %v692_v3  ;;  %v932_v17 = vadd.f32 %v931_v8, %v858_v2  ;;  %768 = vadd.xlane.f32.xlu0 %v767_v10 }
 0x136   : > { %924 = vadd.xlane.f32.xlu1 %v923_v62  ;;  %v860_v18 = vmul.f32 %v583_v13, %v583_v13  ;;  %v585_v19 = vpop.f32.mrb[25].mxu0  ;;  %v698_v20 = vpop.f32.mrb[25].mxu1  ;;  %v862_v24 = vmul.f32 %v696_v14, %v696_v14 }
 0x137   : > { %v775_v21 = vadd.f32 %v585_v19, %v583_v13  ;;  %v861_v22 = vmul.f32 %v585_v19, %v585_v19  ;;  %v587_v23 = vpop.f32.mrb[26].mxu0  ;;  %v700_v25 = vpop.f32.mrb[26].mxu1  ;;  %v933_v26 = vadd.f32 %v932_v17, %v859_v12  ;;  %v863_v29 = vmul.f32 %v698_v20, %v698_v20 }
 0x138   : > { %v864_v27 = vmul.f32 %v587_v23, %v587_v23  ;;  %v589_v28 = vpop.f32.mrb[27].mxu0  ;;  %v866_v30 = vmul.f32 %v700_v25, %v700_v25  ;;  %v702_v31 = vpop.f32.mrb[27].mxu1 }
 0x139   : > { %v936_v32 = vadd.f32 %v861_v22, %v860_v18  ;;  %v776_v33 = vadd.f32 %v775_v21, %v696_v14  ;;  %v780_v34 = vadd.f32 %v589_v28, %v587_v23  ;;  %v865_v35 = vmul.f32 %v589_v28, %v589_v28  ;;  %929 = vadd.xlane.f32.xlu0 %v928_v15 }
 0x13a   : > { %773 = vadd.xlane.f32.xlu1 %v772_v16  ;;  %v867_v40 = vmul.f32 %v702_v31, %v702_v31 }
 0x13b   : > { %v941_v36 = vadd.f32 %v865_v35, %v864_v27  ;;  %v781_v37 = vadd.f32 %v780_v34, %v700_v25  ;;  %v777_v38 = vadd.f32 %v776_v33, %v698_v20  ;;  %v937_v39 = vadd.f32 %v936_v32, %v862_v24 }
 0x13d   : > { %v593_v41 = vpop.f32.mrb[28].mxu0  ;;  %v706_v42 = vpop.f32.mrb[28].mxu1  ;;  %v938_v43 = vadd.f32 %v937_v39, %v863_v29  ;;  %v782_v44 = vadd.f32 %v781_v37, %v702_v31  ;;  %v942_v45 = vadd.f32 %v941_v36, %v866_v30  ;;  %778 = vadd.xlane.f32.xlu0 %v777_v38 }
 0x13e   : > { %934 = vadd.xlane.f32.xlu1 %v933_v26  ;;  %v868_v46 = vmul.f32 %v593_v41, %v593_v41  ;;  %v595_v47 = vpop.f32.mrb[29].mxu0  ;;  %v708_v48 = vpop.f32.mrb[29].mxu1  ;;  %v870_v52 = vmul.f32 %v706_v42, %v706_v42 }
 0x13f   : > { %v785_v49 = vadd.f32 %v595_v47, %v593_v41  ;;  %v869_v50 = vmul.f32 %v595_v47, %v595_v47  ;;  %v597_v51 = vpop.f32.mrb[30].mxu0  ;;  %v710_v53 = vpop.f32.mrb[30].mxu1  ;;  %v943_v54 = vadd.f32 %v942_v45, %v867_v40  ;;  %v871_v57 = vmul.f32 %v708_v48, %v708_v48 }
 0x140   : > { %v872_v55 = vmul.f32 %v597_v51, %v597_v51  ;;  %v599_v56 = vpop.f32.mrb[31].mxu0  ;;  %v874_v58 = vmul.f32 %v710_v53, %v710_v53  ;;  %v712_v59 = vpop.f32.mrb[31].mxu1 }
 0x141   : > { %v946_v60 = vadd.f32 %v869_v50, %v868_v46  ;;  %v786_v61 = vadd.f32 %v785_v49, %v706_v42  ;;  %v790_v62 = vadd.f32 %v599_v56, %v597_v51  ;;  %v873_v63 = vmul.f32 %v599_v56, %v599_v56  ;;  %939 = vadd.xlane.f32.xlu0 %v938_v43 }
 0x142   : > { %783 = vadd.xlane.f32.xlu1 %v782_v44  ;;  %v875_v5 = vmul.f32 %v712_v59, %v712_v59 }
 0x143   : > { %v951_v0 = vadd.f32 %v873_v63, %v872_v55  ;;  %v791_v1 = vadd.f32 %v790_v62, %v710_v53  ;;  %v787_v2 = vadd.f32 %v786_v61, %v708_v48  ;;  %v947_v3 = vadd.f32 %v946_v60, %v870_v52 }
 0x145   : > { %v792_v4 = vadd.f32 %v791_v1, %v712_v59  ;;  %v948_v6 = vadd.f32 %v947_v3, %v871_v57  ;;  %v952_v7 = vadd.f32 %v951_v0, %v874_v58  ;;  %788 = vadd.xlane.f32.xlu0 %v787_v2 }
 0x146   : > { %944 = vadd.xlane.f32.xlu1 %v943_v54 }
 0x147   : > { %v953_v8 = vadd.f32 %v952_v7, %v875_v5 }
 0x149   : > { %949 = vadd.xlane.f32.xlu0 %v948_v6 }
 0x14a   : > { %793 = vadd.xlane.f32.xlu1 %v792_v4 }
 0x14e   : > { %954 = vadd.xlane.f32.xlu1 %v953_v8 }
 0x19a   : > { %v719_v9 = vpop.xlane.xlu0 %718 }
 0x19b   : > { %796 = vst.msk [vmem:[%s1398_s16] sm:$0xff] %vm795_vm0, %v719_v9 }
 0x19e   : > { %v885_v10 = vpop.xlane.xlu1 %884  ;;  %v724_v11 = vpop.xlane.xlu0 %723 }
 0x19f   : > { %957 = vst.msk [vmem:[%s1405_s19 + $0x8] sm:$0xff] %vm795_vm0, %v885_v10  ;;  %797 = vst.msk [vmem:[%s1398_s16 + $0x8] sm:$0xff] %vm795_vm0, %v724_v11 }
 0x1a2   : > { %v880_v12 = vpop.xlane.xlu0 %879 }
 0x1a3   : > { %v729_v13 = vpop.xlane.xlu1 %728  ;;  %956 = vst.msk [vmem:[%s1405_s19] sm:$0xff] %vm795_vm0, %v880_v12 }
 0x1a4   : > { %798 = vst.msk [vmem:[%s1398_s16 + $0x10] sm:$0xff] %vm795_vm0, %v729_v13 }
 0x1a6   : > { %v890_v14 = vpop.xlane.xlu0 %889 }
 0x1a7   : > { %v734_v15 = vpop.xlane.xlu1 %733  ;;  %958 = vst.msk [vmem:[%s1405_s19 + $0x10] sm:$0xff] %vm795_vm0, %v890_v14 }
 0x1a8   : > { %799 = vst.msk [vmem:[%s1398_s16 + $0x18] sm:$0xff] %vm795_vm0, %v734_v15 }
 0x1aa   : > { %v739_v17 = vpop.xlane.xlu0 %738 }
 0x1ab   : > { %v895_v16 = vpop.xlane.xlu1 %894  ;;  %800 = vst.msk [vmem:[%s1398_s16 + $0x20] sm:$0xff] %vm795_vm0, %v739_v17 }
 0x1ac   : > { %959 = vst.msk [vmem:[%s1405_s19 + $0x18] sm:$0xff] %vm795_vm0, %v895_v16 }
 0x1ae   : > { %v900_v18 = vpop.xlane.xlu0 %899 }
 0x1af   : > { %v744_v19 = vpop.xlane.xlu1 %743  ;;  %960 = vst.msk [vmem:[%s1405_s19 + $0x20] sm:$0xff] %vm795_vm0, %v900_v18 }
 0x1b0   : > { %801 = vst.msk [vmem:[%s1398_s16 + $0x28] sm:$0xff] %vm795_vm0, %v744_v19 }
 0x1b2   : > { %v749_v21 = vpop.xlane.xlu0 %748 }
 0x1b3   : > { %v905_v20 = vpop.xlane.xlu1 %904  ;;  %802 = vst.msk [vmem:[%s1398_s16 + $0x30] sm:$0xff] %vm795_vm0, %v749_v21 }
 0x1b4   : > { %961 = vst.msk [vmem:[%s1405_s19 + $0x28] sm:$0xff] %vm795_vm0, %v905_v20 }
 0x1b6   : > { %v910_v22 = vpop.xlane.xlu0 %909 }
 0x1b7   : > { %v754_v23 = vpop.xlane.xlu1 %753  ;;  %962 = vst.msk [vmem:[%s1405_s19 + $0x30] sm:$0xff] %vm795_vm0, %v910_v22 }
 0x1b8   : > { %803 = vst.msk [vmem:[%s1398_s16 + $0x38] sm:$0xff] %vm795_vm0, %v754_v23 }
 0x1ba   : > { %v759_v25 = vpop.xlane.xlu0 %758 }
 0x1bb   : > { %v915_v24 = vpop.xlane.xlu1 %914  ;;  %804 = vst.msk [vmem:[%s1398_s16 + $0x40] sm:$0xff] %vm795_vm0, %v759_v25 }
 0x1bc   : > { %963 = vst.msk [vmem:[%s1405_s19 + $0x38] sm:$0xff] %vm795_vm0, %v915_v24 }
 0x1be   : > { %v920_v26 = vpop.xlane.xlu0 %919 }
 0x1bf   : > { %v764_v27 = vpop.xlane.xlu1 %763  ;;  %964 = vst.msk [vmem:[%s1405_s19 + $0x40] sm:$0xff] %vm795_vm0, %v920_v26 }
 0x1c0   : > { %805 = vst.msk [vmem:[%s1398_s16 + $0x48] sm:$0xff] %vm795_vm0, %v764_v27 }
 0x1c2   : > { %v769_v29 = vpop.xlane.xlu0 %768 }
 0x1c3   : > { %v925_v28 = vpop.xlane.xlu1 %924  ;;  %806 = vst.msk [vmem:[%s1398_s16 + $0x50] sm:$0xff] %vm795_vm0, %v769_v29 }
 0x1c4   : > { %965 = vst.msk [vmem:[%s1405_s19 + $0x48] sm:$0xff] %vm795_vm0, %v925_v28 }
 0x1c6   : > { %v930_v30 = vpop.xlane.xlu0 %929 }
 0x1c7   : > { %v774_v31 = vpop.xlane.xlu1 %773  ;;  %966 = vst.msk [vmem:[%s1405_s19 + $0x50] sm:$0xff] %vm795_vm0, %v930_v30 }
 0x1c8   : > { %807 = vst.msk [vmem:[%s1398_s16 + $0x58] sm:$0xff] %vm795_vm0, %v774_v31 }
 0x1ca   : > { %v779_v33 = vpop.xlane.xlu0 %778 }
 0x1cb   : > { %v935_v32 = vpop.xlane.xlu1 %934  ;;  %808 = vst.msk [vmem:[%s1398_s16 + $0x60] sm:$0xff] %vm795_vm0, %v779_v33 }
 0x1cc   : > { %967 = vst.msk [vmem:[%s1405_s19 + $0x58] sm:$0xff] %vm795_vm0, %v935_v32 }
 0x1ce   : > { %v940_v34 = vpop.xlane.xlu0 %939 }
 0x1cf   : > { %v784_v35 = vpop.xlane.xlu1 %783  ;;  %968 = vst.msk [vmem:[%s1405_s19 + $0x60] sm:$0xff] %vm795_vm0, %v940_v34 }
 0x1d0   : > { %809 = vst.msk [vmem:[%s1398_s16 + $0x68] sm:$0xff] %vm795_vm0, %v784_v35 }
 0x1d2   : > { %v789_v37 = vpop.xlane.xlu0 %788 }
 0x1d3   : > { %v945_v36 = vpop.xlane.xlu1 %944  ;;  %810 = vst.msk [vmem:[%s1398_s16 + $0x70] sm:$0xff] %vm795_vm0, %v789_v37 }
 0x1d4   : > { %969 = vst.msk [vmem:[%s1405_s19 + $0x68] sm:$0xff] %vm795_vm0, %v945_v36 }
 0x1d6   : > { %v950_v38 = vpop.xlane.xlu0 %949 }
 0x1d7   : > { %v794_v39 = vpop.xlane.xlu1 %793  ;;  %970 = vst.msk [vmem:[%s1405_s19 + $0x70] sm:$0xff] %vm795_vm0, %v950_v38 }
 0x1d8   : > { %811 = vst.msk [vmem:[%s1398_s16 + $0x78] sm:$0xff] %vm795_vm0, %v794_v39 }
 0x1db   : > { %v955_v40 = vpop.xlane.xlu1 %954 }
 0x1dc   : > { %971 = vst.msk [vmem:[%s1405_s19 + $0x78] sm:$0xff] %vm795_vm0, %v955_v40 }
 0x1dd PF: > { %s14_s14 = sadd.s32 1, %s1273_s14   ;;  %s1482_s12 = smov %s1269_s13 }
 0x1de   : > { %p11_p5 = scmp.ge.s32.totalorder %s14_s14, 4   ;;  %s1483_s13 = smov %s1485_s15 }
 0x1e0   :  { %13 = sbr.rel (!%p11_p5) target bundleno = 2 (0x2), region = 70 }

// kernel: pointgencon_forward.5
= control target key start
LH: loop header
LB: loop body
LE: loop exit
PB: predicated region body
PF: predicated region fallthrough
CT: control target
= control target key end

     0   :  { %s1868_s21 = smov 0   ;;  %s1870_s22 = smov 0   ;;  %s2248_s0 = inlined_call_operand.vmem [shape: bf16[2,128,512], index: 0, kind: input, shape index: {}]   ;;  %s2249_s1 = inlined_call_operand.vmem [shape: bf16[128,128], index: 1, kind: input, shape index: {}]   ;;  %s2250_s2 = inlined_call_operand.vmem [shape: f32[128,1], index: 2, kind: input, shape index: {}]   ;;  %s2251_s3 = inlined_call_operand.vmem [shape: f32[128,1], index: 3, kind: input, shape index: {}]   ;;  %s2252_s4 = inlined_call_operand.vmem [shape: bf16[64,128], index: 4, kind: input, shape index: {}]   ;;  %s2253_s5 = inlined_call_operand.vmem [shape: f32[2,1,64,1], index: 5, kind: output, shape index: {0}]   ;;  %s2254_s6 = inlined_call_operand.vmem [shape: f32[2,1,64,1], index: 6, kind: output, shape index: {1}]  }
   0x1   :  { %s1872_s23 = smov 0  }
   0x2 LB: > { %s29_s24 = sadd.s32 1, %s1826_s22  ;;  %p1665_p0 = scmp.ge.s32.totalorder %s1830_s23, 1  ;;  %s1830_s23 = sphi %s1872_s23, %s17_s23   ;;  %s1826_s22 = sphi %s1870_s22, %s2256_s22   ;;  %s1822_s21 = sphi %s1868_s21, %s2255_s21  }
   0x3   : > { %p31_p1 = scmp.ge.s32.totalorder %s29_s24, 2  ;;  %p238_p2 = scmp.lt.s32.totalorder %s1830_s23, 3 }
   0x5   : > { %s2258_s24 = smov (%p31_p1, %s29_s24), 0  ;;  %p239_p3 = pnand %p1665_p0, %p238_p2 }
   0x6   : > { %p286_p4 = scmp.lt.s32.totalorder (!%p239_p3), %s1822_s21, 1  ;;  %v1832_v0 = vmov (!%p239_p3), 0   ;;  %v796_v1 = vld [vmem:[%s2250_s2] sm:$0xff] (!%p239_p3)  ;;  %v797_v3 = vld [vmem:[%s2250_s2 + $0x8] sm:$0xff] (!%p239_p3)  ;;  %v798_v7 = vld [vmem:[%s2250_s2 + $0x10] sm:$0xff] (!%p239_p3)  ;;  %vm1430_vm0 = vcmask (!%p239_p3), 7168  }
   0x7   : > { %242 = sbr.rel (%p239_p3) target bundleno = 727 (0x2d7), region = 40  ;;  %602 = vmatprep.mubr.bf16.mxu0 (!%p239_p3), %v1832_v0  ;;  %715 = vmatprep.mubr.bf16.mxu1 (!%p239_p3), %v1832_v0  ;;  %v956_v2 = vld [vmem:[%s2251_s3] sm:$0xff] (!%p239_p3)  ;;  %v957_v4 = vld [vmem:[%s2251_s3 + $0x8] sm:$0xff] (!%p239_p3)  ;;  %v799_v32 = vld [vmem:[%s2250_s2 + $0x18] sm:$0xff] (!%p239_p3) }
   0x8   : > { %1746 = vset.pattern.permute.xlu0 (!%p239_p3), %v1832_v0  ;;  %1747 = vset.pattern.permute.xlu1 (!%p239_p3), %v1832_v0  ;;  %v958_v33 = vld [vmem:[%s2251_s3 + $0x10] sm:$0xff] (!%p239_p3)  ;;  %v959_v36 = vld [vmem:[%s2251_s3 + $0x18] sm:$0xff] (!%p239_p3)  ;;  %v800_v37 = vld [vmem:[%s2250_s2 + $0x20] sm:$0xff] (!%p239_p3) }
   0x9   : > { %814 = vperm.xlu0 (!%p239_p3), %1746, %v796_v1   ;;  %974 = vperm.xlu1 (!%p239_p3), %1747, %v956_v2   ;;  %v801_v42 = vld [vmem:[%s2250_s2 + $0x28] sm:$0xff] (!%p239_p3)  ;;  %v960_v43 = vld [vmem:[%s2251_s3 + $0x20] sm:$0xff] (!%p239_p3)  ;;  %v802_v46 = vld [vmem:[%s2250_s2 + $0x30] sm:$0xff] (!%p239_p3) }
   0xa   : > { %v1796_v44 = vld [vmem:[%s2249_s1] sm:$0xff] (!%p239_p3)   ;;  %v961_v45 = vld [vmem:[%s2251_s3 + $0x28] sm:$0xff] (!%p239_p3)  ;;  %v803_v47 = vld [vmem:[%s2250_s2 + $0x38] sm:$0xff] (!%p239_p3) }
   0xb   : > { %v962_v48 = vld [vmem:[%s2251_s3 + $0x30] sm:$0xff] (!%p239_p3)  ;;  %v1797_v49 = vld [vmem:[%s2249_s1 + $0x8] sm:$0xff] (!%p239_p3)   ;;  %v963_v50 = vld [vmem:[%s2251_s3 + $0x38] sm:$0xff] (!%p239_p3) }
   0xc   : > { %v804_v51 = vld [vmem:[%s2250_s2 + $0x40] sm:$0xff] (!%p239_p3)  ;;  %v805_v52 = vld [vmem:[%s2250_s2 + $0x48] sm:$0xff] (!%p239_p3)  ;;  %v1798_v54 = vld [vmem:[%s2249_s1 + $0x10] sm:$0xff] (!%p239_p3)  }
   0xd   : > { %819 = vperm.xlu0 (!%p239_p3), %1746, %v797_v3   ;;  %979 = vperm.xlu1 (!%p239_p3), %1747, %v957_v4   ;;  %v964_v53 = vld [vmem:[%s2251_s3 + $0x40] sm:$0xff] (!%p239_p3)  ;;  %v965_v55 = vld [vmem:[%s2251_s3 + $0x48] sm:$0xff] (!%p239_p3)  ;;  %v806_v56 = vld [vmem:[%s2250_s2 + $0x50] sm:$0xff] (!%p239_p3) }
   0xe   : > { %s2260_s21 = smov (!%p286_p4, %s1822_s21), 1  ;;  %v807_v57 = vld [vmem:[%s2250_s2 + $0x58] sm:$0xff]  ;;  %v966_v58 = vld [vmem:[%s2251_s3 + $0x50] sm:$0xff]  ;;  %v808_v61 = vld [vmem:[%s2250_s2 + $0x60] sm:$0xff] }
   0xf   : > { %s1718_s27 = sshll.u32 %s2260_s21, 8  ;;  %v1799_v59 = vld [vmem:[%s2249_s1 + $0x18] sm:$0xff]   ;;  %v809_v62 = vld [vmem:[%s2250_s2 + $0x68] sm:$0xff]  ;;  %v968_v63 = vld [vmem:[%s2251_s3 + $0x60] sm:$0xff]  ;;  %s1719_s13 = sshll.u32 %s2260_s21, 6 }
  0x10   : > { %s1902_s8 = scalar_lea.vmem %s2248_s0, %s1718_s27  ;;  %v967_v60 = vld [vmem:[%s2251_s3 + $0x58] sm:$0xff]  ;;  %v1800_v1 = vld [vmem:[%s2249_s1 + $0x20] sm:$0xff]   ;;  %v969_v2 = vld [vmem:[%s2251_s3 + $0x68] sm:$0xff]  ;;  %s303_s16 = scalar_lea.vmem %s2253_s5, %s1719_s13 }
  0x11   : > { %v1748_v5 = vld [vmem:[%s1902_s8 + $0x4] ss:$16 sps:$4 sm:$0xff]   ;;  %v1750_v6 = vld [vmem:[%s1902_s8 + $0xc] ss:$16 sps:$4 sm:$0xff]   ;;  %v1752_v8 = vld [vmem:[%s1902_s8] ss:$16 sps:$4 sm:$0xff]   ;;  %824 = vperm.xlu0 %1746, %v798_v7   ;;  %829 = vperm.xlu1 %1747, %v799_v32   ;;  %s312_s19 = scalar_lea.vmem %s2254_s6, %s1719_s13 }
  0x12   : > { %570 = vmatprep.subr.bf16.mxu0 %v1748_v5  ;;  %v1753_v9 = vld [vmem:[%s1902_s8 + $0x8] ss:$16 sps:$4 sm:$0xff]   ;;  %683 = vmatprep.subr.bf16.mxu1 %v1750_v6  ;;  %v1754_v10 = vld [vmem:[%s1902_s8 + $0x24] ss:$16 sps:$4 sm:$0xff]   ;;  %v1756_v11 = vld [vmem:[%s1902_s8 + $0x2c] ss:$16 sps:$4 sm:$0xff]  }
  0x13   : > { %571 = vmatpush1.bf16.msra.mxu0 %v1752_v8  ;;  %684 = vmatpush1.bf16.msra.mxu1 %v1753_v9  ;;  %v1758_v12 = vld [vmem:[%s1902_s8 + $0x20] ss:$16 sps:$4 sm:$0xff]   ;;  %v1759_v13 = vld [vmem:[%s1902_s8 + $0x28] ss:$16 sps:$4 sm:$0xff]   ;;  %v1760_v14 = vld [vmem:[%s1902_s8 + $0x44] ss:$16 sps:$4 sm:$0xff]  }
  0x14   : > { %572 = vmatprep.subr.bf16.mxu0 %v1754_v10  ;;  %685 = vmatprep.subr.bf16.mxu1 %v1756_v11  ;;  %v1762_v15 = vld [vmem:[%s1902_s8 + $0x4c] ss:$16 sps:$4 sm:$0xff]   ;;  %v1764_v16 = vld [vmem:[%s1902_s8 + $0x40] ss:$16 sps:$4 sm:$0xff]   ;;  %v1765_v17 = vld [vmem:[%s1902_s8 + $0x48] ss:$16 sps:$4 sm:$0xff]  }
  0x15   : > { %v1766_v18 = vld [vmem:[%s1902_s8 + $0x64] ss:$16 sps:$4 sm:$0xff]   ;;  %v1768_v19 = vld [vmem:[%s1902_s8 + $0x6c] ss:$16 sps:$4 sm:$0xff]   ;;  %v1770_v20 = vld [vmem:[%s1902_s8 + $0x60] ss:$16 sps:$4 sm:$0xff]   ;;  %984 = vperm.xlu0 %1746, %v958_v33   ;;  %989 = vperm.xlu1 %1747, %v959_v36  }
  0x16   : > { %v1771_v21 = vld [vmem:[%s1902_s8 + $0x68] ss:$16 sps:$4 sm:$0xff]   ;;  %v1772_v22 = vld [vmem:[%s1902_s8 + $0x84] ss:$16 sps:$4 sm:$0xff]   ;;  %v1774_v23 = vld [vmem:[%s1902_s8 + $0x8c] ss:$16 sps:$4 sm:$0xff]  }
  0x17   : > { %573 = vmatpush1.bf16.msra.mxu0 %v1758_v12  ;;  %686 = vmatpush1.bf16.msra.mxu1 %v1759_v13  ;;  %v1776_v24 = vld [vmem:[%s1902_s8 + $0x80] ss:$16 sps:$4 sm:$0xff]   ;;  %v1777_v25 = vld [vmem:[%s1902_s8 + $0x88] ss:$16 sps:$4 sm:$0xff]   ;;  %v1778_v26 = vld [vmem:[%s1902_s8 + $0xa4] ss:$16 sps:$4 sm:$0xff]  }
  0x18   : > { %574 = vmatprep.subr.bf16.mxu0 %v1760_v14  ;;  %687 = vmatprep.subr.bf16.mxu1 %v1762_v15  ;;  %v1780_v27 = vld [vmem:[%s1902_s8 + $0xac] ss:$16 sps:$4 sm:$0xff]   ;;  %v1782_v28 = vld [vmem:[%s1902_s8 + $0xa0] ss:$16 sps:$4 sm:$0xff]   ;;  %v1783_v29 = vld [vmem:[%s1902_s8 + $0xa8] ss:$16 sps:$4 sm:$0xff]  }
  0x19   : > { %v1784_v30 = vld [vmem:[%s1902_s8 + $0xc4] ss:$16 sps:$4 sm:$0xff]   ;;  %v1786_v31 = vld [vmem:[%s1902_s8 + $0xcc] ss:$16 sps:$4 sm:$0xff]   ;;  %v1788_v34 = vld [vmem:[%s1902_s8 + $0xc0] ss:$16 sps:$4 sm:$0xff]   ;;  %834 = vperm.xlu0 %1746, %v800_v37   ;;  %839 = vperm.xlu1 %1747, %v801_v42  }
  0x1a   : > { %v1789_v35 = vld [vmem:[%s1902_s8 + $0xc8] ss:$16 sps:$4 sm:$0xff]   ;;  %v1790_v38 = vld [vmem:[%s1902_s8 + $0xe4] ss:$16 sps:$4 sm:$0xff]   ;;  %v1792_v39 = vld [vmem:[%s1902_s8 + $0xec] ss:$16 sps:$4 sm:$0xff]  }
  0x1b   : > { %575 = vmatpush1.bf16.msra.mxu0 %v1764_v16  ;;  %688 = vmatpush1.bf16.msra.mxu1 %v1765_v17  ;;  %v1794_v40 = vld [vmem:[%s1902_s8 + $0xe0] ss:$16 sps:$4 sm:$0xff]   ;;  %v1795_v41 = vld [vmem:[%s1902_s8 + $0xe8] ss:$16 sps:$4 sm:$0xff]  }
  0x1c   : > { %576 = vmatprep.subr.bf16.mxu0 %v1766_v18  ;;  %689 = vmatprep.subr.bf16.mxu1 %v1768_v19  ;;  %v810_v3 = vld [vmem:[%s2250_s2 + $0x70] sm:$0xff]  ;;  %v811_v4 = vld [vmem:[%s2250_s2 + $0x78] sm:$0xff]  ;;  %v1801_v6 = vld [vmem:[%s2249_s1 + $0x28] sm:$0xff]  }
  0x1d   : > { %994 = vperm.xlu0 %1746, %v960_v43   ;;  %999 = vperm.xlu1 %1747, %v961_v45   ;;  %v970_v5 = vld [vmem:[%s2251_s3 + $0x70] sm:$0xff]  ;;  %v971_v7 = vld [vmem:[%s2251_s3 + $0x78] sm:$0xff] }
  0x1e   : > { %v1802_v8 = vld [vmem:[%s2249_s1 + $0x30] sm:$0xff]   ;;  %v1803_v9 = vld [vmem:[%s2249_s1 + $0x38] sm:$0xff]  }
  0x1f   : > { %577 = vmatpush1.bf16.msra.mxu0 %v1770_v20  ;;  %690 = vmatpush1.bf16.msra.mxu1 %v1771_v21 }
  0x20   : > { %578 = vmatprep.subr.bf16.mxu0 %v1772_v22  ;;  %691 = vmatprep.subr.bf16.mxu1 %v1774_v23 }
  0x21   : > { %844 = vperm.xlu0 %1746, %v802_v46   ;;  %849 = vperm.xlu1 %1747, %v803_v47  }
  0x23   : > { %579 = vmatpush1.bf16.msra.mxu0 %v1776_v24  ;;  %692 = vmatpush1.bf16.msra.mxu1 %v1777_v25 }
  0x24   : > { %580 = vmatprep.subr.bf16.mxu0 %v1778_v26  ;;  %693 = vmatprep.subr.bf16.mxu1 %v1780_v27 }
  0x25   : > { %1004 = vperm.xlu0 %1746, %v962_v48   ;;  %1009 = vperm.xlu1 %1747, %v963_v50  }
  0x27   : > { %581 = vmatpush1.bf16.msra.mxu0 %v1782_v28  ;;  %694 = vmatpush1.bf16.msra.mxu1 %v1783_v29 }
  0x28   : > { %582 = vmatprep.subr.bf16.mxu0 %v1784_v30  ;;  %695 = vmatprep.subr.bf16.mxu1 %v1786_v31 }
  0x29   : > { %854 = vperm.xlu0 %1746, %v804_v51   ;;  %859 = vperm.xlu1 %1747, %v805_v52  }
  0x2b   : > { %583 = vmatpush1.bf16.msra.mxu0 %v1788_v34  ;;  %696 = vmatpush1.bf16.msra.mxu1 %v1789_v35 }
  0x2c   : > { %584 = vmatprep.subr.bf16.mxu0 %v1790_v38  ;;  %697 = vmatprep.subr.bf16.mxu1 %v1792_v39 }
  0x2d   : > { %1014 = vperm.xlu0 %1746, %v964_v53   ;;  %1019 = vperm.xlu1 %1747, %v965_v55  }
  0x2f   : > { %585 = vmatpush1.bf16.msra.mxu0 %v1794_v40  ;;  %698 = vmatpush1.bf16.msra.mxu1 %v1795_v41 }
  0x31   : > { %864 = vperm.xlu0 %1746, %v806_v56   ;;  %869 = vperm.xlu1 %1747, %v807_v57  }
  0x32   : > { %603 = vmatmul.mubr.bf16.vlgmr.msra.gmra.mrb[0].mxu0 %v1796_v44  ;;  %716 = vmatmul.mubr.bf16.vlgmr.msra.gmra.mrb[0].mxu1 %v1796_v44 }
  0x33   : > { %612 = vmatprep.mubr.bf16.mxu0 %v1832_v0  ;;  %725 = vmatprep.mubr.bf16.mxu1 %v1832_v0 }
  0x35   : > { %1024 = vperm.xlu0 %1746, %v966_v58   ;;  %1029 = vperm.xlu1 %1747, %v967_v60  }
  0x39   : > { %874 = vperm.xlu0 %1746, %v808_v61   ;;  %879 = vperm.xlu1 %1747, %v809_v62  }
  0x3a   : > { %613 = vmatmul.mubr.bf16.gmra.mrb[4].mxu0 %v1797_v49  ;;  %726 = vmatmul.mubr.bf16.gmra.mrb[4].mxu1 %v1797_v49 }
  0x3b   : > { %622 = vmatprep.mubr.bf16.mxu0 %v1832_v0  ;;  %735 = vmatprep.mubr.bf16.mxu1 %v1832_v0 }
  0x3d   : > { %1034 = vperm.xlu0 %1746, %v968_v63   ;;  %1039 = vperm.xlu1 %1747, %v969_v2  }
  0x41   : > { %884 = vperm.xlu0 %1746, %v810_v3   ;;  %889 = vperm.xlu1 %1747, %v811_v4  }
  0x42   : > { %623 = vmatmul.mubr.bf16.gmra.mrb[8].mxu0 %v1798_v54  ;;  %736 = vmatmul.mubr.bf16.gmra.mrb[8].mxu1 %v1798_v54 }
  0x43   : > { %632 = vmatprep.mubr.bf16.mxu0 %v1832_v0  ;;  %745 = vmatprep.mubr.bf16.mxu1 %v1832_v0 }
  0x45   : > { %1044 = vperm.xlu0 %1746, %v970_v5   ;;  %1049 = vperm.xlu1 %1747, %v971_v7  }
  0x4a   : > { %633 = vmatmul.mubr.bf16.gmra.mrb[12].mxu0 %v1799_v59  ;;  %746 = vmatmul.mubr.bf16.gmra.mrb[12].mxu1 %v1799_v59 }
  0x4b   : > { %642 = vmatprep.mubr.bf16.mxu0 %v1832_v0  ;;  %755 = vmatprep.mubr.bf16.mxu1 %v1832_v0 }
  0x52   : > { %643 = vmatmul.mubr.bf16.gmra.mrb[16].mxu0 %v1800_v1  ;;  %756 = vmatmul.mubr.bf16.gmra.mrb[16].mxu1 %v1800_v1 }
  0x53   : > { %652 = vmatprep.mubr.bf16.mxu0 %v1832_v0  ;;  %765 = vmatprep.mubr.bf16.mxu1 %v1832_v0 }
  0x5a   : > { %653 = vmatmul.mubr.bf16.gmra.mrb[20].mxu0 %v1801_v6  ;;  %766 = vmatmul.mubr.bf16.gmra.mrb[20].mxu1 %v1801_v6 }
  0x5b   : > { %662 = vmatprep.mubr.bf16.mxu0 %v1832_v0  ;;  %775 = vmatprep.mubr.bf16.mxu1 %v1832_v0 }
  0x62   : > { %663 = vmatmul.mubr.bf16.gmra.mrb[24].mxu0 %v1802_v8  ;;  %776 = vmatmul.mubr.bf16.gmra.mrb[24].mxu1 %v1802_v8 }
  0x63   : > { %672 = vmatprep.mubr.bf16.mxu0 %v1832_v0  ;;  %785 = vmatprep.mubr.bf16.mxu1 %v1832_v0 }
  0x6a   : > { %673 = vmatmul.mubr.bf16.gmra.mrb[28].mxu0 %v1803_v9  ;;  %786 = vmatmul.mubr.bf16.gmra.mrb[28].mxu1 %v1803_v9 }
  0x6b   : > { %1276 = vmatprep.mubr.bf16.mxu0 %v1832_v0  ;;  %1349 = vmatprep.mubr.bf16.mxu1 %v1832_v0 }
  0x88   : > { %v815_v10 = vpop.permute.xlu0 %814  ;;  %v975_v11 = vpop.permute.xlu1 %974 }
  0x8c   : > { %v820_v12 = vpop.permute.xlu0 %819  ;;  %v980_v13 = vpop.permute.xlu1 %979 }
  0x90   : > { %v825_v14 = vpop.permute.xlu0 %824  ;;  %v2066_v15 = vpop.permute.xlu1 %829 }
  0x94   : > { %v2068_v16 = vpop.permute.xlu0 %984  ;;  %v2070_v17 = vpop.permute.xlu1 %989 }
  0x98   : > { %v2072_v18 = vpop.permute.xlu0 %834  ;;  %v2074_v19 = vpop.permute.xlu1 %839 }
  0x9c   : > { %v2076_v20 = vpop.permute.xlu0 %994  ;;  %v2078_v21 = vpop.permute.xlu1 %999 }
  0xa0   : > { %v2080_v22 = vpop.permute.xlu0 %844  ;;  %v2082_v23 = vpop.permute.xlu1 %849 }
  0xa4   : > { %v2084_v24 = vpop.permute.xlu0 %1004  ;;  %v2086_v25 = vpop.permute.xlu1 %1009 }
  0xa8   : > { %v2088_v26 = vpop.permute.xlu0 %854  ;;  %v2090_v51 = vpop.permute.xlu1 %859 }
  0xac   : > { %v2092_v52 = vpop.permute.xlu0 %1014 }
 0x105   : > { %v604_v27 = vpop.f32.mrb[0].mxu0  ;;  %v717_v28 = vpop.f32.mrb[0].mxu1 }
 0x106   : > { %v892_v29 = vmul.f32 %v815_v10, %v604_v27  ;;  %v894_v30 = vmul.f32 %v815_v10, %v717_v28  ;;  %v606_v31 = vpop.f32.mrb[1].mxu0  ;;  %v719_v32 = vpop.f32.mrb[1].mxu1 }
 0x107   : > { %v893_v33 = vmul.f32 %v815_v10, %v606_v31  ;;  %v895_v34 = vmul.f32 %v815_v10, %v719_v32  ;;  %v608_v35 = vpop.f32.mrb[2].mxu0  ;;  %v721_v36 = vpop.f32.mrb[2].mxu1 }
 0x108   : > { %v1052_v37 = vadd.f32 %v975_v11, %v892_v29  ;;  %v1054_v38 = vadd.f32 %v975_v11, %v894_v30  ;;  %v896_v39 = vmul.f32 %v820_v12, %v608_v35  ;;  %v898_v40 = vmul.f32 %v820_v12, %v721_v36  ;;  %v610_v41 = vpop.f32.mrb[3].mxu0  ;;  %v723_v42 = vpop.f32.mrb[3].mxu1 }
 0x109   : > { %v1053_v43 = vadd.f32 %v975_v11, %v893_v33  ;;  %v1055_v44 = vadd.f32 %v975_v11, %v895_v34  ;;  %v897_v45 = vmul.f32 %v820_v12, %v610_v41  ;;  %v899_v46 = vmul.f32 %v820_v12, %v723_v42 }
 0x10a   : > { %v1056_v47 = vadd.f32 %v980_v13, %v896_v39  ;;  %v1058_v48 = vadd.f32 %v980_v13, %v898_v40  ;;  %v1116_v53 = vmax.f32 %v1052_v37, 0.0  ;;  %v1118_v54 = vmax.f32 %v1054_v38, 0.0  ;;  %v2106_v38 = vpop.permute.xlu1 %1019  ;;  %v2108_v39 = vpop.permute.xlu0 %864 }
 0x10b   : > { %v1057_v49 = vadd.f32 %v980_v13, %v897_v45  ;;  %v1059_v50 = vadd.f32 %v980_v13, %v899_v46  ;;  %v1117_v57 = vmax.f32 %v1053_v43, 0.0  ;;  %v1119_v58 = vmax.f32 %v1055_v44, 0.0 }
 0x10c   : > { %v1120_v55 = vmax.f32 %v1056_v47, 0.0  ;;  %v1122_v56 = vmax.f32 %v1058_v48, 0.0 }
 0x10d   : > { %v1121_v59 = vmax.f32 %v1057_v49, 0.0  ;;  %v1123_v60 = vmax.f32 %v1059_v50, 0.0  ;;  %v614_v61 = vpop.f32.mrb[4].mxu0  ;;  %v727_v62 = vpop.f32.mrb[4].mxu1 }
 0x10e   : > { %v1180_v63 = vpack.c.bf16 %v1120_v55, %v1116_v53  ;;  %v1182_v1 = vpack.c.bf16 %v1122_v56, %v1118_v54  ;;  %v900_v2 = vmul.f32 %v825_v14, %v614_v61  ;;  %v902_v3 = vmul.f32 %v825_v14, %v727_v62  ;;  %v616_v4 = vpop.f32.mrb[5].mxu0  ;;  %v729_v5 = vpop.f32.mrb[5].mxu1 }
 0x10f   : > { %v901_v6 = vmul.f32 %v825_v14, %v616_v4  ;;  %v903_v7 = vmul.f32 %v825_v14, %v729_v5  ;;  %v618_v8 = vpop.f32.mrb[6].mxu0  ;;  %v731_v9 = vpop.f32.mrb[6].mxu1  ;;  %v1181_v10 = vpack.c.bf16 %v1121_v59, %v1117_v57  ;;  %v1183_v11 = vpack.c.bf16 %v1123_v60, %v1119_v58 }
 0x110   : > { %v1060_v12 = vadd.f32 %v2068_v16, %v900_v2  ;;  %v1062_v13 = vadd.f32 %v2068_v16, %v902_v3  ;;  %v904_v27 = vmul.f32 %v2066_v15, %v618_v8  ;;  %v906_v28 = vmul.f32 %v2066_v15, %v731_v9  ;;  %v620_v29 = vpop.f32.mrb[7].mxu0  ;;  %v733_v30 = vpop.f32.mrb[7].mxu1 }
 0x111   : > { %v1061_v31 = vadd.f32 %v2068_v16, %v901_v6  ;;  %v1063_v32 = vadd.f32 %v2068_v16, %v903_v7  ;;  %v905_v14 = vmul.f32 %v2066_v15, %v620_v29  ;;  %v907_v33 = vmul.f32 %v2066_v15, %v733_v30  ;;  %1244 = vmatprep.subr.bf16.mxu0 %v1181_v10 }
 0x112   : > { %v1064_v34 = vadd.f32 %v2070_v17, %v904_v27  ;;  %v1066_v35 = vadd.f32 %v2070_v17, %v906_v28  ;;  %1317 = vmatprep.subr.bf16.mxu1 %v1183_v11  ;;  %1245 = vmatpush1.bf16.msra.mxu0 %v1180_v63  ;;  %v1124_v16 = vmax.f32 %v1060_v12, 0.0  ;;  %v1126_v40 = vmax.f32 %v1062_v13, 0.0  ;;  %v2126_v11 = vpop.permute.xlu1 %869  ;;  %v2128_v12 = vpop.permute.xlu0 %1024 }
 0x113   : > { %v1065_v36 = vadd.f32 %v2070_v17, %v905_v14  ;;  %v1067_v37 = vadd.f32 %v2070_v17, %v907_v33  ;;  %1318 = vmatpush1.bf16.msra.mxu1 %v1182_v1  ;;  %v1125_v42 = vmax.f32 %v1061_v31, 0.0  ;;  %v1127_v43 = vmax.f32 %v1063_v32, 0.0 }
 0x114   : > { %v1128_v41 = vmax.f32 %v1064_v34, 0.0  ;;  %v1130_v15 = vmax.f32 %v1066_v35, 0.0 }
 0x115   : > { %v1129_v44 = vmax.f32 %v1065_v36, 0.0  ;;  %v1131_v45 = vmax.f32 %v1067_v37, 0.0  ;;  %v624_v46 = vpop.f32.mrb[8].mxu0  ;;  %v737_v47 = vpop.f32.mrb[8].mxu1 }
 0x116   : > { %v1184_v48 = vpack.c.bf16 %v1128_v41, %v1124_v16  ;;  %v1186_v49 = vpack.c.bf16 %v1130_v15, %v1126_v40  ;;  %v908_v50 = vmul.f32 %v2072_v18, %v624_v46  ;;  %v910_v17 = vmul.f32 %v2072_v18, %v737_v47  ;;  %v626_v53 = vpop.f32.mrb[9].mxu0  ;;  %v739_v54 = vpop.f32.mrb[9].mxu1 }
 0x117   : > { %v909_v55 = vmul.f32 %v2072_v18, %v626_v53  ;;  %v911_v56 = vmul.f32 %v2072_v18, %v739_v54  ;;  %v628_v57 = vpop.f32.mrb[10].mxu0  ;;  %v741_v58 = vpop.f32.mrb[10].mxu1  ;;  %v1185_v59 = vpack.c.bf16 %v1129_v44, %v1125_v42  ;;  %v1187_v60 = vpack.c.bf16 %v1131_v45, %v1127_v43 }
 0x118   : > { %v1068_v61 = vadd.f32 %v2076_v20, %v908_v50  ;;  %v1070_v62 = vadd.f32 %v2076_v20, %v910_v17  ;;  %v912_v63 = vmul.f32 %v2074_v19, %v628_v57  ;;  %v914_v1 = vmul.f32 %v2074_v19, %v741_v58  ;;  %v630_v2 = vpop.f32.mrb[11].mxu0  ;;  %v743_v3 = vpop.f32.mrb[11].mxu1 }
 0x119   : > { %v1069_v4 = vadd.f32 %v2076_v20, %v909_v55  ;;  %v1071_v5 = vadd.f32 %v2076_v20, %v911_v56  ;;  %v913_v18 = vmul.f32 %v2074_v19, %v630_v2  ;;  %v915_v6 = vmul.f32 %v2074_v19, %v743_v3  ;;  %1246 = vmatprep.subr.bf16.mxu0 %v1185_v59  ;;  %v2146_v58 = vpop.permute.xlu1 %1029  ;;  %v2148_v59 = vpop.permute.xlu0 %874 }
 0x11a   : > { %v1072_v7 = vadd.f32 %v2078_v21, %v912_v63  ;;  %v1074_v8 = vadd.f32 %v2078_v21, %v914_v1  ;;  %1319 = vmatprep.subr.bf16.mxu1 %v1187_v60  ;;  %1247 = vmatpush1.bf16.msra.mxu0 %v1184_v48  ;;  %v1132_v20 = vmax.f32 %v1068_v61, 0.0  ;;  %v1134_v13 = vmax.f32 %v1070_v62, 0.0 }
 0x11b   : > { %v1073_v9 = vadd.f32 %v2078_v21, %v913_v18  ;;  %v1075_v10 = vadd.f32 %v2078_v21, %v915_v6  ;;  %1320 = vmatpush1.bf16.msra.mxu1 %v1186_v49  ;;  %v1133_v28 = vmax.f32 %v1069_v4, 0.0  ;;  %v1135_v29 = vmax.f32 %v1071_v5, 0.0 }
 0x11c   : > { %v1136_v27 = vmax.f32 %v1072_v7, 0.0  ;;  %v1138_v19 = vmax.f32 %v1074_v8, 0.0 }
 0x11d   : > { %v1137_v30 = vmax.f32 %v1073_v9, 0.0  ;;  %v1139_v31 = vmax.f32 %v1075_v10, 0.0  ;;  %v634_v32 = vpop.f32.mrb[12].mxu0  ;;  %v747_v14 = vpop.f32.mrb[12].mxu1 }
 0x11e   : > { %v1188_v33 = vpack.c.bf16 %v1136_v27, %v1132_v20  ;;  %v1190_v34 = vpack.c.bf16 %v1138_v19, %v1134_v13  ;;  %v916_v35 = vmul.f32 %v2080_v22, %v634_v32  ;;  %v918_v21 = vmul.f32 %v2080_v22, %v747_v14  ;;  %v636_v36 = vpop.f32.mrb[13].mxu0  ;;  %v749_v37 = vpop.f32.mrb[13].mxu1 }
 0x11f   : > { %v917_v16 = vmul.f32 %v2080_v22, %v636_v36  ;;  %v919_v40 = vmul.f32 %v2080_v22, %v749_v37  ;;  %v638_v41 = vpop.f32.mrb[14].mxu0  ;;  %v751_v15 = vpop.f32.mrb[14].mxu1  ;;  %v1189_v42 = vpack.c.bf16 %v1137_v30, %v1133_v28  ;;  %v1191_v43 = vpack.c.bf16 %v1139_v31, %v1135_v29 }
 0x120   : > { %v1076_v44 = vadd.f32 %v2084_v24, %v916_v35  ;;  %v1078_v45 = vadd.f32 %v2084_v24, %v918_v21  ;;  %v920_v46 = vmul.f32 %v2082_v23, %v638_v41  ;;  %v922_v47 = vmul.f32 %v2082_v23, %v751_v15  ;;  %v640_v48 = vpop.f32.mrb[15].mxu0  ;;  %v753_v49 = vpop.f32.mrb[15].mxu1 }
 0x121   : > { %v1077_v50 = vadd.f32 %v2084_v24, %v917_v16  ;;  %v1079_v17 = vadd.f32 %v2084_v24, %v919_v40  ;;  %v921_v22 = vmul.f32 %v2082_v23, %v640_v48  ;;  %v923_v53 = vmul.f32 %v2082_v23, %v753_v49  ;;  %1248 = vmatprep.subr.bf16.mxu0 %v1189_v42  ;;  %v2166_v40 = vpop.permute.xlu1 %879  ;;  %v2168_v41 = vpop.permute.xlu0 %1034 }
 0x122   : > { %v1080_v54 = vadd.f32 %v2086_v25, %v920_v46  ;;  %v1082_v55 = vadd.f32 %v2086_v25, %v922_v47  ;;  %1321 = vmatprep.subr.bf16.mxu1 %v1191_v43  ;;  %1249 = vmatpush1.bf16.msra.mxu0 %v1188_v33  ;;  %v1140_v24 = vmax.f32 %v1076_v44, 0.0  ;;  %v1142_v60 = vmax.f32 %v1078_v45, 0.0 }
 0x123   : > { %v1081_v56 = vadd.f32 %v2086_v25, %v921_v22  ;;  %v1083_v57 = vadd.f32 %v2086_v25, %v923_v53  ;;  %1322 = vmatpush1.bf16.msra.mxu1 %v1190_v34  ;;  %v1141_v62 = vmax.f32 %v1077_v50, 0.0  ;;  %v1143_v63 = vmax.f32 %v1079_v17, 0.0 }
 0x124   : > { %v1144_v61 = vmax.f32 %v1080_v54, 0.0  ;;  %v1146_v23 = vmax.f32 %v1082_v55, 0.0 }
 0x125   : > { %v1145_v1 = vmax.f32 %v1081_v56, 0.0  ;;  %v1147_v2 = vmax.f32 %v1083_v57, 0.0  ;;  %v644_v3 = vpop.f32.mrb[16].mxu0  ;;  %v757_v4 = vpop.f32.mrb[16].mxu1 }
 0x126   : > { %v1192_v5 = vpack.c.bf16 %v1144_v61, %v1140_v24  ;;  %v1194_v18 = vpack.c.bf16 %v1146_v23, %v1142_v60  ;;  %v924_v6 = vmul.f32 %v2088_v26, %v644_v3  ;;  %v926_v25 = vmul.f32 %v2088_v26, %v757_v4  ;;  %v646_v7 = vpop.f32.mrb[17].mxu0  ;;  %v759_v8 = vpop.f32.mrb[17].mxu1 }
 0x127   : > { %v925_v9 = vmul.f32 %v2088_v26, %v646_v7  ;;  %v927_v10 = vmul.f32 %v2088_v26, %v759_v8  ;;  %v648_v20 = vpop.f32.mrb[18].mxu0  ;;  %v761_v13 = vpop.f32.mrb[18].mxu1  ;;  %v1193_v27 = vpack.c.bf16 %v1145_v1, %v1141_v62  ;;  %v1195_v19 = vpack.c.bf16 %v1147_v2, %v1143_v63 }
 0x128   : > { %v1084_v28 = vadd.f32 %v2092_v52, %v924_v6  ;;  %v1086_v29 = vadd.f32 %v2092_v52, %v926_v25  ;;  %v928_v30 = vmul.f32 %v2090_v51, %v648_v20  ;;  %v930_v31 = vmul.f32 %v2090_v51, %v761_v13  ;;  %v650_v32 = vpop.f32.mrb[19].mxu0  ;;  %v763_v14 = vpop.f32.mrb[19].mxu1 }
 0x129   : > { %v1085_v33 = vadd.f32 %v2092_v52, %v925_v9  ;;  %v1087_v34 = vadd.f32 %v2092_v52, %v927_v10  ;;  %v929_v26 = vmul.f32 %v2090_v51, %v650_v32  ;;  %v931_v35 = vmul.f32 %v2090_v51, %v763_v14  ;;  %1250 = vmatprep.subr.bf16.mxu0 %v1193_v27  ;;  %v1040_v8 = vpop.permute.xlu1 %1039  ;;  %v885_v9 = vpop.permute.xlu0 %884 }
 0x12a   : > { %v1088_v21 = vadd.f32 %v2106_v38, %v928_v30  ;;  %v1090_v36 = vadd.f32 %v2106_v38, %v930_v31  ;;  %1323 = vmatprep.subr.bf16.mxu1 %v1195_v19  ;;  %1251 = vmatpush1.bf16.msra.mxu0 %v1192_v5  ;;  %v1148_v52 = vmax.f32 %v1084_v28, 0.0  ;;  %v1150_v15 = vmax.f32 %v1086_v29, 0.0 }
 0x12b   : > { %v1089_v37 = vadd.f32 %v2106_v38, %v929_v26  ;;  %v1091_v16 = vadd.f32 %v2106_v38, %v931_v35  ;;  %1324 = vmatpush1.bf16.msra.mxu1 %v1194_v18  ;;  %v1149_v43 = vmax.f32 %v1085_v33, 0.0  ;;  %v1151_v44 = vmax.f32 %v1087_v34, 0.0 }
 0x12c   : > { %v1152_v42 = vmax.f32 %v1088_v21, 0.0  ;;  %v1154_v51 = vmax.f32 %v1090_v36, 0.0 }
 0x12d   : > { %v1153_v45 = vmax.f32 %v1089_v37, 0.0  ;;  %v1155_v46 = vmax.f32 %v1091_v16, 0.0  ;;  %v654_v47 = vpop.f32.mrb[20].mxu0  ;;  %v767_v48 = vpop.f32.mrb[20].mxu1 }
 0x12e   : > { %v1196_v49 = vpack.c.bf16 %v1152_v42, %v1148_v52  ;;  %v1198_v50 = vpack.c.bf16 %v1154_v51, %v1150_v15  ;;  %v932_v17 = vmul.f32 %v2108_v39, %v654_v47  ;;  %v934_v38 = vmul.f32 %v2108_v39, %v767_v48  ;;  %v656_v22 = vpop.f32.mrb[21].mxu0  ;;  %v769_v53 = vpop.f32.mrb[21].mxu1 }
 0x12f   : > { %v933_v54 = vmul.f32 %v2108_v39, %v656_v22  ;;  %v935_v55 = vmul.f32 %v2108_v39, %v769_v53  ;;  %v658_v56 = vpop.f32.mrb[22].mxu0  ;;  %v771_v57 = vpop.f32.mrb[22].mxu1  ;;  %v1197_v24 = vpack.c.bf16 %v1153_v45, %v1149_v43  ;;  %v1199_v60 = vpack.c.bf16 %v1155_v46, %v1151_v44 }
 0x130   : > { %v1092_v61 = vadd.f32 %v2128_v12, %v932_v17  ;;  %v1094_v23 = vadd.f32 %v2128_v12, %v934_v38  ;;  %v936_v62 = vmul.f32 %v2126_v11, %v658_v56  ;;  %v938_v63 = vmul.f32 %v2126_v11, %v771_v57  ;;  %v660_v1 = vpop.f32.mrb[23].mxu0  ;;  %v773_v2 = vpop.f32.mrb[23].mxu1 }
 0x131   : > { %v1093_v3 = vadd.f32 %v2128_v12, %v933_v54  ;;  %v1095_v4 = vadd.f32 %v2128_v12, %v935_v55  ;;  %v937_v39 = vmul.f32 %v2126_v11, %v660_v1  ;;  %v939_v5 = vmul.f32 %v2126_v11, %v773_v2  ;;  %1252 = vmatprep.subr.bf16.mxu0 %v1197_v24  ;;  %v1045_v22 = vpop.permute.xlu0 %1044 }
 0x132   : > { %v1096_v18 = vadd.f32 %v2146_v58, %v936_v62  ;;  %v1098_v6 = vadd.f32 %v2146_v58, %v938_v63  ;;  %1325 = vmatprep.subr.bf16.mxu1 %v1199_v60  ;;  %1253 = vmatpush1.bf16.msra.mxu0 %v1196_v49  ;;  %v1156_v10 = vmax.f32 %v1092_v61, 0.0  ;;  %v1158_v12 = vmax.f32 %v1094_v23, 0.0 }
 0x133   : > { %v1097_v25 = vadd.f32 %v2146_v58, %v937_v39  ;;  %v1099_v7 = vadd.f32 %v2146_v58, %v939_v5  ;;  %1326 = vmatpush1.bf16.msra.mxu1 %v1198_v50  ;;  %v1157_v27 = vmax.f32 %v1093_v3, 0.0  ;;  %v1159_v11 = vmax.f32 %v1095_v4, 0.0  ;;  %v890_v50 = vpop.permute.xlu1 %889 }
 0x134   : > { %v1160_v20 = vmax.f32 %v1096_v18, 0.0  ;;  %v1162_v13 = vmax.f32 %v1098_v6, 0.0 }
 0x135   : > { %v1161_v19 = vmax.f32 %v1097_v25, 0.0  ;;  %v1163_v28 = vmax.f32 %v1099_v7, 0.0  ;;  %v664_v29 = vpop.f32.mrb[24].mxu0  ;;  %v777_v30 = vpop.f32.mrb[24].mxu1 }
 0x136   : > { %v1200_v31 = vpack.c.bf16 %v1160_v20, %v1156_v10  ;;  %v1202_v32 = vpack.c.bf16 %v1162_v13, %v1158_v12  ;;  %v940_v14 = vmul.f32 %v2148_v59, %v664_v29  ;;  %v942_v33 = vmul.f32 %v2148_v59, %v777_v30  ;;  %v666_v58 = vpop.f32.mrb[25].mxu0  ;;  %v779_v34 = vpop.f32.mrb[25].mxu1 }
 0x137   : > { %v941_v26 = vmul.f32 %v2148_v59, %v666_v58  ;;  %v943_v35 = vmul.f32 %v2148_v59, %v779_v34  ;;  %v668_v21 = vpop.f32.mrb[26].mxu0  ;;  %v781_v36 = vpop.f32.mrb[26].mxu1  ;;  %v1201_v37 = vpack.c.bf16 %v1161_v19, %v1157_v27  ;;  %v1203_v16 = vpack.c.bf16 %v1163_v28, %v1159_v11 }
 0x138   : > { %v1100_v52 = vadd.f32 %v2168_v41, %v940_v14  ;;  %v1102_v15 = vadd.f32 %v2168_v41, %v942_v33  ;;  %v944_v42 = vmul.f32 %v2166_v40, %v668_v21  ;;  %v946_v51 = vmul.f32 %v2166_v40, %v781_v36  ;;  %v670_v43 = vpop.f32.mrb[27].mxu0  ;;  %v783_v44 = vpop.f32.mrb[27].mxu1 }
 0x139   : > { %v1101_v45 = vadd.f32 %v2168_v41, %v941_v26  ;;  %v1103_v46 = vadd.f32 %v2168_v41, %v943_v35  ;;  %v945_v59 = vmul.f32 %v2166_v40, %v670_v43  ;;  %v947_v47 = vmul.f32 %v2166_v40, %v783_v44  ;;  %1254 = vmatprep.subr.bf16.mxu0 %v1201_v37  ;;  %v1050_v27 = vpop.permute.xlu1 %1049  ;;  %v1806_v43 = vld [vmem:[%s2252_s4 + $0x10] sm:$0xff]   ;;  %v1807_v44 = vld [vmem:[%s2252_s4 + $0x18] sm:$0xff]  }
 0x13a   : > { %v1104_v48 = vadd.f32 %v1040_v8, %v944_v42  ;;  %v1106_v49 = vadd.f32 %v1040_v8, %v946_v51  ;;  %1327 = vmatprep.subr.bf16.mxu1 %v1203_v16  ;;  %1255 = vmatpush1.bf16.msra.mxu0 %v1200_v31  ;;  %v1164_v53 = vmax.f32 %v1100_v52, 0.0  ;;  %v1166_v54 = vmax.f32 %v1102_v15, 0.0  ;;  %v1804_v42 = vld [vmem:[%s2252_s4] sm:$0xff]   ;;  %v1805_v51 = vld [vmem:[%s2252_s4 + $0x8] sm:$0xff]  }
 0x13b   : > { %v1105_v17 = vadd.f32 %v1040_v8, %v945_v59  ;;  %v1107_v38 = vadd.f32 %v1040_v8, %v947_v47  ;;  %1328 = vmatpush1.bf16.msra.mxu1 %v1202_v32  ;;  %v1165_v57 = vmax.f32 %v1101_v45, 0.0  ;;  %v1167_v41 = vmax.f32 %v1103_v46, 0.0 }
 0x13c   : > { %v1168_v55 = vmax.f32 %v1104_v48, 0.0  ;;  %v1170_v56 = vmax.f32 %v1106_v49, 0.0 }
 0x13d   : > { %v1169_v24 = vmax.f32 %v1105_v17, 0.0  ;;  %v1171_v60 = vmax.f32 %v1107_v38, 0.0  ;;  %v674_v61 = vpop.f32.mrb[28].mxu0  ;;  %v787_v40 = vpop.f32.mrb[28].mxu1 }
 0x13e   : > { %v1204_v23 = vpack.c.bf16 %v1168_v55, %v1164_v53  ;;  %v1206_v62 = vpack.c.bf16 %v1170_v56, %v1166_v54  ;;  %v948_v63 = vmul.f32 %v885_v9, %v674_v61  ;;  %v950_v1 = vmul.f32 %v885_v9, %v787_v40  ;;  %v676_v2 = vpop.f32.mrb[29].mxu0  ;;  %v789_v3 = vpop.f32.mrb[29].mxu1 }
 0x13f   : > { %v949_v4 = vmul.f32 %v885_v9, %v676_v2  ;;  %v951_v39 = vmul.f32 %v885_v9, %v789_v3  ;;  %v678_v5 = vpop.f32.mrb[30].mxu0  ;;  %v791_v18 = vpop.f32.mrb[30].mxu1  ;;  %v1205_v6 = vpack.c.bf16 %v1169_v24, %v1165_v57  ;;  %v1207_v25 = vpack.c.bf16 %v1171_v60, %v1167_v41 }
 0x140   : > { %v1108_v7 = vadd.f32 %v1045_v22, %v948_v63  ;;  %v1110_v8 = vadd.f32 %v1045_v22, %v950_v1  ;;  %v952_v10 = vmul.f32 %v890_v50, %v678_v5  ;;  %v954_v12 = vmul.f32 %v890_v50, %v791_v18  ;;  %v680_v20 = vpop.f32.mrb[31].mxu0  ;;  %v793_v13 = vpop.f32.mrb[31].mxu1 }
 0x141   : > { %v1109_v11 = vadd.f32 %v1045_v22, %v949_v4  ;;  %v1111_v19 = vadd.f32 %v1045_v22, %v951_v39  ;;  %v953_v28 = vmul.f32 %v890_v50, %v680_v20  ;;  %v955_v29 = vmul.f32 %v890_v50, %v793_v13  ;;  %1256 = vmatprep.subr.bf16.mxu0 %v1205_v6 }
 0x142   : > { %v1112_v30 = vadd.f32 %v1050_v27, %v952_v10  ;;  %v1114_v31 = vadd.f32 %v1050_v27, %v954_v12  ;;  %1329 = vmatprep.subr.bf16.mxu1 %v1207_v25  ;;  %1257 = vmatpush1.bf16.msra.mxu0 %v1204_v23  ;;  %v1172_v14 = vmax.f32 %v1108_v7, 0.0  ;;  %v1174_v33 = vmax.f32 %v1110_v8, 0.0 }
 0x143   : > { %v1113_v9 = vadd.f32 %v1050_v27, %v953_v28  ;;  %v1115_v32 = vadd.f32 %v1050_v27, %v955_v29  ;;  %1330 = vmatpush1.bf16.msra.mxu1 %v1206_v62  ;;  %v1173_v26 = vmax.f32 %v1109_v11, 0.0  ;;  %v1175_v35 = vmax.f32 %v1111_v19, 0.0 }
 0x144   : > { %v1176_v58 = vmax.f32 %v1112_v30, 0.0  ;;  %v1178_v34 = vmax.f32 %v1114_v31, 0.0 }
 0x145   : > { %v1177_v21 = vmax.f32 %v1113_v9, 0.0  ;;  %v1179_v36 = vmax.f32 %v1115_v32, 0.0 }
 0x146   : > { %v1208_v37 = vpack.c.bf16 %v1176_v58, %v1172_v14  ;;  %v1210_v16 = vpack.c.bf16 %v1178_v34, %v1174_v33 }
 0x147   : > { %v1209_v52 = vpack.c.bf16 %v1177_v21, %v1173_v26  ;;  %v1211_v15 = vpack.c.bf16 %v1179_v36, %v1175_v35 }
 0x149   : > { %1258 = vmatprep.subr.bf16.mxu0 %v1209_v52  ;;  %1331 = vmatprep.subr.bf16.mxu1 %v1211_v15 }
 0x14a   : > { %1259 = vmatpush1.bf16.msra.mxu0 %v1208_v37  ;;  %1332 = vmatpush1.bf16.msra.mxu1 %v1210_v16 }
 0x14d   : > { %1277 = vmatmul.mubr.bf16.vlgmr.msra.gmra.mrb[32].mxu0 %v1804_v42  ;;  %1350 = vmatmul.mubr.bf16.vlgmr.msra.gmra.mrb[32].mxu1 %v1804_v42 }
 0x14e   : > { %1286 = vmatprep.mubr.bf16.mxu0 %v1832_v0  ;;  %1359 = vmatprep.mubr.bf16.mxu1 %v1832_v0 }
 0x155   : > { %1287 = vmatmul.mubr.bf16.gmra.mrb[36].mxu0 %v1805_v51  ;;  %1360 = vmatmul.mubr.bf16.gmra.mrb[36].mxu1 %v1805_v51 }
 0x156   : > { %1296 = vmatprep.mubr.bf16.mxu0 %v1832_v0  ;;  %1369 = vmatprep.mubr.bf16.mxu1 %v1832_v0 }
 0x15d   : > { %1297 = vmatmul.mubr.bf16.gmra.mrb[40].mxu0 %v1806_v43  ;;  %1370 = vmatmul.mubr.bf16.gmra.mrb[40].mxu1 %v1806_v43 }
 0x15e   : > { %1306 = vmatprep.mubr.bf16.mxu0 %v1832_v0  ;;  %1379 = vmatprep.mubr.bf16.mxu1 %v1832_v0 }
 0x165   : > { %1307 = vmatmul.mubr.bf16.gmra.mrb[44].mxu0 %v1807_v44  ;;  %1380 = vmatmul.mubr.bf16.gmra.mrb[44].mxu1 %v1807_v44 }
 0x220   : > { %v1278_v45 = vpop.f32.mrb[32].mxu0  ;;  %v1351_v46 = vpop.f32.mrb[32].mxu1 }
 0x221   : > { %v1439_v59 = vmul.f32 %v1278_v45, %v1278_v45  ;;  %v1280_v47 = vpop.f32.mrb[33].mxu0  ;;  %v1353_v48 = vpop.f32.mrb[33].mxu1  ;;  %v1441_v38 = vmul.f32 %v1351_v46, %v1351_v46 }
 0x222   : > { %v1390_v49 = vadd.f32 %v1280_v47, %v1278_v45  ;;  %v1440_v50 = vmul.f32 %v1280_v47, %v1280_v47  ;;  %v1282_v17 = vpop.f32.mrb[34].mxu0  ;;  %v1355_v22 = vpop.f32.mrb[34].mxu1  ;;  %v1442_v24 = vmul.f32 %v1353_v48, %v1353_v48 }
 0x223   : > { %v1443_v53 = vmul.f32 %v1282_v17, %v1282_v17  ;;  %v1284_v54 = vpop.f32.mrb[35].mxu0  ;;  %v1357_v55 = vpop.f32.mrb[35].mxu1  ;;  %v1445_v60 = vmul.f32 %v1355_v22, %v1355_v22 }
 0x224   : > { %v1471_v0 = vadd.f32 %v1440_v50, %v1439_v59  ;;  %v1395_v56 = vadd.f32 %v1284_v54, %v1282_v17  ;;  %v1444_v57 = vmul.f32 %v1284_v54, %v1284_v54  ;;  %v1391_v41 = vadd.f32 %v1390_v49, %v1351_v46 }
 0x225   : > { %v1446_v63 = vmul.f32 %v1357_v55, %v1357_v55 }
 0x226   : > { %v1476_v61 = vadd.f32 %v1444_v57, %v1443_v53  ;;  %v1396_v40 = vadd.f32 %v1395_v56, %v1355_v22  ;;  %v1392_v23 = vadd.f32 %v1391_v41, %v1353_v48  ;;  %v1472_v62 = vadd.f32 %v1471_v0, %v1441_v38 }
 0x228   : > { %1393 = vadd.xlane.f32.xlu0 %v1392_v23  ;;  %v1288_v1 = vpop.f32.mrb[36].mxu0  ;;  %v1397_v2 = vadd.f32 %v1396_v40, %v1357_v55  ;;  %v1361_v3 = vpop.f32.mrb[36].mxu1  ;;  %v1477_v4 = vadd.f32 %v1476_v61, %v1445_v60  ;;  %v1473_v39 = vadd.f32 %v1472_v62, %v1442_v24 }
 0x229   : > { %v1447_v5 = vmul.f32 %v1288_v1, %v1288_v1  ;;  %v1290_v18 = vpop.f32.mrb[37].mxu0  ;;  %v1363_v6 = vpop.f32.mrb[37].mxu1  ;;  %v1449_v10 = vmul.f32 %v1361_v3, %v1361_v3 }
 0x22a   : > { %v1400_v25 = vadd.f32 %v1290_v18, %v1288_v1  ;;  %v1448_v7 = vmul.f32 %v1290_v18, %v1290_v18  ;;  %1398 = vadd.xlane.f32.xlu1 %v1397_v2  ;;  %v1292_v8 = vpop.f32.mrb[38].mxu0  ;;  %v1478_v12 = vadd.f32 %v1477_v4, %v1446_v63  ;;  %v1365_v20 = vpop.f32.mrb[38].mxu1  ;;  %v1450_v31 = vmul.f32 %v1363_v6, %v1363_v6 }
 0x22b   : > { %v1451_v13 = vmul.f32 %v1292_v8, %v1292_v8  ;;  %v1294_v27 = vpop.f32.mrb[39].mxu0  ;;  %v1367_v11 = vpop.f32.mrb[39].mxu1  ;;  %v1453_v9 = vmul.f32 %v1365_v20, %v1365_v20 }
 0x22c   : > { %v1481_v19 = vadd.f32 %v1448_v7, %v1447_v5  ;;  %v1401_v28 = vadd.f32 %v1400_v25, %v1361_v3  ;;  %1479 = vadd.xlane.f32.xlu0 %v1478_v12  ;;  %v1405_v29 = vadd.f32 %v1294_v27, %v1292_v8  ;;  %v1452_v30 = vmul.f32 %v1294_v27, %v1294_v27 }
 0x22d   : > { %v1454_v34 = vmul.f32 %v1367_v11, %v1367_v11 }
 0x22e   : > { %v1486_v32 = vadd.f32 %v1452_v30, %v1451_v13  ;;  %v1406_v14 = vadd.f32 %v1405_v29, %v1365_v20  ;;  %1474 = vadd.xlane.f32.xlu1 %v1473_v39  ;;  %v1402_v33 = vadd.f32 %v1401_v28, %v1363_v6  ;;  %v1482_v58 = vadd.f32 %v1481_v19, %v1449_v10 }
 0x230   : > { %1403 = vadd.xlane.f32.xlu0 %v1402_v33  ;;  %v1298_v26 = vpop.f32.mrb[40].mxu0  ;;  %v1407_v35 = vadd.f32 %v1406_v14, %v1367_v11  ;;  %v1371_v21 = vpop.f32.mrb[40].mxu1  ;;  %v1483_v36 = vadd.f32 %v1482_v58, %v1450_v31  ;;  %v1487_v37 = vadd.f32 %v1486_v32, %v1453_v9 }
 0x231   : > { %v1455_v16 = vmul.f32 %v1298_v26, %v1298_v26  ;;  %v1300_v52 = vpop.f32.mrb[41].mxu0  ;;  %v1373_v15 = vpop.f32.mrb[41].mxu1  ;;  %v1457_v44 = vmul.f32 %v1371_v21, %v1371_v21 }
 0x232   : > { %v1410_v42 = vadd.f32 %v1300_v52, %v1298_v26  ;;  %v1456_v51 = vmul.f32 %v1300_v52, %v1300_v52  ;;  %v1302_v43 = vpop.f32.mrb[42].mxu0  ;;  %1484 = vadd.xlane.f32.xlu1 %v1483_v36  ;;  %v1375_v45 = vpop.f32.mrb[42].mxu1  ;;  %v1488_v46 = vadd.f32 %v1487_v37, %v1454_v34  ;;  %v1458_v48 = vmul.f32 %v1373_v15, %v1373_v15 }
 0x233   : > { %v1459_v59 = vmul.f32 %v1302_v43, %v1302_v43  ;;  %v1304_v47 = vpop.f32.mrb[43].mxu0  ;;  %v1461_v49 = vmul.f32 %v1375_v45, %v1375_v45  ;;  %v1377_v50 = vpop.f32.mrb[43].mxu1 }
 0x234   : > { %v1491_v17 = vadd.f32 %v1456_v51, %v1455_v16  ;;  %1408 = vadd.xlane.f32.xlu0 %v1407_v35  ;;  %v1411_v38 = vadd.f32 %v1410_v42, %v1371_v21  ;;  %v1415_v22 = vadd.f32 %v1304_v47, %v1302_v43  ;;  %v1460_v53 = vmul.f32 %v1304_v47, %v1304_v47 }
 0x235   : > { %v1462_v57 = vmul.f32 %v1377_v50, %v1377_v50 }
 0x236   : > { %v1496_v54 = vadd.f32 %v1460_v53, %v1459_v59  ;;  %v1416_v55 = vadd.f32 %v1415_v22, %v1375_v45  ;;  %v1412_v0 = vadd.f32 %v1411_v38, %v1373_v15  ;;  %v1492_v56 = vadd.f32 %v1491_v17, %v1457_v44 }
 0x238   : > { %1489 = vadd.xlane.f32.xlu0 %v1488_v46  ;;  %v1308_v41 = vpop.f32.mrb[44].mxu0  ;;  %1413 = vadd.xlane.f32.xlu1 %v1412_v0  ;;  %v1417_v24 = vadd.f32 %v1416_v55, %v1377_v50  ;;  %v1381_v60 = vpop.f32.mrb[44].mxu1  ;;  %v1493_v61 = vadd.f32 %v1492_v56, %v1458_v48  ;;  %v1497_v40 = vadd.f32 %v1496_v54, %v1461_v49 }
 0x239   : > { %v1463_v23 = vmul.f32 %v1308_v41, %v1308_v41  ;;  %v1310_v62 = vpop.f32.mrb[45].mxu0  ;;  %v1383_v63 = vpop.f32.mrb[45].mxu1  ;;  %v1465_v4 = vmul.f32 %v1381_v60, %v1381_v60 }
 0x23a   : > { %v1420_v1 = vadd.f32 %v1310_v62, %v1308_v41  ;;  %v1464_v2 = vmul.f32 %v1310_v62, %v1310_v62  ;;  %v1312_v3 = vpop.f32.mrb[46].mxu0  ;;  %v1385_v39 = vpop.f32.mrb[46].mxu1  ;;  %v1498_v5 = vadd.f32 %v1497_v40, %v1462_v57  ;;  %v1466_v25 = vmul.f32 %v1383_v63, %v1383_v63 }
 0x23b   : > { %v1467_v18 = vmul.f32 %v1312_v3, %v1312_v3  ;;  %v1314_v6 = vpop.f32.mrb[47].mxu0  ;;  %v1469_v7 = vmul.f32 %v1385_v39, %v1385_v39  ;;  %v1387_v8 = vpop.f32.mrb[47].mxu1 }
 0x23c   : > { %v1501_v10 = vadd.f32 %v1464_v2, %v1463_v23  ;;  %1418 = vadd.xlane.f32.xlu0 %v1417_v24  ;;  %v1425_v12 = vadd.f32 %v1314_v6, %v1312_v3  ;;  %v1468_v20 = vmul.f32 %v1314_v6, %v1314_v6  ;;  %v1421_v13 = vadd.f32 %v1420_v1, %v1381_v60 }
 0x23d   : > { %1494 = vadd.xlane.f32.xlu1 %v1493_v61  ;;  %v1470_v30 = vmul.f32 %v1387_v8, %v1387_v8 }
 0x23e   : > { %v1506_v27 = vadd.f32 %v1468_v20, %v1467_v18  ;;  %v1426_v11 = vadd.f32 %v1425_v12, %v1385_v39  ;;  %v1422_v19 = vadd.f32 %v1421_v13, %v1383_v63  ;;  %v1502_v28 = vadd.f32 %v1501_v10, %v1465_v4 }
 0x240   : > { %1499 = vadd.xlane.f32.xlu0 %v1498_v5  ;;  %v1427_v29 = vadd.f32 %v1426_v11, %v1387_v8  ;;  %v1503_v31 = vadd.f32 %v1502_v28, %v1466_v25  ;;  %v1507_v9 = vadd.f32 %v1506_v27, %v1469_v7 }
 0x241   : > { %1423 = vadd.xlane.f32.xlu1 %v1422_v19 }
 0x242   : > { %v1508_v32 = vadd.f32 %v1507_v9, %v1470_v30 }
 0x244   : > { %1428 = vadd.xlane.f32.xlu0 %v1427_v29 }
 0x245   : > { %1504 = vadd.xlane.f32.xlu1 %v1503_v31 }
 0x248   : > { %1509 = vadd.xlane.f32.xlu0 %v1508_v32 }
 0x2b5   : > { %v1394_v14 = vpop.xlane.xlu0 %1393 }
 0x2b6   : > { %1431 = vst.msk [vmem:[%s303_s16] sm:$0xff] %vm1430_vm0, %v1394_v14 }
 0x2b7   : > { %v1399_v33 = vpop.xlane.xlu1 %1398 }
 0x2b8   : > { %1432 = vst.msk [vmem:[%s303_s16 + $0x8] sm:$0xff] %vm1430_vm0, %v1399_v33 }
 0x2b9   : > { %v1480_v58 = vpop.xlane.xlu0 %1479 }
 0x2ba   : > { %1512 = vst.msk [vmem:[%s312_s19 + $0x8] sm:$0xff] %vm1430_vm0, %v1480_v58 }
 0x2bb   : > { %v1475_v34 = vpop.xlane.xlu1 %1474 }
 0x2bc   : > { %1511 = vst.msk [vmem:[%s312_s19] sm:$0xff] %vm1430_vm0, %v1475_v34 }
 0x2bd   : > { %v1404_v26 = vpop.xlane.xlu0 %1403 }
 0x2be   : > { %1433 = vst.msk [vmem:[%s303_s16 + $0x10] sm:$0xff] %vm1430_vm0, %v1404_v26 }
 0x2bf   : > { %v1485_v35 = vpop.xlane.xlu1 %1484 }
 0x2c0   : > { %1513 = vst.msk [vmem:[%s312_s19 + $0x10] sm:$0xff] %vm1430_vm0, %v1485_v35 }
 0x2c1   : > { %v1409_v21 = vpop.xlane.xlu0 %1408 }
 0x2c2   : > { %1434 = vst.msk [vmem:[%s303_s16 + $0x18] sm:$0xff] %vm1430_vm0, %v1409_v21 }
 0x2c5   : > { %v1490_v36 = vpop.xlane.xlu0 %1489  ;;  %v1414_v37 = vpop.xlane.xlu1 %1413 }
 0x2c6   : > { %1514 = vst.msk [vmem:[%s312_s19 + $0x18] sm:$0xff] %vm1430_vm0, %v1490_v36  ;;  %1435 = vst.msk [vmem:[%s303_s16 + $0x20] sm:$0xff] %vm1430_vm0, %v1414_v37 }
 0x2c9   : > { %v1419_v16 = vpop.xlane.xlu0 %1418 }
 0x2ca   : > { %1436 = vst.msk [vmem:[%s303_s16 + $0x28] sm:$0xff] %vm1430_vm0, %v1419_v16  ;;  %v1495_v52 = vpop.xlane.xlu1 %1494 }
 0x2cb   : > { %1515 = vst.msk [vmem:[%s312_s19 + $0x20] sm:$0xff] %vm1430_vm0, %v1495_v52 }
 0x2cd   : > { %v1500_v15 = vpop.xlane.xlu0 %1499 }
 0x2ce   : > { %1516 = vst.msk [vmem:[%s312_s19 + $0x28] sm:$0xff] %vm1430_vm0, %v1500_v15  ;;  %v1424_v42 = vpop.xlane.xlu1 %1423 }
 0x2cf   : > { %1437 = vst.msk [vmem:[%s303_s16 + $0x30] sm:$0xff] %vm1430_vm0, %v1424_v42 }
 0x2d1   : > { %v1429_v51 = vpop.xlane.xlu0 %1428 }
 0x2d2   : > { %1438 = vst.msk [vmem:[%s303_s16 + $0x38] sm:$0xff] %vm1430_vm0, %v1429_v51  ;;  %v1505_v43 = vpop.xlane.xlu1 %1504 }
 0x2d3   : > { %1517 = vst.msk [vmem:[%s312_s19 + $0x30] sm:$0xff] %vm1430_vm0, %v1505_v43 }
 0x2d5   : > { %v1510_v44 = vpop.xlane.xlu0 %1509 }
 0x2d6   : > { %1518 = vst.msk [vmem:[%s312_s19 + $0x38] sm:$0xff] %vm1430_vm0, %v1510_v44 }
 0x2d7 PF: > { %s17_s23 = sadd.s32 1, %s1830_s23   ;;  %s2255_s21 = smov %s1826_s22 }
 0x2d8   : > { %p14_p5 = scmp.ge.s32.totalorder %s17_s23, 4   ;;  %s2256_s22 = smov %s2258_s24 }
 0x2da   :  { %16 = sbr.rel (!%p14_p5) target bundleno = 2 (0x2), region = 82 }

// kernel: pointgencon_forward.6
= control target key start
LH: loop header
LB: loop body
LE: loop exit
PB: predicated region body
PF: predicated region fallthrough
CT: control target
= control target key end

     0   :  { %s2243_s30 = smov 0   ;;  %s2245_s10 = smov 0   ;;  %s2697_s0 = inlined_call_operand.vmem [shape: bf16[2,128,512], index: 0, kind: input, shape index: {}]   ;;  %s2698_s1 = inlined_call_operand.vmem [shape: bf16[128,128], index: 1, kind: input, shape index: {}]   ;;  %s2699_s2 = inlined_call_operand.vmem [shape: f32[128,1], index: 2, kind: input, shape index: {}]   ;;  %s2700_s3 = inlined_call_operand.vmem [shape: f32[128,1], index: 3, kind: input, shape index: {}]   ;;  %s2701_s4 = inlined_call_operand.vmem [shape: bf16[64,128], index: 4, kind: input, shape index: {}]   ;;  %s2702_s5 = inlined_call_operand.vmem [shape: f32[64,1], index: 5, kind: input, shape index: {}]   ;;  %s2703_s6 = inlined_call_operand.vmem [shape: f32[64,1], index: 6, kind: input, shape index: {}]   ;;  %s2704_s7 = inlined_call_operand.vmem [shape: bf16[32,64], index: 7, kind: input, shape index: {}]   ;;  %s2705_s8 = inlined_call_operand.vmem [shape: f32[2,1,32,1], index: 8, kind: output, shape index: {0}]   ;;  %s2706_s9 = inlined_call_operand.vmem [shape: f32[2,1,32,1], index: 9, kind: output, shape index: {1}]  }
   0x1   :  { %s2247_s11 = smov 0  }
   0x2 LB: > { %s32_s12 = sadd.s32 1, %s2186_s10  ;;  %p2017_p0 = scmp.ge.s32.totalorder %s2190_s11, 1  ;;  %s2190_s11 = sphi %s2247_s11, %s20_s11   ;;  %s2186_s10 = sphi %s2245_s10, %s2708_s10   ;;  %s2182_s30 = sphi %s2243_s30, %s2707_s30  }
   0x3   : > { %p34_p1 = scmp.ge.s32.totalorder %s32_s12, 2  ;;  %p313_p2 = scmp.lt.s32.totalorder %s2190_s11, 3 }
   0x5   : > { %s2710_s12 = smov (%p34_p1, %s32_s12), 0  ;;  %p314_p3 = pnand %p2017_p0, %p313_p2 }
   0x6   : > { %p367_p4 = scmp.lt.s32.totalorder (!%p314_p3), %s2182_s30, 1  ;;  %v877_v0 = vld [vmem:[%s2699_s2] sm:$0xff] (!%p314_p3)  ;;  %v2192_v2 = vmov (!%p314_p3), 0   ;;  %v878_v3 = vld [vmem:[%s2699_s2 + $0x8] sm:$0xff] (!%p314_p3)  ;;  %v879_v6 = vld [vmem:[%s2699_s2 + $0x10] sm:$0xff] (!%p314_p3)  ;;  %vm1693_vm0 = vcmask (!%p314_p3), 523264  }
   0x7   : > { %317 = sbr.rel (%p314_p3) target bundleno = 962 (0x3c2), region = 52  ;;  %v1037_v1 = vld [vmem:[%s2700_s3] sm:$0xff] (!%p314_p3)  ;;  %2104 = vset.pattern.permute.xlu0 (!%p314_p3), %v2192_v2  ;;  %2105 = vset.pattern.permute.xlu1 (!%p314_p3), %v2192_v2  ;;  %v1038_v4 = vld [vmem:[%s2700_s3 + $0x8] sm:$0xff] (!%p314_p3)  ;;  %v880_v8 = vld [vmem:[%s2699_s2 + $0x18] sm:$0xff] (!%p314_p3)  ;;  %vm1826_vm1 = vcmask (!%p314_p3), 7168  }
   0x8   : > { %895 = vperm.xlu0 (!%p314_p3), %2104, %v877_v0   ;;  %1055 = vperm.xlu1 (!%p314_p3), %2105, %v1037_v1   ;;  %v1039_v15 = vld [vmem:[%s2700_s3 + $0x10] sm:$0xff] (!%p314_p3)  ;;  %v1040_v16 = vld [vmem:[%s2700_s3 + $0x18] sm:$0xff] (!%p314_p3)  ;;  %v881_v23 = vld [vmem:[%s2699_s2 + $0x20] sm:$0xff] (!%p314_p3) }
   0x9   : > { %683 = vmatprep.mubr.bf16.mxu0 (!%p314_p3), %v2192_v2  ;;  %796 = vmatprep.mubr.bf16.mxu1 (!%p314_p3), %v2192_v2  ;;  %v882_v24 = vld [vmem:[%s2699_s2 + $0x28] sm:$0xff] (!%p314_p3)  ;;  %v1041_v29 = vld [vmem:[%s2700_s3 + $0x20] sm:$0xff] (!%p314_p3)  ;;  %v883_v39 = vld [vmem:[%s2699_s2 + $0x30] sm:$0xff] (!%p314_p3) }
   0xa   : > { %v1042_v32 = vld [vmem:[%s2700_s3 + $0x28] sm:$0xff] (!%p314_p3)  ;;  %v884_v40 = vld [vmem:[%s2699_s2 + $0x38] sm:$0xff] (!%p314_p3)  ;;  %v1043_v43 = vld [vmem:[%s2700_s3 + $0x30] sm:$0xff] (!%p314_p3) }
   0xb   : > { %v1044_v44 = vld [vmem:[%s2700_s3 + $0x38] sm:$0xff] (!%p314_p3)  ;;  %v885_v48 = vld [vmem:[%s2699_s2 + $0x40] sm:$0xff] (!%p314_p3)  ;;  %v886_v50 = vld [vmem:[%s2699_s2 + $0x48] sm:$0xff] (!%p314_p3) }
   0xc   : > { %900 = vperm.xlu0 (!%p314_p3), %2104, %v878_v3   ;;  %1060 = vperm.xlu1 (!%p314_p3), %2105, %v1038_v4   ;;  %v2154_v51 = vld [vmem:[%s2698_s1] sm:$0xff] (!%p314_p3)   ;;  %v1046_v53 = vld [vmem:[%s2700_s3 + $0x48] sm:$0xff] (!%p314_p3)  ;;  %v887_v54 = vld [vmem:[%s2699_s2 + $0x50] sm:$0xff] (!%p314_p3) }
   0xd   : > { %v1045_v52 = vld [vmem:[%s2700_s3 + $0x40] sm:$0xff] (!%p314_p3)  ;;  %v2155_v55 = vld [vmem:[%s2698_s1 + $0x8] sm:$0xff] (!%p314_p3)   ;;  %v888_v56 = vld [vmem:[%s2699_s2 + $0x58] sm:$0xff] (!%p314_p3) }
   0xe   : > { %s2712_s30 = smov (!%p367_p4, %s2182_s30), 1  ;;  %v1047_v57 = vld [vmem:[%s2700_s3 + $0x50] sm:$0xff]  ;;  %v1048_v58 = vld [vmem:[%s2700_s3 + $0x58] sm:$0xff]  ;;  %v889_v59 = vld [vmem:[%s2699_s2 + $0x60] sm:$0xff] }
   0xf   : > { %s2076_s21 = sshll.u32 %s2712_s30, 8  ;;  %v890_v60 = vld [vmem:[%s2699_s2 + $0x68] sm:$0xff]  ;;  %v2156_v61 = vld [vmem:[%s2698_s1 + $0x10] sm:$0xff]   ;;  %v1049_v62 = vld [vmem:[%s2700_s3 + $0x60] sm:$0xff]  ;;  %s2077_s23 = sshll.u32 %s2712_s30, 5 }
  0x10   : > { %s2283_s24 = scalar_lea.vmem %s2697_s0, %s2076_s21  ;;  %905 = vperm.xlu0 %2104, %v879_v6   ;;  %910 = vperm.xlu1 %2105, %v880_v8   ;;  %v1050_v63 = vld [vmem:[%s2700_s3 + $0x68] sm:$0xff]  ;;  %v891_v0 = vld [vmem:[%s2699_s2 + $0x70] sm:$0xff]  ;;  %v892_v1 = vld [vmem:[%s2699_s2 + $0x78] sm:$0xff]  ;;  %s384_s26 = scalar_lea.vmem %s2705_s8, %s2077_s23 }
  0x11   : > { %v2106_v5 = vld [vmem:[%s2283_s24 + $0x4] ss:$16 sps:$4 sm:$0xff]   ;;  %v2108_v7 = vld [vmem:[%s2283_s24 + $0xc] ss:$16 sps:$4 sm:$0xff]   ;;  %v2110_v9 = vld [vmem:[%s2283_s24] ss:$16 sps:$4 sm:$0xff]   ;;  %s393_s29 = scalar_lea.vmem %s2706_s9, %s2077_s23 }
  0x12   : > { %651 = vmatprep.subr.bf16.mxu0 %v2106_v5  ;;  %v2111_v10 = vld [vmem:[%s2283_s24 + $0x8] ss:$16 sps:$4 sm:$0xff]   ;;  %764 = vmatprep.subr.bf16.mxu1 %v2108_v7  ;;  %v2112_v11 = vld [vmem:[%s2283_s24 + $0x24] ss:$16 sps:$4 sm:$0xff]   ;;  %v2114_v12 = vld [vmem:[%s2283_s24 + $0x2c] ss:$16 sps:$4 sm:$0xff]  }
  0x13   : > { %652 = vmatpush1.bf16.msra.mxu0 %v2110_v9  ;;  %765 = vmatpush1.bf16.msra.mxu1 %v2111_v10  ;;  %v2116_v13 = vld [vmem:[%s2283_s24 + $0x20] ss:$16 sps:$4 sm:$0xff]   ;;  %v2117_v14 = vld [vmem:[%s2283_s24 + $0x28] ss:$16 sps:$4 sm:$0xff]   ;;  %v2118_v17 = vld [vmem:[%s2283_s24 + $0x44] ss:$16 sps:$4 sm:$0xff]  }
  0x14   : > { %653 = vmatprep.subr.bf16.mxu0 %v2112_v11  ;;  %766 = vmatprep.subr.bf16.mxu1 %v2114_v12  ;;  %v2120_v18 = vld [vmem:[%s2283_s24 + $0x4c] ss:$16 sps:$4 sm:$0xff]   ;;  %v2122_v19 = vld [vmem:[%s2283_s24 + $0x40] ss:$16 sps:$4 sm:$0xff]   ;;  %v2123_v20 = vld [vmem:[%s2283_s24 + $0x48] ss:$16 sps:$4 sm:$0xff]  }
  0x15   : > { %v2124_v21 = vld [vmem:[%s2283_s24 + $0x64] ss:$16 sps:$4 sm:$0xff]   ;;  %v2126_v22 = vld [vmem:[%s2283_s24 + $0x6c] ss:$16 sps:$4 sm:$0xff]   ;;  %1065 = vperm.xlu0 %2104, %v1039_v15   ;;  %1070 = vperm.xlu1 %2105, %v1040_v16   ;;  %v2128_v25 = vld [vmem:[%s2283_s24 + $0x60] ss:$16 sps:$4 sm:$0xff]  }
  0x16   : > { %v2129_v26 = vld [vmem:[%s2283_s24 + $0x68] ss:$16 sps:$4 sm:$0xff]   ;;  %v2130_v27 = vld [vmem:[%s2283_s24 + $0x84] ss:$16 sps:$4 sm:$0xff]   ;;  %v2132_v28 = vld [vmem:[%s2283_s24 + $0x8c] ss:$16 sps:$4 sm:$0xff]  }
  0x17   : > { %654 = vmatpush1.bf16.msra.mxu0 %v2116_v13  ;;  %767 = vmatpush1.bf16.msra.mxu1 %v2117_v14  ;;  %v2134_v30 = vld [vmem:[%s2283_s24 + $0x80] ss:$16 sps:$4 sm:$0xff]   ;;  %v2135_v31 = vld [vmem:[%s2283_s24 + $0x88] ss:$16 sps:$4 sm:$0xff]   ;;  %v2136_v33 = vld [vmem:[%s2283_s24 + $0xa4] ss:$16 sps:$4 sm:$0xff]  }
  0x18   : > { %655 = vmatprep.subr.bf16.mxu0 %v2118_v17  ;;  %768 = vmatprep.subr.bf16.mxu1 %v2120_v18  ;;  %v2138_v34 = vld [vmem:[%s2283_s24 + $0xac] ss:$16 sps:$4 sm:$0xff]   ;;  %v2140_v35 = vld [vmem:[%s2283_s24 + $0xa0] ss:$16 sps:$4 sm:$0xff]   ;;  %v2141_v36 = vld [vmem:[%s2283_s24 + $0xa8] ss:$16 sps:$4 sm:$0xff]  }
  0x19   : > { %915 = vperm.xlu0 %2104, %v881_v23   ;;  %920 = vperm.xlu1 %2105, %v882_v24   ;;  %v2142_v37 = vld [vmem:[%s2283_s24 + $0xc4] ss:$16 sps:$4 sm:$0xff]   ;;  %v2144_v38 = vld [vmem:[%s2283_s24 + $0xcc] ss:$16 sps:$4 sm:$0xff]   ;;  %v2146_v41 = vld [vmem:[%s2283_s24 + $0xc0] ss:$16 sps:$4 sm:$0xff]  }
  0x1a   : > { %v2147_v42 = vld [vmem:[%s2283_s24 + $0xc8] ss:$16 sps:$4 sm:$0xff]   ;;  %v2148_v45 = vld [vmem:[%s2283_s24 + $0xe4] ss:$16 sps:$4 sm:$0xff]   ;;  %v2150_v46 = vld [vmem:[%s2283_s24 + $0xec] ss:$16 sps:$4 sm:$0xff]  }
  0x1b   : > { %656 = vmatpush1.bf16.msra.mxu0 %v2122_v19  ;;  %769 = vmatpush1.bf16.msra.mxu1 %v2123_v20  ;;  %v2152_v47 = vld [vmem:[%s2283_s24 + $0xe0] ss:$16 sps:$4 sm:$0xff]   ;;  %v2153_v49 = vld [vmem:[%s2283_s24 + $0xe8] ss:$16 sps:$4 sm:$0xff]  }
  0x1c   : > { %657 = vmatprep.subr.bf16.mxu0 %v2124_v21  ;;  %770 = vmatprep.subr.bf16.mxu1 %v2126_v22  ;;  %v2157_v3 = vld [vmem:[%s2698_s1 + $0x18] sm:$0xff]   ;;  %v1051_v4 = vld [vmem:[%s2700_s3 + $0x70] sm:$0xff]  ;;  %v1471_v6 = vld [vmem:[%s2702_s5] sm:$0xff] }
  0x1d   : > { %1075 = vperm.xlu0 %2104, %v1041_v29   ;;  %1080 = vperm.xlu1 %2105, %v1042_v32   ;;  %v1052_v5 = vld [vmem:[%s2700_s3 + $0x78] sm:$0xff]  ;;  %v1472_v7 = vld [vmem:[%s2702_s5 + $0x8] sm:$0xff]  ;;  %v2158_v8 = vld [vmem:[%s2698_s1 + $0x20] sm:$0xff]  }
  0x1e   : > { %v1551_v9 = vld [vmem:[%s2703_s6] sm:$0xff]  ;;  %v1552_v10 = vld [vmem:[%s2703_s6 + $0x8] sm:$0xff]  ;;  %v1473_v11 = vld [vmem:[%s2702_s5 + $0x10] sm:$0xff] }
  0x1f   : > { %658 = vmatpush1.bf16.msra.mxu0 %v2128_v25  ;;  %771 = vmatpush1.bf16.msra.mxu1 %v2129_v26  ;;  %v1474_v12 = vld [vmem:[%s2702_s5 + $0x18] sm:$0xff]  ;;  %v2159_v13 = vld [vmem:[%s2698_s1 + $0x28] sm:$0xff]   ;;  %v1553_v14 = vld [vmem:[%s2703_s6 + $0x10] sm:$0xff] }
  0x20   : > { %659 = vmatprep.subr.bf16.mxu0 %v2130_v27  ;;  %772 = vmatprep.subr.bf16.mxu1 %v2132_v28  ;;  %v1554_v15 = vld [vmem:[%s2703_s6 + $0x18] sm:$0xff]  ;;  %v1475_v16 = vld [vmem:[%s2702_s5 + $0x20] sm:$0xff]  ;;  %v1476_v17 = vld [vmem:[%s2702_s5 + $0x28] sm:$0xff] }
  0x21   : > { %925 = vperm.xlu0 %2104, %v883_v39   ;;  %930 = vperm.xlu1 %2105, %v884_v40   ;;  %v2160_v18 = vld [vmem:[%s2698_s1 + $0x30] sm:$0xff]   ;;  %v1555_v19 = vld [vmem:[%s2703_s6 + $0x20] sm:$0xff]  ;;  %v1556_v20 = vld [vmem:[%s2703_s6 + $0x28] sm:$0xff] }
  0x22   : > { %v1477_v21 = vld [vmem:[%s2702_s5 + $0x30] sm:$0xff]  ;;  %v1478_v22 = vld [vmem:[%s2702_s5 + $0x38] sm:$0xff] }
  0x23   : > { %660 = vmatpush1.bf16.msra.mxu0 %v2134_v30  ;;  %773 = vmatpush1.bf16.msra.mxu1 %v2135_v31  ;;  %v2161_v23 = vld [vmem:[%s2698_s1 + $0x38] sm:$0xff]   ;;  %v1557_v24 = vld [vmem:[%s2703_s6 + $0x30] sm:$0xff] }
  0x24   : > { %661 = vmatprep.subr.bf16.mxu0 %v2136_v33  ;;  %774 = vmatprep.subr.bf16.mxu1 %v2138_v34  ;;  %v1558_v25 = vld [vmem:[%s2703_s6 + $0x38] sm:$0xff] }
  0x25   : > { %1085 = vperm.xlu0 %2104, %v1043_v43   ;;  %1090 = vperm.xlu1 %2105, %v1044_v44  }
  0x27   : > { %662 = vmatpush1.bf16.msra.mxu0 %v2140_v35  ;;  %775 = vmatpush1.bf16.msra.mxu1 %v2141_v36 }
  0x28   : > { %663 = vmatprep.subr.bf16.mxu0 %v2142_v37  ;;  %776 = vmatprep.subr.bf16.mxu1 %v2144_v38 }
  0x29   : > { %935 = vperm.xlu0 %2104, %v885_v48   ;;  %940 = vperm.xlu1 %2105, %v886_v50  }
  0x2b   : > { %664 = vmatpush1.bf16.msra.mxu0 %v2146_v41  ;;  %777 = vmatpush1.bf16.msra.mxu1 %v2147_v42 }
  0x2c   : > { %665 = vmatprep.subr.bf16.mxu0 %v2148_v45  ;;  %778 = vmatprep.subr.bf16.mxu1 %v2150_v46 }
  0x2d   : > { %1095 = vperm.xlu0 %2104, %v1045_v52   ;;  %1100 = vperm.xlu1 %2105, %v1046_v53  }
  0x2f   : > { %666 = vmatpush1.bf16.msra.mxu0 %v2152_v47  ;;  %779 = vmatpush1.bf16.msra.mxu1 %v2153_v49 }
  0x31   : > { %945 = vperm.xlu0 %2104, %v887_v54   ;;  %950 = vperm.xlu1 %2105, %v888_v56  }
  0x32   : > { %684 = vmatmul.mubr.bf16.vlgmr.msra.gmra.mrb[0].mxu0 %v2154_v51  ;;  %797 = vmatmul.mubr.bf16.vlgmr.msra.gmra.mrb[0].mxu1 %v2154_v51 }
  0x33   : > { %693 = vmatprep.mubr.bf16.mxu0 %v2192_v2  ;;  %806 = vmatprep.mubr.bf16.mxu1 %v2192_v2 }
  0x35   : > { %1105 = vperm.xlu0 %2104, %v1047_v57   ;;  %1110 = vperm.xlu1 %2105, %v1048_v58  }
  0x39   : > { %955 = vperm.xlu0 %2104, %v889_v59   ;;  %960 = vperm.xlu1 %2105, %v890_v60  }
  0x3a   : > { %694 = vmatmul.mubr.bf16.gmra.mrb[4].mxu0 %v2155_v55  ;;  %807 = vmatmul.mubr.bf16.gmra.mrb[4].mxu1 %v2155_v55 }
  0x3b   : > { %703 = vmatprep.mubr.bf16.mxu0 %v2192_v2  ;;  %816 = vmatprep.mubr.bf16.mxu1 %v2192_v2 }
  0x3d   : > { %1115 = vperm.xlu0 %2104, %v1049_v62   ;;  %1120 = vperm.xlu1 %2105, %v1050_v63  }
  0x41   : > { %965 = vperm.xlu0 %2104, %v891_v0   ;;  %970 = vperm.xlu1 %2105, %v892_v1  }
  0x42   : > { %704 = vmatmul.mubr.bf16.gmra.mrb[8].mxu0 %v2156_v61  ;;  %817 = vmatmul.mubr.bf16.gmra.mrb[8].mxu1 %v2156_v61 }
  0x43   : > { %713 = vmatprep.mubr.bf16.mxu0 %v2192_v2  ;;  %826 = vmatprep.mubr.bf16.mxu1 %v2192_v2 }
  0x45   : > { %1125 = vperm.xlu0 %2104, %v1051_v4   ;;  %1130 = vperm.xlu1 %2105, %v1052_v5  }
  0x49   : > { %1481 = vperm.xlu0 %2104, %v1471_v6   ;;  %1486 = vperm.xlu1 %2105, %v1472_v7  }
  0x4a   : > { %714 = vmatmul.mubr.bf16.gmra.mrb[12].mxu0 %v2157_v3  ;;  %827 = vmatmul.mubr.bf16.gmra.mrb[12].mxu1 %v2157_v3 }
  0x4b   : > { %723 = vmatprep.mubr.bf16.mxu0 %v2192_v2  ;;  %836 = vmatprep.mubr.bf16.mxu1 %v2192_v2 }
  0x4d   : > { %1561 = vperm.xlu0 %2104, %v1551_v9   ;;  %1566 = vperm.xlu1 %2105, %v1552_v10  }
  0x51   : > { %1491 = vperm.xlu0 %2104, %v1473_v11   ;;  %1496 = vperm.xlu1 %2105, %v1474_v12  }
  0x52   : > { %724 = vmatmul.mubr.bf16.gmra.mrb[16].mxu0 %v2158_v8  ;;  %837 = vmatmul.mubr.bf16.gmra.mrb[16].mxu1 %v2158_v8 }
  0x53   : > { %733 = vmatprep.mubr.bf16.mxu0 %v2192_v2  ;;  %846 = vmatprep.mubr.bf16.mxu1 %v2192_v2 }
  0x55   : > { %1571 = vperm.xlu0 %2104, %v1553_v14   ;;  %1576 = vperm.xlu1 %2105, %v1554_v15  }
  0x59   : > { %1501 = vperm.xlu0 %2104, %v1475_v16   ;;  %1506 = vperm.xlu1 %2105, %v1476_v17  }
  0x5a   : > { %734 = vmatmul.mubr.bf16.gmra.mrb[20].mxu0 %v2159_v13  ;;  %847 = vmatmul.mubr.bf16.gmra.mrb[20].mxu1 %v2159_v13 }
  0x5b   : > { %743 = vmatprep.mubr.bf16.mxu0 %v2192_v2  ;;  %856 = vmatprep.mubr.bf16.mxu1 %v2192_v2 }
  0x5d   : > { %1581 = vperm.xlu0 %2104, %v1555_v19   ;;  %1586 = vperm.xlu1 %2105, %v1556_v20  }
  0x61   : > { %1511 = vperm.xlu0 %2104, %v1477_v21   ;;  %1516 = vperm.xlu1 %2105, %v1478_v22  }
  0x62   : > { %744 = vmatmul.mubr.bf16.gmra.mrb[24].mxu0 %v2160_v18  ;;  %857 = vmatmul.mubr.bf16.gmra.mrb[24].mxu1 %v2160_v18 }
  0x63   : > { %753 = vmatprep.mubr.bf16.mxu0 %v2192_v2  ;;  %866 = vmatprep.mubr.bf16.mxu1 %v2192_v2 }
  0x65   : > { %1591 = vperm.xlu0 %2104, %v1557_v24   ;;  %1596 = vperm.xlu1 %2105, %v1558_v25  }
  0x6a   : > { %754 = vmatmul.mubr.bf16.gmra.mrb[28].mxu0 %v2161_v23  ;;  %867 = vmatmul.mubr.bf16.gmra.mrb[28].mxu1 %v2161_v23 }
  0x6b   : > { %1357 = vmatprep.mubr.bf16.mxu0 %v2192_v2  ;;  %1430 = vmatprep.mubr.bf16.mxu1 %v2192_v2 }
  0x87   : > { %v896_v26 = vpop.permute.xlu0 %895  ;;  %v1056_v27 = vpop.permute.xlu1 %1055 }
  0x8b   : > { %v901_v28 = vpop.permute.xlu0 %900  ;;  %v1061_v29 = vpop.permute.xlu1 %1060 }
  0x8f   : > { %v906_v30 = vpop.permute.xlu0 %905  ;;  %v2489_v31 = vpop.permute.xlu1 %910 }
  0x94   : > { %v2491_v32 = vpop.permute.xlu0 %1065  ;;  %v2493_v33 = vpop.permute.xlu1 %1070 }
  0x98   : > { %v2495_v34 = vpop.permute.xlu0 %915  ;;  %v2497_v35 = vpop.permute.xlu1 %920 }
  0x9c   : > { %v2499_v36 = vpop.permute.xlu0 %1075  ;;  %v2501_v37 = vpop.permute.xlu1 %1080 }
  0xa0   : > { %v2503_v38 = vpop.permute.xlu0 %925  ;;  %v2505_v39 = vpop.permute.xlu1 %930 }
  0xa4   : > { %v2507_v40 = vpop.permute.xlu0 %1085  ;;  %v2509_v41 = vpop.permute.xlu1 %1090 }
  0xa8   : > { %v2511_v42 = vpop.permute.xlu0 %935  ;;  %v2513_v4 = vpop.permute.xlu1 %940 }
  0xac   : > { %v2515_v5 = vpop.permute.xlu0 %1095 }
 0x105   : > { %v685_v43 = vpop.f32.mrb[0].mxu0  ;;  %v798_v44 = vpop.f32.mrb[0].mxu1 }
 0x106   : > { %v973_v45 = vmul.f32 %v896_v26, %v685_v43  ;;  %v975_v46 = vmul.f32 %v896_v26, %v798_v44  ;;  %v687_v47 = vpop.f32.mrb[1].mxu0  ;;  %v800_v48 = vpop.f32.mrb[1].mxu1 }
 0x107   : > { %v974_v49 = vmul.f32 %v896_v26, %v687_v47  ;;  %v976_v50 = vmul.f32 %v896_v26, %v800_v48  ;;  %v689_v51 = vpop.f32.mrb[2].mxu0  ;;  %v802_v52 = vpop.f32.mrb[2].mxu1 }
 0x108   : > { %v1133_v53 = vadd.f32 %v1056_v27, %v973_v45  ;;  %v1135_v54 = vadd.f32 %v1056_v27, %v975_v46  ;;  %v977_v55 = vmul.f32 %v901_v28, %v689_v51  ;;  %v979_v56 = vmul.f32 %v901_v28, %v802_v52  ;;  %v691_v57 = vpop.f32.mrb[3].mxu0  ;;  %v804_v58 = vpop.f32.mrb[3].mxu1 }
 0x109   : > { %v1134_v59 = vadd.f32 %v1056_v27, %v974_v49  ;;  %v1136_v60 = vadd.f32 %v1056_v27, %v976_v50  ;;  %v978_v61 = vmul.f32 %v901_v28, %v691_v57  ;;  %v980_v62 = vmul.f32 %v901_v28, %v804_v58 }
 0x10a   : > { %v1137_v63 = vadd.f32 %v1061_v29, %v977_v55  ;;  %v1139_v0 = vadd.f32 %v1061_v29, %v979_v56  ;;  %v1197_v6 = vmax.f32 %v1133_v53, 0.0  ;;  %v1199_v7 = vmax.f32 %v1135_v54, 0.0  ;;  %v2529_v54 = vpop.permute.xlu1 %1100  ;;  %v2531_v55 = vpop.permute.xlu0 %945 }
 0x10b   : > { %v1138_v1 = vadd.f32 %v1061_v29, %v978_v61  ;;  %v1140_v3 = vadd.f32 %v1061_v29, %v980_v62  ;;  %v1198_v10 = vmax.f32 %v1134_v59, 0.0  ;;  %v1200_v11 = vmax.f32 %v1136_v60, 0.0 }
 0x10c   : > { %v1201_v8 = vmax.f32 %v1137_v63, 0.0  ;;  %v1203_v9 = vmax.f32 %v1139_v0, 0.0 }
 0x10d   : > { %v1202_v12 = vmax.f32 %v1138_v1, 0.0  ;;  %v1204_v13 = vmax.f32 %v1140_v3, 0.0  ;;  %v695_v14 = vpop.f32.mrb[4].mxu0  ;;  %v808_v15 = vpop.f32.mrb[4].mxu1 }
 0x10e   : > { %v1261_v16 = vpack.c.bf16 %v1201_v8, %v1197_v6  ;;  %v1263_v17 = vpack.c.bf16 %v1203_v9, %v1199_v7  ;;  %v981_v18 = vmul.f32 %v906_v30, %v695_v14  ;;  %v983_v19 = vmul.f32 %v906_v30, %v808_v15  ;;  %v697_v20 = vpop.f32.mrb[5].mxu0  ;;  %v810_v21 = vpop.f32.mrb[5].mxu1 }
 0x10f   : > { %v982_v22 = vmul.f32 %v906_v30, %v697_v20  ;;  %v984_v23 = vmul.f32 %v906_v30, %v810_v21  ;;  %v699_v24 = vpop.f32.mrb[6].mxu0  ;;  %v812_v25 = vpop.f32.mrb[6].mxu1  ;;  %v1262_v26 = vpack.c.bf16 %v1202_v12, %v1198_v10  ;;  %v1264_v27 = vpack.c.bf16 %v1204_v13, %v1200_v11 }
 0x110   : > { %v1141_v28 = vadd.f32 %v2491_v32, %v981_v18  ;;  %v1143_v29 = vadd.f32 %v2491_v32, %v983_v19  ;;  %v985_v43 = vmul.f32 %v2489_v31, %v699_v24  ;;  %v987_v44 = vmul.f32 %v2489_v31, %v812_v25  ;;  %v701_v45 = vpop.f32.mrb[7].mxu0  ;;  %v814_v46 = vpop.f32.mrb[7].mxu1 }
 0x111   : > { %v1142_v47 = vadd.f32 %v2491_v32, %v982_v22  ;;  %v1144_v48 = vadd.f32 %v2491_v32, %v984_v23  ;;  %v986_v30 = vmul.f32 %v2489_v31, %v701_v45  ;;  %v988_v49 = vmul.f32 %v2489_v31, %v814_v46  ;;  %1325 = vmatprep.subr.bf16.mxu0 %v1262_v26 }
 0x112   : > { %v1145_v50 = vadd.f32 %v2493_v33, %v985_v43  ;;  %v1147_v51 = vadd.f32 %v2493_v33, %v987_v44  ;;  %1398 = vmatprep.subr.bf16.mxu1 %v1264_v27  ;;  %1326 = vmatpush1.bf16.msra.mxu0 %v1261_v16  ;;  %v1205_v32 = vmax.f32 %v1141_v28, 0.0  ;;  %v1207_v56 = vmax.f32 %v1143_v29, 0.0  ;;  %v2549_v27 = vpop.permute.xlu1 %950  ;;  %v2551_v28 = vpop.permute.xlu0 %1105 }
 0x113   : > { %v1146_v52 = vadd.f32 %v2493_v33, %v986_v30  ;;  %v1148_v53 = vadd.f32 %v2493_v33, %v988_v49  ;;  %1399 = vmatpush1.bf16.msra.mxu1 %v1263_v17  ;;  %v1206_v58 = vmax.f32 %v1142_v47, 0.0  ;;  %v1208_v59 = vmax.f32 %v1144_v48, 0.0 }
 0x114   : > { %v1209_v57 = vmax.f32 %v1145_v50, 0.0  ;;  %v1211_v31 = vmax.f32 %v1147_v51, 0.0 }
 0x115   : > { %v1210_v60 = vmax.f32 %v1146_v52, 0.0  ;;  %v1212_v61 = vmax.f32 %v1148_v53, 0.0  ;;  %v705_v62 = vpop.f32.mrb[8].mxu0  ;;  %v818_v63 = vpop.f32.mrb[8].mxu1 }
 0x116   : > { %v1265_v0 = vpack.c.bf16 %v1209_v57, %v1205_v32  ;;  %v1267_v1 = vpack.c.bf16 %v1211_v31, %v1207_v56  ;;  %v989_v3 = vmul.f32 %v2495_v34, %v705_v62  ;;  %v991_v33 = vmul.f32 %v2495_v34, %v818_v63  ;;  %v707_v6 = vpop.f32.mrb[9].mxu0  ;;  %v820_v7 = vpop.f32.mrb[9].mxu1 }
 0x117   : > { %v990_v8 = vmul.f32 %v2495_v34, %v707_v6  ;;  %v992_v9 = vmul.f32 %v2495_v34, %v820_v7  ;;  %v709_v10 = vpop.f32.mrb[10].mxu0  ;;  %v822_v11 = vpop.f32.mrb[10].mxu1  ;;  %v1266_v12 = vpack.c.bf16 %v1210_v60, %v1206_v58  ;;  %v1268_v13 = vpack.c.bf16 %v1212_v61, %v1208_v59 }
 0x118   : > { %v1149_v14 = vadd.f32 %v2499_v36, %v989_v3  ;;  %v1151_v15 = vadd.f32 %v2499_v36, %v991_v33  ;;  %v993_v16 = vmul.f32 %v2497_v35, %v709_v10  ;;  %v995_v17 = vmul.f32 %v2497_v35, %v822_v11  ;;  %v711_v18 = vpop.f32.mrb[11].mxu0  ;;  %v824_v19 = vpop.f32.mrb[11].mxu1 }
 0x119   : > { %v1150_v20 = vadd.f32 %v2499_v36, %v990_v8  ;;  %v1152_v21 = vadd.f32 %v2499_v36, %v992_v9  ;;  %v994_v34 = vmul.f32 %v2497_v35, %v711_v18  ;;  %v996_v22 = vmul.f32 %v2497_v35, %v824_v19  ;;  %1327 = vmatprep.subr.bf16.mxu0 %v1266_v12  ;;  %v2569_v11 = vpop.permute.xlu1 %1110  ;;  %v2571_v12 = vpop.permute.xlu0 %955 }
 0x11a   : > { %v1153_v23 = vadd.f32 %v2501_v37, %v993_v16  ;;  %v1155_v24 = vadd.f32 %v2501_v37, %v995_v17  ;;  %1400 = vmatprep.subr.bf16.mxu1 %v1268_v13  ;;  %1328 = vmatpush1.bf16.msra.mxu0 %v1265_v0  ;;  %v1213_v36 = vmax.f32 %v1149_v14, 0.0  ;;  %v1215_v29 = vmax.f32 %v1151_v15, 0.0 }
 0x11b   : > { %v1154_v25 = vadd.f32 %v2501_v37, %v994_v34  ;;  %v1156_v26 = vadd.f32 %v2501_v37, %v996_v22  ;;  %1401 = vmatpush1.bf16.msra.mxu1 %v1267_v1  ;;  %v1214_v44 = vmax.f32 %v1150_v20, 0.0  ;;  %v1216_v45 = vmax.f32 %v1152_v21, 0.0 }
 0x11c   : > { %v1217_v43 = vmax.f32 %v1153_v23, 0.0  ;;  %v1219_v35 = vmax.f32 %v1155_v24, 0.0 }
 0x11d   : > { %v1218_v46 = vmax.f32 %v1154_v25, 0.0  ;;  %v1220_v47 = vmax.f32 %v1156_v26, 0.0  ;;  %v715_v48 = vpop.f32.mrb[12].mxu0  ;;  %v828_v30 = vpop.f32.mrb[12].mxu1 }
 0x11e   : > { %v1269_v49 = vpack.c.bf16 %v1217_v43, %v1213_v36  ;;  %v1271_v50 = vpack.c.bf16 %v1219_v35, %v1215_v29  ;;  %v997_v51 = vmul.f32 %v2503_v38, %v715_v48  ;;  %v999_v37 = vmul.f32 %v2503_v38, %v828_v30  ;;  %v717_v52 = vpop.f32.mrb[13].mxu0  ;;  %v830_v53 = vpop.f32.mrb[13].mxu1 }
 0x11f   : > { %v998_v32 = vmul.f32 %v2503_v38, %v717_v52  ;;  %v1000_v56 = vmul.f32 %v2503_v38, %v830_v53  ;;  %v719_v57 = vpop.f32.mrb[14].mxu0  ;;  %v832_v31 = vpop.f32.mrb[14].mxu1  ;;  %v1270_v58 = vpack.c.bf16 %v1218_v46, %v1214_v44  ;;  %v1272_v59 = vpack.c.bf16 %v1220_v47, %v1216_v45 }
 0x120   : > { %v1157_v60 = vadd.f32 %v2507_v40, %v997_v51  ;;  %v1159_v61 = vadd.f32 %v2507_v40, %v999_v37  ;;  %v1001_v62 = vmul.f32 %v2505_v39, %v719_v57  ;;  %v1003_v63 = vmul.f32 %v2505_v39, %v832_v31  ;;  %v721_v0 = vpop.f32.mrb[15].mxu0  ;;  %v834_v1 = vpop.f32.mrb[15].mxu1 }
 0x121   : > { %v1158_v3 = vadd.f32 %v2507_v40, %v998_v32  ;;  %v1160_v33 = vadd.f32 %v2507_v40, %v1000_v56  ;;  %v1002_v38 = vmul.f32 %v2505_v39, %v721_v0  ;;  %v1004_v6 = vmul.f32 %v2505_v39, %v834_v1  ;;  %1329 = vmatprep.subr.bf16.mxu0 %v1270_v58  ;;  %v2589_v56 = vpop.permute.xlu1 %960  ;;  %v2591_v57 = vpop.permute.xlu0 %1115 }
 0x122   : > { %v1161_v7 = vadd.f32 %v2509_v41, %v1001_v62  ;;  %v1163_v8 = vadd.f32 %v2509_v41, %v1003_v63  ;;  %1402 = vmatprep.subr.bf16.mxu1 %v1272_v59  ;;  %1330 = vmatpush1.bf16.msra.mxu0 %v1269_v49  ;;  %v1221_v40 = vmax.f32 %v1157_v60, 0.0  ;;  %v1223_v13 = vmax.f32 %v1159_v61, 0.0 }
 0x123   : > { %v1162_v9 = vadd.f32 %v2509_v41, %v1002_v38  ;;  %v1164_v10 = vadd.f32 %v2509_v41, %v1004_v6  ;;  %1403 = vmatpush1.bf16.msra.mxu1 %v1271_v50  ;;  %v1222_v15 = vmax.f32 %v1158_v3, 0.0  ;;  %v1224_v16 = vmax.f32 %v1160_v33, 0.0 }
 0x124   : > { %v1225_v14 = vmax.f32 %v1161_v7, 0.0  ;;  %v1227_v39 = vmax.f32 %v1163_v8, 0.0 }
 0x125   : > { %v1226_v17 = vmax.f32 %v1162_v9, 0.0  ;;  %v1228_v18 = vmax.f32 %v1164_v10, 0.0  ;;  %v725_v19 = vpop.f32.mrb[16].mxu0  ;;  %v838_v20 = vpop.f32.mrb[16].mxu1 }
 0x126   : > { %v1273_v21 = vpack.c.bf16 %v1225_v14, %v1221_v40  ;;  %v1275_v34 = vpack.c.bf16 %v1227_v39, %v1223_v13  ;;  %v1005_v22 = vmul.f32 %v2511_v42, %v725_v19  ;;  %v1007_v41 = vmul.f32 %v2511_v42, %v838_v20  ;;  %v727_v23 = vpop.f32.mrb[17].mxu0  ;;  %v840_v24 = vpop.f32.mrb[17].mxu1 }
 0x127   : > { %v1006_v25 = vmul.f32 %v2511_v42, %v727_v23  ;;  %v1008_v26 = vmul.f32 %v2511_v42, %v840_v24  ;;  %v729_v36 = vpop.f32.mrb[18].mxu0  ;;  %v842_v29 = vpop.f32.mrb[18].mxu1  ;;  %v1274_v43 = vpack.c.bf16 %v1226_v17, %v1222_v15  ;;  %v1276_v35 = vpack.c.bf16 %v1228_v18, %v1224_v16 }
 0x128   : > { %v1165_v44 = vadd.f32 %v2515_v5, %v1005_v22  ;;  %v1167_v45 = vadd.f32 %v2515_v5, %v1007_v41  ;;  %v1009_v46 = vmul.f32 %v2513_v4, %v729_v36  ;;  %v1011_v47 = vmul.f32 %v2513_v4, %v842_v29  ;;  %v731_v48 = vpop.f32.mrb[19].mxu0  ;;  %v844_v30 = vpop.f32.mrb[19].mxu1 }
 0x129   : > { %v1166_v49 = vadd.f32 %v2515_v5, %v1006_v25  ;;  %v1168_v50 = vadd.f32 %v2515_v5, %v1008_v26  ;;  %v1010_v42 = vmul.f32 %v2513_v4, %v731_v48  ;;  %v1012_v51 = vmul.f32 %v2513_v4, %v844_v30  ;;  %1331 = vmatprep.subr.bf16.mxu0 %v1274_v43  ;;  %v1121_v24 = vpop.permute.xlu1 %1120  ;;  %v966_v25 = vpop.permute.xlu0 %965 }
 0x12a   : > { %v1169_v37 = vadd.f32 %v2529_v54, %v1009_v46  ;;  %v1171_v52 = vadd.f32 %v2529_v54, %v1011_v47  ;;  %1404 = vmatprep.subr.bf16.mxu1 %v1276_v35  ;;  %1332 = vmatpush1.bf16.msra.mxu0 %v1273_v21  ;;  %v1229_v5 = vmax.f32 %v1165_v44, 0.0  ;;  %v1231_v31 = vmax.f32 %v1167_v45, 0.0 }
 0x12b   : > { %v1170_v53 = vadd.f32 %v2529_v54, %v1010_v42  ;;  %v1172_v32 = vadd.f32 %v2529_v54, %v1012_v51  ;;  %1405 = vmatpush1.bf16.msra.mxu1 %v1275_v34  ;;  %v1230_v59 = vmax.f32 %v1166_v49, 0.0  ;;  %v1232_v60 = vmax.f32 %v1168_v50, 0.0 }
 0x12c   : > { %v1233_v58 = vmax.f32 %v1169_v37, 0.0  ;;  %v1235_v4 = vmax.f32 %v1171_v52, 0.0 }
 0x12d   : > { %v1234_v61 = vmax.f32 %v1170_v53, 0.0  ;;  %v1236_v62 = vmax.f32 %v1172_v32, 0.0  ;;  %v735_v63 = vpop.f32.mrb[20].mxu0  ;;  %v848_v0 = vpop.f32.mrb[20].mxu1 }
 0x12e   : > { %v1277_v1 = vpack.c.bf16 %v1233_v58, %v1229_v5  ;;  %v1279_v3 = vpack.c.bf16 %v1235_v4, %v1231_v31  ;;  %v1013_v33 = vmul.f32 %v2531_v55, %v735_v63  ;;  %v1015_v54 = vmul.f32 %v2531_v55, %v848_v0  ;;  %v737_v38 = vpop.f32.mrb[21].mxu0  ;;  %v850_v6 = vpop.f32.mrb[21].mxu1 }
 0x12f   : > { %v1014_v7 = vmul.f32 %v2531_v55, %v737_v38  ;;  %v1016_v8 = vmul.f32 %v2531_v55, %v850_v6  ;;  %v739_v9 = vpop.f32.mrb[22].mxu0  ;;  %v852_v10 = vpop.f32.mrb[22].mxu1  ;;  %v1278_v40 = vpack.c.bf16 %v1234_v61, %v1230_v59  ;;  %v1280_v13 = vpack.c.bf16 %v1236_v62, %v1232_v60 }
 0x130   : > { %v1173_v14 = vadd.f32 %v2551_v28, %v1013_v33  ;;  %v1175_v39 = vadd.f32 %v2551_v28, %v1015_v54  ;;  %v1017_v15 = vmul.f32 %v2549_v27, %v739_v9  ;;  %v1019_v16 = vmul.f32 %v2549_v27, %v852_v10  ;;  %v741_v17 = vpop.f32.mrb[23].mxu0  ;;  %v854_v18 = vpop.f32.mrb[23].mxu1 }
 0x131   : > { %v1174_v19 = vadd.f32 %v2551_v28, %v1014_v7  ;;  %v1176_v20 = vadd.f32 %v2551_v28, %v1016_v8  ;;  %v1018_v55 = vmul.f32 %v2549_v27, %v741_v17  ;;  %v1020_v21 = vmul.f32 %v2549_v27, %v854_v18  ;;  %1333 = vmatprep.subr.bf16.mxu0 %v1278_v40  ;;  %v1126_v38 = vpop.permute.xlu0 %1125 }
 0x132   : > { %v1177_v34 = vadd.f32 %v2569_v11, %v1017_v15  ;;  %v1179_v22 = vadd.f32 %v2569_v11, %v1019_v16  ;;  %1406 = vmatprep.subr.bf16.mxu1 %v1280_v13  ;;  %1334 = vmatpush1.bf16.msra.mxu0 %v1277_v1  ;;  %v1237_v26 = vmax.f32 %v1173_v14, 0.0  ;;  %v1239_v28 = vmax.f32 %v1175_v39, 0.0 }
 0x133   : > { %v1178_v41 = vadd.f32 %v2569_v11, %v1018_v55  ;;  %v1180_v23 = vadd.f32 %v2569_v11, %v1020_v21  ;;  %1407 = vmatpush1.bf16.msra.mxu1 %v1279_v3  ;;  %v1238_v43 = vmax.f32 %v1174_v19, 0.0  ;;  %v1240_v27 = vmax.f32 %v1176_v20, 0.0  ;;  %v971_v3 = vpop.permute.xlu1 %970 }
 0x134   : > { %v1241_v36 = vmax.f32 %v1177_v34, 0.0  ;;  %v1243_v29 = vmax.f32 %v1179_v22, 0.0 }
 0x135   : > { %v1242_v35 = vmax.f32 %v1178_v41, 0.0  ;;  %v1244_v44 = vmax.f32 %v1180_v23, 0.0  ;;  %v745_v45 = vpop.f32.mrb[24].mxu0  ;;  %v858_v46 = vpop.f32.mrb[24].mxu1 }
 0x136   : > { %v1281_v47 = vpack.c.bf16 %v1241_v36, %v1237_v26  ;;  %v1283_v48 = vpack.c.bf16 %v1243_v29, %v1239_v28  ;;  %v1021_v30 = vmul.f32 %v2571_v12, %v745_v45  ;;  %v1023_v49 = vmul.f32 %v2571_v12, %v858_v46  ;;  %v747_v11 = vpop.f32.mrb[25].mxu0  ;;  %v860_v50 = vpop.f32.mrb[25].mxu1 }
 0x137   : > { %v1022_v42 = vmul.f32 %v2571_v12, %v747_v11  ;;  %v1024_v51 = vmul.f32 %v2571_v12, %v860_v50  ;;  %v749_v37 = vpop.f32.mrb[26].mxu0  ;;  %v862_v52 = vpop.f32.mrb[26].mxu1  ;;  %v1282_v53 = vpack.c.bf16 %v1242_v35, %v1238_v43  ;;  %v1284_v32 = vpack.c.bf16 %v1244_v44, %v1240_v27 }
 0x138   : > { %v1181_v5 = vadd.f32 %v2591_v57, %v1021_v30  ;;  %v1183_v31 = vadd.f32 %v2591_v57, %v1023_v49  ;;  %v1025_v58 = vmul.f32 %v2589_v56, %v749_v37  ;;  %v1027_v4 = vmul.f32 %v2589_v56, %v862_v52  ;;  %v751_v59 = vpop.f32.mrb[27].mxu0  ;;  %v864_v60 = vpop.f32.mrb[27].mxu1 }
 0x139   : > { %v1182_v61 = vadd.f32 %v2591_v57, %v1022_v42  ;;  %v1184_v62 = vadd.f32 %v2591_v57, %v1024_v51  ;;  %v1026_v12 = vmul.f32 %v2589_v56, %v751_v59  ;;  %v1028_v63 = vmul.f32 %v2589_v56, %v864_v60  ;;  %1335 = vmatprep.subr.bf16.mxu0 %v1282_v53  ;;  %v1131_v43 = vpop.permute.xlu1 %1130  ;;  %v2164_v59 = vld [vmem:[%s2701_s4 + $0x10] sm:$0xff]   ;;  %v2165_v60 = vld [vmem:[%s2701_s4 + $0x18] sm:$0xff]  }
 0x13a   : > { %v1185_v0 = vadd.f32 %v1121_v24, %v1025_v58  ;;  %v1187_v1 = vadd.f32 %v1121_v24, %v1027_v4  ;;  %1408 = vmatprep.subr.bf16.mxu1 %v1284_v32  ;;  %1336 = vmatpush1.bf16.msra.mxu0 %v1281_v47  ;;  %v1245_v6 = vmax.f32 %v1181_v5, 0.0  ;;  %v1247_v7 = vmax.f32 %v1183_v31, 0.0  ;;  %v2162_v58 = vld [vmem:[%s2701_s4] sm:$0xff]   ;;  %v2163_v4 = vld [vmem:[%s2701_s4 + $0x8] sm:$0xff]  }
 0x13b   : > { %v1186_v33 = vadd.f32 %v1121_v24, %v1026_v12  ;;  %v1188_v54 = vadd.f32 %v1121_v24, %v1028_v63  ;;  %1409 = vmatpush1.bf16.msra.mxu1 %v1283_v48  ;;  %v1246_v10 = vmax.f32 %v1182_v61, 0.0  ;;  %v1248_v57 = vmax.f32 %v1184_v62, 0.0  ;;  %v1482_v61 = vpop.permute.xlu0 %1481 }
 0x13c   : > { %v1249_v8 = vmax.f32 %v1185_v0, 0.0  ;;  %v1251_v9 = vmax.f32 %v1187_v1, 0.0 }
 0x13d   : > { %v1250_v40 = vmax.f32 %v1186_v33, 0.0  ;;  %v1252_v13 = vmax.f32 %v1188_v54, 0.0  ;;  %v755_v14 = vpop.f32.mrb[28].mxu0  ;;  %v868_v56 = vpop.f32.mrb[28].mxu1 }
 0x13e   : > { %v1285_v39 = vpack.c.bf16 %v1249_v8, %v1245_v6  ;;  %v1287_v15 = vpack.c.bf16 %v1251_v9, %v1247_v7  ;;  %v1029_v16 = vmul.f32 %v966_v25, %v755_v14  ;;  %v1031_v17 = vmul.f32 %v966_v25, %v868_v56  ;;  %v757_v18 = vpop.f32.mrb[29].mxu0  ;;  %v870_v19 = vpop.f32.mrb[29].mxu1 }
 0x13f   : > { %v1030_v20 = vmul.f32 %v966_v25, %v757_v18  ;;  %v1032_v55 = vmul.f32 %v966_v25, %v870_v19  ;;  %v759_v21 = vpop.f32.mrb[30].mxu0  ;;  %v872_v34 = vpop.f32.mrb[30].mxu1  ;;  %v1286_v22 = vpack.c.bf16 %v1250_v40, %v1246_v10  ;;  %v1288_v41 = vpack.c.bf16 %v1252_v13, %v1248_v57 }
 0x140   : > { %v1189_v23 = vadd.f32 %v1126_v38, %v1029_v16  ;;  %v1191_v24 = vadd.f32 %v1126_v38, %v1031_v17  ;;  %v1033_v26 = vmul.f32 %v971_v3, %v759_v21  ;;  %v1035_v28 = vmul.f32 %v971_v3, %v872_v34  ;;  %v761_v36 = vpop.f32.mrb[31].mxu0  ;;  %v874_v29 = vpop.f32.mrb[31].mxu1 }
 0x141   : > { %v1190_v27 = vadd.f32 %v1126_v38, %v1030_v20  ;;  %v1192_v35 = vadd.f32 %v1126_v38, %v1032_v55  ;;  %v1034_v44 = vmul.f32 %v971_v3, %v761_v36  ;;  %v1036_v45 = vmul.f32 %v971_v3, %v874_v29  ;;  %1337 = vmatprep.subr.bf16.mxu0 %v1286_v22  ;;  %v1487_v62 = vpop.permute.xlu1 %1486  ;;  %v1562_v12 = vpop.permute.xlu0 %1561 }
 0x142   : > { %v1193_v46 = vadd.f32 %v1131_v43, %v1033_v26  ;;  %v1195_v47 = vadd.f32 %v1131_v43, %v1035_v28  ;;  %1410 = vmatprep.subr.bf16.mxu1 %v1288_v41  ;;  %1338 = vmatpush1.bf16.msra.mxu0 %v1285_v39  ;;  %v1253_v30 = vmax.f32 %v1189_v23, 0.0  ;;  %v1255_v49 = vmax.f32 %v1191_v24, 0.0 }
 0x143   : > { %v1194_v25 = vadd.f32 %v1131_v43, %v1034_v44  ;;  %v1196_v48 = vadd.f32 %v1131_v43, %v1036_v45  ;;  %1411 = vmatpush1.bf16.msra.mxu1 %v1287_v15  ;;  %v1254_v42 = vmax.f32 %v1190_v27, 0.0  ;;  %v1256_v51 = vmax.f32 %v1192_v35, 0.0 }
 0x144   : > { %v1257_v11 = vmax.f32 %v1193_v46, 0.0  ;;  %v1259_v50 = vmax.f32 %v1195_v47, 0.0 }
 0x145   : > { %v1258_v37 = vmax.f32 %v1194_v25, 0.0  ;;  %v1260_v52 = vmax.f32 %v1196_v48, 0.0  ;;  %v1567_v63 = vpop.permute.xlu1 %1566  ;;  %v1492_v0 = vpop.permute.xlu0 %1491 }
 0x146   : > { %v1289_v53 = vpack.c.bf16 %v1257_v11, %v1253_v30  ;;  %v1291_v32 = vpack.c.bf16 %v1259_v50, %v1255_v49 }
 0x147   : > { %v1290_v5 = vpack.c.bf16 %v1258_v37, %v1254_v42  ;;  %v1292_v31 = vpack.c.bf16 %v1260_v52, %v1256_v51 }
 0x149   : > { %1339 = vmatprep.subr.bf16.mxu0 %v1290_v5  ;;  %1412 = vmatprep.subr.bf16.mxu1 %v1292_v31  ;;  %v1497_v1 = vpop.permute.xlu1 %1496  ;;  %v1572_v3 = vpop.permute.xlu0 %1571 }
 0x14a   : > { %1340 = vmatpush1.bf16.msra.mxu0 %v1289_v53  ;;  %1413 = vmatpush1.bf16.msra.mxu1 %v1291_v32 }
 0x14d   : > { %1358 = vmatmul.mubr.bf16.vlgmr.msra.gmra.mrb[32].mxu0 %v2162_v58  ;;  %1431 = vmatmul.mubr.bf16.vlgmr.msra.gmra.mrb[32].mxu1 %v2162_v58  ;;  %v2641_v33 = vpop.permute.xlu1 %1576  ;;  %v2643_v54 = vpop.permute.xlu0 %1501 }
 0x14e   : > { %1367 = vmatprep.mubr.bf16.mxu0 %v2192_v2  ;;  %1440 = vmatprep.mubr.bf16.mxu1 %v2192_v2 }
 0x151   : > { %v2645_v24 = vpop.permute.xlu1 %1506  ;;  %v2647_v26 = vpop.permute.xlu0 %1581 }
 0x155   : > { %1368 = vmatmul.mubr.bf16.gmra.mrb[36].mxu0 %v2163_v4  ;;  %1441 = vmatmul.mubr.bf16.gmra.mrb[36].mxu1 %v2163_v4 }
 0x156   : > { %1377 = vmatprep.mubr.bf16.mxu0 %v2192_v2  ;;  %1450 = vmatprep.mubr.bf16.mxu1 %v2192_v2 }
 0x15d   : > { %1378 = vmatmul.mubr.bf16.gmra.mrb[40].mxu0 %v2164_v59  ;;  %1451 = vmatmul.mubr.bf16.gmra.mrb[40].mxu1 %v2164_v59 }
 0x15e   : > { %1387 = vmatprep.mubr.bf16.mxu0 %v2192_v2  ;;  %1460 = vmatprep.mubr.bf16.mxu1 %v2192_v2 }
 0x165   : > { %1388 = vmatmul.mubr.bf16.gmra.mrb[44].mxu0 %v2165_v60  ;;  %1461 = vmatmul.mubr.bf16.gmra.mrb[44].mxu1 %v2165_v60 }
 0x166   : > { %1732 = vmatprep.mubr.bf16.mxu0 %v2192_v2  ;;  %1785 = vmatprep.mubr.bf16.mxu1 %v2192_v2 }
 0x220   : > { %v1359_v38 = vpop.f32.mrb[32].mxu0  ;;  %v1432_v6 = vpop.f32.mrb[32].mxu1 }
 0x221   : > { %v1519_v7 = vmul.f32 %v1482_v61, %v1359_v38  ;;  %v1521_v8 = vmul.f32 %v1482_v61, %v1432_v6  ;;  %v1361_v9 = vpop.f32.mrb[33].mxu0  ;;  %v1434_v10 = vpop.f32.mrb[33].mxu1 }
 0x222   : > { %v1520_v57 = vmul.f32 %v1482_v61, %v1361_v9  ;;  %v1522_v40 = vmul.f32 %v1482_v61, %v1434_v10  ;;  %v1363_v13 = vpop.f32.mrb[34].mxu0  ;;  %v1436_v14 = vpop.f32.mrb[34].mxu1 }
 0x223   : > { %v1599_v56 = vadd.f32 %v1562_v12, %v1519_v7  ;;  %v1601_v39 = vadd.f32 %v1562_v12, %v1521_v8  ;;  %v1523_v15 = vmul.f32 %v1487_v62, %v1363_v13  ;;  %v1525_v16 = vmul.f32 %v1487_v62, %v1436_v14  ;;  %v1365_v17 = vpop.f32.mrb[35].mxu0  ;;  %v1438_v18 = vpop.f32.mrb[35].mxu1 }
 0x224   : > { %v1600_v19 = vadd.f32 %v1562_v12, %v1520_v57  ;;  %v1602_v20 = vadd.f32 %v1562_v12, %v1522_v40  ;;  %v1524_v55 = vmul.f32 %v1487_v62, %v1365_v17  ;;  %v1526_v21 = vmul.f32 %v1487_v62, %v1438_v18  ;;  %v1587_v8 = vpop.permute.xlu1 %1586  ;;  %v1512_v9 = vpop.permute.xlu0 %1511 }
 0x225   : > { %v1603_v34 = vadd.f32 %v1567_v63, %v1523_v15  ;;  %v1605_v22 = vadd.f32 %v1567_v63, %v1525_v16  ;;  %v1631_v28 = vmax.f32 %v1599_v56, 0.0  ;;  %v1633_v36 = vmax.f32 %v1601_v39, 0.0 }
 0x226   : > { %v1604_v41 = vadd.f32 %v1567_v63, %v1524_v55  ;;  %v1606_v23 = vadd.f32 %v1567_v63, %v1526_v21  ;;  %v1632_v27 = vmax.f32 %v1600_v19, 0.0  ;;  %v1634_v35 = vmax.f32 %v1602_v20, 0.0 }
 0x227   : > { %v1635_v29 = vmax.f32 %v1603_v34, 0.0  ;;  %v1637_v43 = vmax.f32 %v1605_v22, 0.0 }
 0x228   : > { %v1636_v44 = vmax.f32 %v1604_v41, 0.0  ;;  %v1638_v45 = vmax.f32 %v1606_v23, 0.0  ;;  %v1369_v46 = vpop.f32.mrb[36].mxu0  ;;  %v1442_v47 = vpop.f32.mrb[36].mxu1 }
 0x229   : > { %v1663_v25 = vpack.c.bf16 %v1635_v29, %v1631_v28  ;;  %v1665_v48 = vpack.c.bf16 %v1637_v43, %v1633_v36  ;;  %v1527_v30 = vmul.f32 %v1492_v0, %v1369_v46  ;;  %v1529_v49 = vmul.f32 %v1492_v0, %v1442_v47  ;;  %v1371_v11 = vpop.f32.mrb[37].mxu0  ;;  %v1444_v50 = vpop.f32.mrb[37].mxu1 }
 0x22a   : > { %v1528_v42 = vmul.f32 %v1492_v0, %v1371_v11  ;;  %v1530_v51 = vmul.f32 %v1492_v0, %v1444_v50  ;;  %v1373_v37 = vpop.f32.mrb[38].mxu0  ;;  %v1446_v52 = vpop.f32.mrb[38].mxu1  ;;  %v1664_v53 = vpack.c.bf16 %v1636_v44, %v1632_v27  ;;  %v1666_v32 = vpack.c.bf16 %v1638_v45, %v1634_v35 }
 0x22b   : > { %v1607_v5 = vadd.f32 %v1572_v3, %v1527_v30  ;;  %v1609_v31 = vadd.f32 %v1572_v3, %v1529_v49  ;;  %v1531_v58 = vmul.f32 %v1497_v1, %v1373_v37  ;;  %v1533_v4 = vmul.f32 %v1497_v1, %v1446_v52  ;;  %v1375_v59 = vpop.f32.mrb[39].mxu0  ;;  %v1448_v60 = vpop.f32.mrb[39].mxu1 }
 0x22c   : > { %v1608_v61 = vadd.f32 %v1572_v3, %v1528_v42  ;;  %v1610_v62 = vadd.f32 %v1572_v3, %v1530_v51  ;;  %v1532_v12 = vmul.f32 %v1497_v1, %v1375_v59  ;;  %v1534_v63 = vmul.f32 %v1497_v1, %v1448_v60  ;;  %1700 = vmatprep.subr.bf16.mxu0 %v1664_v53  ;;  %v1592_v11 = vpop.permute.xlu0 %1591 }
 0x22d   : > { %v1611_v38 = vadd.f32 %v2641_v33, %v1531_v58  ;;  %v1613_v6 = vadd.f32 %v2641_v33, %v1533_v4  ;;  %1753 = vmatprep.subr.bf16.mxu1 %v1666_v32  ;;  %1701 = vmatpush1.bf16.msra.mxu0 %v1663_v25  ;;  %v1639_v10 = vmax.f32 %v1607_v5, 0.0  ;;  %v1641_v57 = vmax.f32 %v1609_v31, 0.0 }
 0x22e   : > { %v1612_v0 = vadd.f32 %v2641_v33, %v1532_v12  ;;  %v1614_v7 = vadd.f32 %v2641_v33, %v1534_v63  ;;  %1754 = vmatpush1.bf16.msra.mxu1 %v1665_v48  ;;  %v1640_v13 = vmax.f32 %v1608_v61, 0.0  ;;  %v1642_v1 = vmax.f32 %v1610_v62, 0.0  ;;  %v1517_v48 = vpop.permute.xlu1 %1516 }
 0x22f   : > { %v1643_v40 = vmax.f32 %v1611_v38, 0.0  ;;  %v1645_v3 = vmax.f32 %v1613_v6, 0.0 }
 0x230   : > { %v1644_v14 = vmax.f32 %v1612_v0, 0.0  ;;  %v1646_v56 = vmax.f32 %v1614_v7, 0.0  ;;  %v1379_v39 = vpop.f32.mrb[40].mxu0  ;;  %v1452_v15 = vpop.f32.mrb[40].mxu1 }
 0x231   : > { %v1667_v16 = vpack.c.bf16 %v1643_v40, %v1639_v10  ;;  %v1669_v17 = vpack.c.bf16 %v1645_v3, %v1641_v57  ;;  %v1535_v18 = vmul.f32 %v2643_v54, %v1379_v39  ;;  %v1537_v19 = vmul.f32 %v2643_v54, %v1452_v15  ;;  %v1381_v33 = vpop.f32.mrb[41].mxu0  ;;  %v1454_v20 = vpop.f32.mrb[41].mxu1 }
 0x232   : > { %v1536_v55 = vmul.f32 %v2643_v54, %v1381_v33  ;;  %v1538_v21 = vmul.f32 %v2643_v54, %v1454_v20  ;;  %v1383_v34 = vpop.f32.mrb[42].mxu0  ;;  %v1456_v22 = vpop.f32.mrb[42].mxu1  ;;  %v1668_v41 = vpack.c.bf16 %v1644_v14, %v1640_v13  ;;  %v1670_v23 = vpack.c.bf16 %v1646_v56, %v1642_v1 }
 0x233   : > { %v1615_v28 = vadd.f32 %v2647_v26, %v1535_v18  ;;  %v1617_v36 = vadd.f32 %v2647_v26, %v1537_v19  ;;  %v1539_v29 = vmul.f32 %v2645_v24, %v1383_v34  ;;  %v1541_v43 = vmul.f32 %v2645_v24, %v1456_v22  ;;  %v1385_v27 = vpop.f32.mrb[43].mxu0  ;;  %v1458_v35 = vpop.f32.mrb[43].mxu1 }
 0x234   : > { %v1616_v44 = vadd.f32 %v2647_v26, %v1536_v55  ;;  %v1618_v45 = vadd.f32 %v2647_v26, %v1538_v21  ;;  %v1540_v54 = vmul.f32 %v2645_v24, %v1385_v27  ;;  %v1542_v46 = vmul.f32 %v2645_v24, %v1458_v35  ;;  %1702 = vmatprep.subr.bf16.mxu0 %v1668_v41  ;;  %v1597_v13 = vpop.permute.xlu1 %1596 }
 0x235   : > { %v1619_v47 = vadd.f32 %v1587_v8, %v1539_v29  ;;  %v1621_v25 = vadd.f32 %v1587_v8, %v1541_v43  ;;  %1755 = vmatprep.subr.bf16.mxu1 %v1670_v23  ;;  %1703 = vmatpush1.bf16.msra.mxu0 %v1667_v16  ;;  %v1647_v50 = vmax.f32 %v1615_v28, 0.0  ;;  %v1649_v42 = vmax.f32 %v1617_v36, 0.0  ;;  %v2166_v29 = vld [vmem:[%s2704_s7] sm:$0xff]   ;;  %v2167_v43 = vld [vmem:[%s2704_s7 + $0x8] sm:$0xff]  }
 0x236   : > { %v1620_v30 = vadd.f32 %v1587_v8, %v1540_v54  ;;  %v1622_v49 = vadd.f32 %v1587_v8, %v1542_v46  ;;  %1756 = vmatpush1.bf16.msra.mxu1 %v1669_v17  ;;  %v1648_v52 = vmax.f32 %v1616_v44, 0.0  ;;  %v1650_v26 = vmax.f32 %v1618_v45, 0.0 }
 0x237   : > { %v1651_v51 = vmax.f32 %v1619_v47, 0.0  ;;  %v1653_v37 = vmax.f32 %v1621_v25, 0.0 }
 0x238   : > { %v1652_v53 = vmax.f32 %v1620_v30, 0.0  ;;  %v1654_v32 = vmax.f32 %v1622_v49, 0.0  ;;  %v1389_v5 = vpop.f32.mrb[44].mxu0  ;;  %v1462_v24 = vpop.f32.mrb[44].mxu1 }
 0x239   : > { %v1671_v31 = vpack.c.bf16 %v1651_v51, %v1647_v50  ;;  %v1673_v58 = vpack.c.bf16 %v1653_v37, %v1649_v42  ;;  %v1543_v4 = vmul.f32 %v1512_v9, %v1389_v5  ;;  %v1545_v59 = vmul.f32 %v1512_v9, %v1462_v24  ;;  %v1391_v60 = vpop.f32.mrb[45].mxu0  ;;  %v1464_v61 = vpop.f32.mrb[45].mxu1 }
 0x23a   : > { %v1544_v62 = vmul.f32 %v1512_v9, %v1391_v60  ;;  %v1546_v12 = vmul.f32 %v1512_v9, %v1464_v61  ;;  %v1393_v63 = vpop.f32.mrb[46].mxu0  ;;  %v1466_v38 = vpop.f32.mrb[46].mxu1  ;;  %v1672_v6 = vpack.c.bf16 %v1652_v53, %v1648_v52  ;;  %v1674_v0 = vpack.c.bf16 %v1654_v32, %v1650_v26 }
 0x23b   : > { %v1623_v7 = vadd.f32 %v1592_v11, %v1543_v4  ;;  %v1625_v8 = vadd.f32 %v1592_v11, %v1545_v59  ;;  %v1547_v10 = vmul.f32 %v1517_v48, %v1393_v63  ;;  %v1549_v57 = vmul.f32 %v1517_v48, %v1466_v38  ;;  %v1395_v40 = vpop.f32.mrb[47].mxu0  ;;  %v1468_v3 = vpop.f32.mrb[47].mxu1 }
 0x23c   : > { %v1624_v1 = vadd.f32 %v1592_v11, %v1544_v62  ;;  %v1626_v14 = vadd.f32 %v1592_v11, %v1546_v12  ;;  %v1548_v56 = vmul.f32 %v1517_v48, %v1395_v40  ;;  %v1550_v39 = vmul.f32 %v1517_v48, %v1468_v3  ;;  %1704 = vmatprep.subr.bf16.mxu0 %v1672_v6 }
 0x23d   : > { %v1627_v15 = vadd.f32 %v1597_v13, %v1547_v10  ;;  %v1629_v16 = vadd.f32 %v1597_v13, %v1549_v57  ;;  %1757 = vmatprep.subr.bf16.mxu1 %v1674_v0  ;;  %1705 = vmatpush1.bf16.msra.mxu0 %v1671_v31  ;;  %v1655_v18 = vmax.f32 %v1623_v7, 0.0  ;;  %v1657_v19 = vmax.f32 %v1625_v8, 0.0 }
 0x23e   : > { %v1628_v9 = vadd.f32 %v1597_v13, %v1548_v56  ;;  %v1630_v17 = vadd.f32 %v1597_v13, %v1550_v39  ;;  %1758 = vmatpush1.bf16.msra.mxu1 %v1673_v58  ;;  %v1656_v55 = vmax.f32 %v1624_v1, 0.0  ;;  %v1658_v21 = vmax.f32 %v1626_v14, 0.0 }
 0x23f   : > { %v1659_v33 = vmax.f32 %v1627_v15, 0.0  ;;  %v1661_v20 = vmax.f32 %v1629_v16, 0.0 }
 0x240   : > { %v1660_v34 = vmax.f32 %v1628_v9, 0.0  ;;  %v1662_v22 = vmax.f32 %v1630_v17, 0.0 }
 0x241   : > { %v1675_v41 = vpack.c.bf16 %v1659_v33, %v1655_v18  ;;  %v1677_v23 = vpack.c.bf16 %v1661_v20, %v1657_v19 }
 0x242   : > { %v1676_v28 = vpack.c.bf16 %v1660_v34, %v1656_v55  ;;  %v1678_v36 = vpack.c.bf16 %v1662_v22, %v1658_v21 }
 0x244   : > { %1706 = vmatprep.subr.bf16.mxu0 %v1676_v28  ;;  %1759 = vmatprep.subr.bf16.mxu1 %v1678_v36 }
 0x245   : > { %1707 = vmatpush1.bf16.msra.mxu0 %v1675_v41  ;;  %1760 = vmatpush1.bf16.msra.mxu1 %v1677_v23 }
 0x248   : > { %2070 = vmatmul.mubr.msk.bf16.vlgmr.msra.gmra.mrb[48].mxu0 %vm1693_vm0, %v2166_v29  ;;  %2072 = vmatmul.mubr.msk.bf16.vlgmr.msra.gmra.mrb[48].mxu1 %vm1693_vm0, %v2166_v29 }
 0x249   : > { %1742 = vmatprep.mubr.bf16.mxu0 %v2192_v2  ;;  %1795 = vmatprep.mubr.bf16.mxu1 %v2192_v2 }
 0x250   : > { %2071 = vmatmul.mubr.msk.bf16.gmra.mrb[52].mxu0 %vm1693_vm0, %v2167_v43  ;;  %2073 = vmatmul.mubr.msk.bf16.gmra.mrb[52].mxu1 %vm1693_vm0, %v2167_v43 }
 0x31b   : > { %v1734_v27 = vpop.f32.mrb[48].mxu0  ;;  %v1787_v35 = vpop.f32.mrb[48].mxu1 }
 0x31c   : > { %v1831_v44 = vmul.f32 %v1734_v27, %v1734_v27  ;;  %v1736_v45 = vpop.f32.mrb[49].mxu0  ;;  %v1789_v54 = vpop.f32.mrb[49].mxu1  ;;  %v1833_v48 = vmul.f32 %v1787_v35, %v1787_v35 }
 0x31d   : > { %v1806_v46 = vadd.f32 %v1736_v45, %v1734_v27  ;;  %v1832_v47 = vmul.f32 %v1736_v45, %v1736_v45  ;;  %v1738_v25 = vpop.f32.mrb[50].mxu0  ;;  %v1791_v30 = vpop.f32.mrb[50].mxu1  ;;  %v1834_v52 = vmul.f32 %v1789_v54, %v1789_v54 }
 0x31e   : > { %v1835_v49 = vmul.f32 %v1738_v25, %v1738_v25  ;;  %v1740_v11 = vpop.f32.mrb[51].mxu0  ;;  %v1793_v50 = vpop.f32.mrb[51].mxu1  ;;  %v1837_v26 = vmul.f32 %v1791_v30, %v1791_v30 }
 0x31f   : > { %v1847_v2 = vadd.f32 %v1832_v47, %v1831_v44  ;;  %v1811_v42 = vadd.f32 %v1740_v11, %v1738_v25  ;;  %v1836_v51 = vmul.f32 %v1740_v11, %v1740_v11  ;;  %v1807_v37 = vadd.f32 %v1806_v46, %v1787_v35 }
 0x320   : > { %v1838_v31 = vmul.f32 %v1793_v50, %v1793_v50 }
 0x321   : > { %v1852_v53 = vadd.f32 %v1836_v51, %v1835_v49  ;;  %v1812_v32 = vadd.f32 %v1811_v42, %v1791_v30  ;;  %v1808_v5 = vadd.f32 %v1807_v37, %v1789_v54  ;;  %v1848_v24 = vadd.f32 %v1847_v2, %v1833_v48 }
 0x323   : > { %1809 = vadd.xlane.f32.xlu0 %v1808_v5  ;;  %v1744_v58 = vpop.f32.mrb[52].mxu0  ;;  %v1813_v4 = vadd.f32 %v1812_v32, %v1793_v50  ;;  %v1797_v59 = vpop.f32.mrb[52].mxu1  ;;  %v1853_v60 = vadd.f32 %v1852_v53, %v1837_v26  ;;  %v1849_v61 = vadd.f32 %v1848_v24, %v1834_v52 }
 0x324   : > { %v1839_v62 = vmul.f32 %v1744_v58, %v1744_v58  ;;  %v1746_v12 = vpop.f32.mrb[53].mxu0  ;;  %v1799_v63 = vpop.f32.mrb[53].mxu1  ;;  %v1841_v7 = vmul.f32 %v1797_v59, %v1797_v59 }
 0x325   : > { %v1816_v38 = vadd.f32 %v1746_v12, %v1744_v58  ;;  %v1840_v6 = vmul.f32 %v1746_v12, %v1746_v12  ;;  %1814 = vadd.xlane.f32.xlu1 %v1813_v4  ;;  %v1748_v0 = vpop.f32.mrb[54].mxu0  ;;  %v1854_v8 = vadd.f32 %v1853_v60, %v1838_v31  ;;  %v1801_v10 = vpop.f32.mrb[54].mxu1  ;;  %v1842_v39 = vmul.f32 %v1799_v63, %v1799_v63 }
 0x326   : > { %v1843_v57 = vmul.f32 %v1748_v0, %v1748_v0  ;;  %v1750_v40 = vpop.f32.mrb[55].mxu0  ;;  %v1803_v3 = vpop.f32.mrb[55].mxu1  ;;  %v1845_v15 = vmul.f32 %v1801_v10, %v1801_v10 }
 0x327   : > { %v1857_v13 = vadd.f32 %v1840_v6, %v1839_v62  ;;  %v1817_v1 = vadd.f32 %v1816_v38, %v1797_v59  ;;  %1855 = vadd.xlane.f32.xlu0 %v1854_v8  ;;  %v1821_v14 = vadd.f32 %v1750_v40, %v1748_v0  ;;  %v1844_v56 = vmul.f32 %v1750_v40, %v1750_v40 }
 0x328   : > { %v1846_v33 = vmul.f32 %v1803_v3, %v1803_v3 }
 0x329   : > { %v1862_v16 = vadd.f32 %v1844_v56, %v1843_v57  ;;  %v1822_v9 = vadd.f32 %v1821_v14, %v1801_v10  ;;  %1850 = vadd.xlane.f32.xlu1 %v1849_v61  ;;  %v1818_v17 = vadd.f32 %v1817_v1, %v1799_v63  ;;  %v1858_v18 = vadd.f32 %v1857_v13, %v1841_v7 }
 0x32b   : > { %v1823_v19 = vadd.f32 %v1822_v9, %v1803_v3  ;;  %1819 = vadd.xlane.f32.xlu0 %v1818_v17  ;;  %v1859_v20 = vadd.f32 %v1858_v18, %v1842_v39  ;;  %v1863_v55 = vadd.f32 %v1862_v16, %v1845_v15 }
 0x32d   : > { %1860 = vadd.xlane.f32.xlu1 %v1859_v20  ;;  %v1864_v21 = vadd.f32 %v1863_v55, %v1846_v33 }
 0x32f   : > { %1824 = vadd.xlane.f32.xlu0 %v1823_v19 }
 0x333   : > { %1865 = vadd.xlane.f32.xlu0 %v1864_v21 }
 0x3b0   : > { %v1810_v34 = vpop.xlane.xlu0 %1809 }
 0x3b1   : > { %1827 = vst.msk [vmem:[%s384_s26] sm:$0xff] %vm1826_vm1, %v1810_v34 }
 0x3b2   : > { %v1815_v22 = vpop.xlane.xlu1 %1814 }
 0x3b3   : > { %1828 = vst.msk [vmem:[%s384_s26 + $0x8] sm:$0xff] %vm1826_vm1, %v1815_v22 }
 0x3b4   : > { %v1856_v41 = vpop.xlane.xlu0 %1855 }
 0x3b5   : > { %1868 = vst.msk [vmem:[%s393_s29 + $0x8] sm:$0xff] %vm1826_vm1, %v1856_v41 }
 0x3b6   : > { %v1851_v23 = vpop.xlane.xlu1 %1850 }
 0x3b7   : > { %1867 = vst.msk [vmem:[%s393_s29] sm:$0xff] %vm1826_vm1, %v1851_v23 }
 0x3b8   : > { %v1820_v28 = vpop.xlane.xlu0 %1819 }
 0x3b9   : > { %1829 = vst.msk [vmem:[%s384_s26 + $0x10] sm:$0xff] %vm1826_vm1, %v1820_v28 }
 0x3ba   : > { %v1861_v36 = vpop.xlane.xlu1 %1860 }
 0x3bb   : > { %1869 = vst.msk [vmem:[%s393_s29 + $0x10] sm:$0xff] %vm1826_vm1, %v1861_v36 }
 0x3bc   : > { %v1825_v29 = vpop.xlane.xlu0 %1824 }
 0x3bd   : > { %1830 = vst.msk [vmem:[%s384_s26 + $0x18] sm:$0xff] %vm1826_vm1, %v1825_v29 }
 0x3c0   : > { %v1866_v43 = vpop.xlane.xlu0 %1865 }
 0x3c1   : > { %1870 = vst.msk [vmem:[%s393_s29 + $0x18] sm:$0xff] %vm1826_vm1, %v1866_v43 }
 0x3c2 PF: > { %s20_s11 = sadd.s32 1, %s2190_s11   ;;  %s2707_s30 = smov %s2186_s10 }
 0x3c3   : > { %p17_p5 = scmp.ge.s32.totalorder %s20_s11, 4   ;;  %s2708_s10 = smov %s2710_s12 }
 0x3c5   :  { %19 = sbr.rel (!%p17_p5) target bundleno = 2 (0x2), region = 94 }

// kernel: pointgencon_forward.7
= control target key start
LH: loop header
LB: loop body
LE: loop exit
PB: predicated region body
PF: predicated region fallthrough
CT: control target
= control target key end

     0   :  { %s2415_s21 = smov 0   ;;  %s2417_s22 = smov 0   ;;  %s2890_s0 = inlined_call_operand.vmem [shape: bf16[2,128,512], index: 0, kind: input, shape index: {}]   ;;  %s2891_s1 = inlined_call_operand.vmem [shape: bf16[128,128], index: 1, kind: input, shape index: {}]   ;;  %s2892_s2 = inlined_call_operand.vmem [shape: f32[128,1], index: 2, kind: input, shape index: {}]   ;;  %s2893_s3 = inlined_call_operand.vmem [shape: f32[128,1], index: 3, kind: input, shape index: {}]   ;;  %s2894_s4 = inlined_call_operand.vmem [shape: bf16[64,128], index: 4, kind: input, shape index: {}]   ;;  %s2895_s5 = inlined_call_operand.vmem [shape: f32[64,1], index: 5, kind: input, shape index: {}]   ;;  %s2896_s6 = inlined_call_operand.vmem [shape: f32[64,1], index: 6, kind: input, shape index: {}]   ;;  %s2897_s7 = inlined_call_operand.vmem [shape: bf16[32,64], index: 7, kind: input, shape index: {}]   ;;  %s2898_s8 = inlined_call_operand.vmem [shape: f32[32,1], index: 8, kind: input, shape index: {}]   ;;  %s2899_s9 = inlined_call_operand.vmem [shape: f32[32,1], index: 9, kind: input, shape index: {}]   ;;  %s2900_s10 = inlined_call_operand.vmem [shape: bf16[3,32], index: 10, kind: input, shape index: {}]   ;;  %s2901_s11 = inlined_call_operand.vmem [shape: f32[3,1], index: 11, kind: input, shape index: {}]   ;;  %s2902_s12 = inlined_call_operand.vmem [shape: f32[2,3,512], index: 12, kind: output, shape index: {}]  }
   0x1   :  { %s2419_s23 = smov 0  }
   0x2 LB: > { %s34_s24 = sadd.s32 1, %s2343_s22  ;;  %p2167_p0 = scmp.ge.s32.totalorder %s2347_s23, 1  ;;  %s2347_s23 = sphi %s2419_s23, %s22_s23   ;;  %s2343_s22 = sphi %s2417_s22, %s2904_s22   ;;  %s2339_s21 = sphi %s2415_s21, %s2903_s21  }
   0x3   : > { %p36_p1 = scmp.ge.s32.totalorder %s34_s24, 2  ;;  %p383_p2 = scmp.lt.s32.totalorder %s2347_s23, 3 }
   0x5   : > { %s2906_s24 = smov (%p36_p1, %s34_s24), 0  ;;  %p384_p3 = pnand %p2167_p0, %p383_p2 }
   0x6   : > { %p434_p4 = scmp.lt.s32.totalorder (!%p384_p3), %s2339_s21, 1  ;;  %v936_v0 = vld [vmem:[%s2892_s2] sm:$0xff] (!%p384_p3)  ;;  %v2349_v2 = vmov (!%p384_p3), 0   ;;  %v937_v3 = vld [vmem:[%s2892_s2 + $0x8] sm:$0xff] (!%p384_p3)  ;;  %v938_v6 = vld [vmem:[%s2892_s2 + $0x10] sm:$0xff] (!%p384_p3)  ;;  %vm1752_vm0 = vcmask (!%p384_p3), 523264  }
   0x7   : > { %387 = sbr.rel (%p384_p3) target bundleno = 1050 (0x41a), region = 68  ;;  %v1096_v1 = vld [vmem:[%s2893_s3] sm:$0xff] (!%p384_p3)  ;;  %2253 = vset.pattern.permute.xlu0 (!%p384_p3), %v2349_v2  ;;  %2254 = vset.pattern.permute.xlu1 (!%p384_p3), %v2349_v2  ;;  %v1097_v4 = vld [vmem:[%s2893_s3 + $0x8] sm:$0xff] (!%p384_p3)  ;;  %v939_v8 = vld [vmem:[%s2892_s2 + $0x18] sm:$0xff] (!%p384_p3)  ;;  %vm1976_vm1 = vcmask (!%p384_p3), 261120  }
   0x8   : > { %954 = vperm.xlu0 (!%p384_p3), %2253, %v936_v0   ;;  %1114 = vperm.xlu1 (!%p384_p3), %2254, %v1096_v1   ;;  %v1098_v15 = vld [vmem:[%s2893_s3 + $0x10] sm:$0xff] (!%p384_p3)  ;;  %v1099_v16 = vld [vmem:[%s2893_s3 + $0x18] sm:$0xff] (!%p384_p3)  ;;  %v940_v23 = vld [vmem:[%s2892_s2 + $0x20] sm:$0xff] (!%p384_p3) }
   0x9   : > { %742 = vmatprep.mubr.bf16.mxu0 (!%p384_p3), %v2349_v2  ;;  %855 = vmatprep.mubr.bf16.mxu1 (!%p384_p3), %v2349_v2  ;;  %v941_v24 = vld [vmem:[%s2892_s2 + $0x28] sm:$0xff] (!%p384_p3)  ;;  %v1100_v29 = vld [vmem:[%s2893_s3 + $0x20] sm:$0xff] (!%p384_p3)  ;;  %v942_v35 = vld [vmem:[%s2892_s2 + $0x30] sm:$0xff] (!%p384_p3) }
   0xa   : > { %v1101_v32 = vld [vmem:[%s2893_s3 + $0x28] sm:$0xff] (!%p384_p3)  ;;  %v943_v36 = vld [vmem:[%s2892_s2 + $0x38] sm:$0xff] (!%p384_p3)  ;;  %v1102_v41 = vld [vmem:[%s2893_s3 + $0x30] sm:$0xff] (!%p384_p3) }
   0xb   : > { %v1103_v42 = vld [vmem:[%s2893_s3 + $0x38] sm:$0xff] (!%p384_p3)  ;;  %v944_v47 = vld [vmem:[%s2892_s2 + $0x40] sm:$0xff] (!%p384_p3)  ;;  %v945_v48 = vld [vmem:[%s2892_s2 + $0x48] sm:$0xff] (!%p384_p3) }
   0xc   : > { %959 = vperm.xlu0 (!%p384_p3), %2253, %v937_v3   ;;  %1119 = vperm.xlu1 (!%p384_p3), %2254, %v1097_v4   ;;  %v2303_v51 = vld [vmem:[%s2891_s1] sm:$0xff] (!%p384_p3)   ;;  %v1105_v53 = vld [vmem:[%s2893_s3 + $0x48] sm:$0xff] (!%p384_p3)  ;;  %v946_v54 = vld [vmem:[%s2892_s2 + $0x50] sm:$0xff] (!%p384_p3) }
   0xd   : > { %v1104_v52 = vld [vmem:[%s2893_s3 + $0x40] sm:$0xff] (!%p384_p3)  ;;  %v947_v55 = vld [vmem:[%s2892_s2 + $0x58] sm:$0xff] (!%p384_p3)  ;;  %v2304_v56 = vld [vmem:[%s2891_s1 + $0x8] sm:$0xff] (!%p384_p3)  }
   0xe   : > { %s2908_s21 = smov (!%p434_p4, %s2339_s21), 1  ;;  %v1106_v57 = vld [vmem:[%s2893_s3 + $0x50] sm:$0xff]  ;;  %v1107_v58 = vld [vmem:[%s2893_s3 + $0x58] sm:$0xff]  ;;  %v948_v59 = vld [vmem:[%s2892_s2 + $0x60] sm:$0xff] }
   0xf   : > { %s2226_s15 = sshll.u32 %s2908_s21, 8  ;;  %v949_v60 = vld [vmem:[%s2892_s2 + $0x68] sm:$0xff]  ;;  %v2305_v61 = vld [vmem:[%s2891_s1 + $0x10] sm:$0xff]   ;;  %v1108_v62 = vld [vmem:[%s2893_s3 + $0x60] sm:$0xff]  ;;  %s2227_s16 = sshll.u32 %s2908_s21, 4 }
  0x10   : > { %s2455_s18 = scalar_lea.vmem %s2890_s0, %s2226_s15  ;;  %964 = vperm.xlu0 %2253, %v938_v6   ;;  %969 = vperm.xlu1 %2254, %v939_v8   ;;  %v1109_v63 = vld [vmem:[%s2893_s3 + $0x68] sm:$0xff]  ;;  %v950_v0 = vld [vmem:[%s2892_s2 + $0x70] sm:$0xff]  ;;  %v951_v1 = vld [vmem:[%s2892_s2 + $0x78] sm:$0xff]  ;;  %s451_s20 = scalar_lea.vmem %s2902_s12, %s2227_s16 }
  0x11   : > { %v2255_v5 = vld [vmem:[%s2455_s18 + $0x4] ss:$16 sps:$4 sm:$0xff]   ;;  %v2257_v7 = vld [vmem:[%s2455_s18 + $0xc] ss:$16 sps:$4 sm:$0xff]   ;;  %v2259_v9 = vld [vmem:[%s2455_s18] ss:$16 sps:$4 sm:$0xff]  }
  0x12   : > { %710 = vmatprep.subr.bf16.mxu0 %v2255_v5  ;;  %v2260_v10 = vld [vmem:[%s2455_s18 + $0x8] ss:$16 sps:$4 sm:$0xff]   ;;  %823 = vmatprep.subr.bf16.mxu1 %v2257_v7  ;;  %v2261_v11 = vld [vmem:[%s2455_s18 + $0x24] ss:$16 sps:$4 sm:$0xff]   ;;  %v2263_v12 = vld [vmem:[%s2455_s18 + $0x2c] ss:$16 sps:$4 sm:$0xff]  }
  0x13   : > { %711 = vmatpush1.bf16.msra.mxu0 %v2259_v9  ;;  %824 = vmatpush1.bf16.msra.mxu1 %v2260_v10  ;;  %v2265_v13 = vld [vmem:[%s2455_s18 + $0x20] ss:$16 sps:$4 sm:$0xff]   ;;  %v2266_v14 = vld [vmem:[%s2455_s18 + $0x28] ss:$16 sps:$4 sm:$0xff]   ;;  %v2267_v17 = vld [vmem:[%s2455_s18 + $0x44] ss:$16 sps:$4 sm:$0xff]  }
  0x14   : > { %712 = vmatprep.subr.bf16.mxu0 %v2261_v11  ;;  %825 = vmatprep.subr.bf16.mxu1 %v2263_v12  ;;  %v2269_v18 = vld [vmem:[%s2455_s18 + $0x4c] ss:$16 sps:$4 sm:$0xff]   ;;  %v2271_v19 = vld [vmem:[%s2455_s18 + $0x40] ss:$16 sps:$4 sm:$0xff]   ;;  %v2272_v20 = vld [vmem:[%s2455_s18 + $0x48] ss:$16 sps:$4 sm:$0xff]  }
  0x15   : > { %v2273_v21 = vld [vmem:[%s2455_s18 + $0x64] ss:$16 sps:$4 sm:$0xff]   ;;  %v2275_v22 = vld [vmem:[%s2455_s18 + $0x6c] ss:$16 sps:$4 sm:$0xff]   ;;  %1124 = vperm.xlu0 %2253, %v1098_v15   ;;  %1129 = vperm.xlu1 %2254, %v1099_v16   ;;  %v2277_v25 = vld [vmem:[%s2455_s18 + $0x60] ss:$16 sps:$4 sm:$0xff]  }
  0x16   : > { %v2278_v26 = vld [vmem:[%s2455_s18 + $0x68] ss:$16 sps:$4 sm:$0xff]   ;;  %v2279_v27 = vld [vmem:[%s2455_s18 + $0x84] ss:$16 sps:$4 sm:$0xff]   ;;  %v2281_v28 = vld [vmem:[%s2455_s18 + $0x8c] ss:$16 sps:$4 sm:$0xff]  }
  0x17   : > { %713 = vmatpush1.bf16.msra.mxu0 %v2265_v13  ;;  %826 = vmatpush1.bf16.msra.mxu1 %v2266_v14  ;;  %v2283_v30 = vld [vmem:[%s2455_s18 + $0x80] ss:$16 sps:$4 sm:$0xff]   ;;  %v2284_v31 = vld [vmem:[%s2455_s18 + $0x88] ss:$16 sps:$4 sm:$0xff]   ;;  %v2285_v33 = vld [vmem:[%s2455_s18 + $0xa4] ss:$16 sps:$4 sm:$0xff]  }
  0x18   : > { %714 = vmatprep.subr.bf16.mxu0 %v2267_v17  ;;  %827 = vmatprep.subr.bf16.mxu1 %v2269_v18  ;;  %v2287_v34 = vld [vmem:[%s2455_s18 + $0xac] ss:$16 sps:$4 sm:$0xff]   ;;  %v2289_v37 = vld [vmem:[%s2455_s18 + $0xa0] ss:$16 sps:$4 sm:$0xff]   ;;  %v2290_v38 = vld [vmem:[%s2455_s18 + $0xa8] ss:$16 sps:$4 sm:$0xff]  }
  0x19   : > { %974 = vperm.xlu0 %2253, %v940_v23   ;;  %979 = vperm.xlu1 %2254, %v941_v24   ;;  %v2291_v39 = vld [vmem:[%s2455_s18 + $0xc4] ss:$16 sps:$4 sm:$0xff]   ;;  %v2293_v40 = vld [vmem:[%s2455_s18 + $0xcc] ss:$16 sps:$4 sm:$0xff]   ;;  %v2295_v43 = vld [vmem:[%s2455_s18 + $0xc0] ss:$16 sps:$4 sm:$0xff]  }
  0x1a   : > { %v2296_v44 = vld [vmem:[%s2455_s18 + $0xc8] ss:$16 sps:$4 sm:$0xff]   ;;  %v2297_v45 = vld [vmem:[%s2455_s18 + $0xe4] ss:$16 sps:$4 sm:$0xff]   ;;  %v2299_v46 = vld [vmem:[%s2455_s18 + $0xec] ss:$16 sps:$4 sm:$0xff]  }
  0x1b   : > { %715 = vmatpush1.bf16.msra.mxu0 %v2271_v19  ;;  %828 = vmatpush1.bf16.msra.mxu1 %v2272_v20  ;;  %v2301_v49 = vld [vmem:[%s2455_s18 + $0xe0] ss:$16 sps:$4 sm:$0xff]   ;;  %v2302_v50 = vld [vmem:[%s2455_s18 + $0xe8] ss:$16 sps:$4 sm:$0xff]  }
  0x1c   : > { %716 = vmatprep.subr.bf16.mxu0 %v2273_v21  ;;  %829 = vmatprep.subr.bf16.mxu1 %v2275_v22  ;;  %v2306_v3 = vld [vmem:[%s2891_s1 + $0x18] sm:$0xff]   ;;  %v1110_v4 = vld [vmem:[%s2893_s3 + $0x70] sm:$0xff]  ;;  %v1530_v6 = vld [vmem:[%s2895_s5] sm:$0xff] }
  0x1d   : > { %1134 = vperm.xlu0 %2253, %v1100_v29   ;;  %1139 = vperm.xlu1 %2254, %v1101_v32   ;;  %v1111_v5 = vld [vmem:[%s2893_s3 + $0x78] sm:$0xff]  ;;  %v1531_v7 = vld [vmem:[%s2895_s5 + $0x8] sm:$0xff]  ;;  %v2307_v8 = vld [vmem:[%s2891_s1 + $0x20] sm:$0xff]  }
  0x1e   : > { %v1610_v9 = vld [vmem:[%s2896_s6] sm:$0xff]  ;;  %v1611_v10 = vld [vmem:[%s2896_s6 + $0x8] sm:$0xff]  ;;  %v1532_v11 = vld [vmem:[%s2895_s5 + $0x10] sm:$0xff] }
  0x1f   : > { %717 = vmatpush1.bf16.msra.mxu0 %v2277_v25  ;;  %830 = vmatpush1.bf16.msra.mxu1 %v2278_v26  ;;  %v1533_v12 = vld [vmem:[%s2895_s5 + $0x18] sm:$0xff]  ;;  %v2308_v13 = vld [vmem:[%s2891_s1 + $0x28] sm:$0xff]   ;;  %v1612_v14 = vld [vmem:[%s2896_s6 + $0x10] sm:$0xff] }
  0x20   : > { %718 = vmatprep.subr.bf16.mxu0 %v2279_v27  ;;  %831 = vmatprep.subr.bf16.mxu1 %v2281_v28  ;;  %v1613_v15 = vld [vmem:[%s2896_s6 + $0x18] sm:$0xff]  ;;  %v1534_v16 = vld [vmem:[%s2895_s5 + $0x20] sm:$0xff]  ;;  %v1535_v17 = vld [vmem:[%s2895_s5 + $0x28] sm:$0xff] }
  0x21   : > { %984 = vperm.xlu0 %2253, %v942_v35   ;;  %989 = vperm.xlu1 %2254, %v943_v36   ;;  %v2309_v18 = vld [vmem:[%s2891_s1 + $0x30] sm:$0xff]   ;;  %v1614_v19 = vld [vmem:[%s2896_s6 + $0x20] sm:$0xff]  ;;  %v1615_v20 = vld [vmem:[%s2896_s6 + $0x28] sm:$0xff] }
  0x22   : > { %v1536_v21 = vld [vmem:[%s2895_s5 + $0x30] sm:$0xff]  ;;  %v1537_v22 = vld [vmem:[%s2895_s5 + $0x38] sm:$0xff]  ;;  %v1865_v26 = vld [vmem:[%s2898_s8] sm:$0xff] }
  0x23   : > { %719 = vmatpush1.bf16.msra.mxu0 %v2283_v30  ;;  %832 = vmatpush1.bf16.msra.mxu1 %v2284_v31  ;;  %v2310_v23 = vld [vmem:[%s2891_s1 + $0x38] sm:$0xff]   ;;  %v1616_v24 = vld [vmem:[%s2896_s6 + $0x30] sm:$0xff]  ;;  %v1866_v27 = vld [vmem:[%s2898_s8 + $0x8] sm:$0xff] }
  0x24   : > { %720 = vmatprep.subr.bf16.mxu0 %v2285_v33  ;;  %833 = vmatprep.subr.bf16.mxu1 %v2287_v34  ;;  %v1617_v25 = vld [vmem:[%s2896_s6 + $0x38] sm:$0xff]  ;;  %v1905_v28 = vld [vmem:[%s2899_s9] sm:$0xff]  ;;  %v1906_v29 = vld [vmem:[%s2899_s9 + $0x8] sm:$0xff] }
  0x25   : > { %1144 = vperm.xlu0 %2253, %v1102_v41   ;;  %1149 = vperm.xlu1 %2254, %v1103_v42   ;;  %v1867_v30 = vld [vmem:[%s2898_s8 + $0x10] sm:$0xff]  ;;  %v1868_v31 = vld [vmem:[%s2898_s8 + $0x18] sm:$0xff]  ;;  %v1970_v34 = vld [vmem:[%s2901_s11] sm:$0x7] }
  0x26   : > { %v1907_v32 = vld [vmem:[%s2899_s9 + $0x10] sm:$0xff]  ;;  %v1908_v33 = vld [vmem:[%s2899_s9 + $0x18] sm:$0xff] }
  0x27   : > { %721 = vmatpush1.bf16.msra.mxu0 %v2289_v37  ;;  %834 = vmatpush1.bf16.msra.mxu1 %v2290_v38 }
  0x28   : > { %722 = vmatprep.subr.bf16.mxu0 %v2291_v39  ;;  %835 = vmatprep.subr.bf16.mxu1 %v2293_v40 }
  0x29   : > { %994 = vperm.xlu0 %2253, %v944_v47   ;;  %999 = vperm.xlu1 %2254, %v945_v48  }
  0x2b   : > { %723 = vmatpush1.bf16.msra.mxu0 %v2295_v43  ;;  %836 = vmatpush1.bf16.msra.mxu1 %v2296_v44 }
  0x2c   : > { %724 = vmatprep.subr.bf16.mxu0 %v2297_v45  ;;  %837 = vmatprep.subr.bf16.mxu1 %v2299_v46 }
  0x2d   : > { %1154 = vperm.xlu0 %2253, %v1104_v52   ;;  %1159 = vperm.xlu1 %2254, %v1105_v53  }
  0x2f   : > { %725 = vmatpush1.bf16.msra.mxu0 %v2301_v49  ;;  %838 = vmatpush1.bf16.msra.mxu1 %v2302_v50 }
  0x31   : > { %1004 = vperm.xlu0 %2253, %v946_v54   ;;  %1009 = vperm.xlu1 %2254, %v947_v55  }
  0x32   : > { %743 = vmatmul.mubr.bf16.vlgmr.msra.gmra.mrb[0].mxu0 %v2303_v51  ;;  %856 = vmatmul.mubr.bf16.vlgmr.msra.gmra.mrb[0].mxu1 %v2303_v51 }
  0x33   : > { %752 = vmatprep.mubr.bf16.mxu0 %v2349_v2  ;;  %865 = vmatprep.mubr.bf16.mxu1 %v2349_v2 }
  0x35   : > { %1164 = vperm.xlu0 %2253, %v1106_v57   ;;  %1169 = vperm.xlu1 %2254, %v1107_v58  }
  0x39   : > { %1014 = vperm.xlu0 %2253, %v948_v59   ;;  %1019 = vperm.xlu1 %2254, %v949_v60  }
  0x3a   : > { %753 = vmatmul.mubr.bf16.gmra.mrb[4].mxu0 %v2304_v56  ;;  %866 = vmatmul.mubr.bf16.gmra.mrb[4].mxu1 %v2304_v56 }
  0x3b   : > { %762 = vmatprep.mubr.bf16.mxu0 %v2349_v2  ;;  %875 = vmatprep.mubr.bf16.mxu1 %v2349_v2 }
  0x3d   : > { %1174 = vperm.xlu0 %2253, %v1108_v62   ;;  %1179 = vperm.xlu1 %2254, %v1109_v63  }
  0x41   : > { %1024 = vperm.xlu0 %2253, %v950_v0   ;;  %1029 = vperm.xlu1 %2254, %v951_v1  }
  0x42   : > { %763 = vmatmul.mubr.bf16.gmra.mrb[8].mxu0 %v2305_v61  ;;  %876 = vmatmul.mubr.bf16.gmra.mrb[8].mxu1 %v2305_v61 }
  0x43   : > { %772 = vmatprep.mubr.bf16.mxu0 %v2349_v2  ;;  %885 = vmatprep.mubr.bf16.mxu1 %v2349_v2 }
  0x45   : > { %1184 = vperm.xlu0 %2253, %v1110_v4   ;;  %1189 = vperm.xlu1 %2254, %v1111_v5  }
  0x49   : > { %1540 = vperm.xlu0 %2253, %v1530_v6   ;;  %1545 = vperm.xlu1 %2254, %v1531_v7  }
  0x4a   : > { %773 = vmatmul.mubr.bf16.gmra.mrb[12].mxu0 %v2306_v3  ;;  %886 = vmatmul.mubr.bf16.gmra.mrb[12].mxu1 %v2306_v3 }
  0x4b   : > { %782 = vmatprep.mubr.bf16.mxu0 %v2349_v2  ;;  %895 = vmatprep.mubr.bf16.mxu1 %v2349_v2 }
  0x4d   : > { %1620 = vperm.xlu0 %2253, %v1610_v9   ;;  %1625 = vperm.xlu1 %2254, %v1611_v10  }
  0x51   : > { %1550 = vperm.xlu0 %2253, %v1532_v11   ;;  %1555 = vperm.xlu1 %2254, %v1533_v12  }
  0x52   : > { %783 = vmatmul.mubr.bf16.gmra.mrb[16].mxu0 %v2307_v8  ;;  %896 = vmatmul.mubr.bf16.gmra.mrb[16].mxu1 %v2307_v8 }
  0x53   : > { %792 = vmatprep.mubr.bf16.mxu0 %v2349_v2  ;;  %905 = vmatprep.mubr.bf16.mxu1 %v2349_v2 }
  0x55   : > { %1630 = vperm.xlu0 %2253, %v1612_v14   ;;  %1635 = vperm.xlu1 %2254, %v1613_v15  }
  0x59   : > { %1560 = vperm.xlu0 %2253, %v1534_v16   ;;  %1565 = vperm.xlu1 %2254, %v1535_v17  }
  0x5a   : > { %793 = vmatmul.mubr.bf16.gmra.mrb[20].mxu0 %v2308_v13  ;;  %906 = vmatmul.mubr.bf16.gmra.mrb[20].mxu1 %v2308_v13 }
  0x5b   : > { %802 = vmatprep.mubr.bf16.mxu0 %v2349_v2  ;;  %915 = vmatprep.mubr.bf16.mxu1 %v2349_v2 }
  0x5d   : > { %1640 = vperm.xlu0 %2253, %v1614_v19   ;;  %1645 = vperm.xlu1 %2254, %v1615_v20  }
  0x61   : > { %1570 = vperm.xlu0 %2253, %v1536_v21   ;;  %1575 = vperm.xlu1 %2254, %v1537_v22  }
  0x62   : > { %803 = vmatmul.mubr.bf16.gmra.mrb[24].mxu0 %v2309_v18  ;;  %916 = vmatmul.mubr.bf16.gmra.mrb[24].mxu1 %v2309_v18 }
  0x63   : > { %812 = vmatprep.mubr.bf16.mxu0 %v2349_v2  ;;  %925 = vmatprep.mubr.bf16.mxu1 %v2349_v2 }
  0x65   : > { %1650 = vperm.xlu0 %2253, %v1616_v24   ;;  %1655 = vperm.xlu1 %2254, %v1617_v25  }
  0x69   : > { %1871 = vperm.xlu0 %2253, %v1865_v26   ;;  %1876 = vperm.xlu1 %2254, %v1866_v27  }
  0x6a   : > { %813 = vmatmul.mubr.bf16.gmra.mrb[28].mxu0 %v2310_v23  ;;  %926 = vmatmul.mubr.bf16.gmra.mrb[28].mxu1 %v2310_v23 }
  0x6b   : > { %1416 = vmatprep.mubr.bf16.mxu0 %v2349_v2  ;;  %1489 = vmatprep.mubr.bf16.mxu1 %v2349_v2 }
  0x6d   : > { %1911 = vperm.xlu0 %2253, %v1905_v28   ;;  %1916 = vperm.xlu1 %2254, %v1906_v29  }
  0x71   : > { %1881 = vperm.xlu0 %2253, %v1867_v30   ;;  %1886 = vperm.xlu1 %2254, %v1868_v31  }
  0x75   : > { %1921 = vperm.xlu0 %2253, %v1907_v32   ;;  %1926 = vperm.xlu1 %2254, %v1908_v33  }
  0x79   : > { %1973 = vperm.xlu0 %2253, %v1970_v34  }
  0x87   : > { %v955_v35 = vpop.permute.xlu0 %954  ;;  %v1115_v37 = vpop.permute.xlu1 %1114 }
  0x8b   : > { %v960_v36 = vpop.permute.xlu0 %959  ;;  %v1120_v39 = vpop.permute.xlu1 %1119 }
  0x8f   : > { %v965_v38 = vpop.permute.xlu0 %964  ;;  %v2690_v41 = vpop.permute.xlu1 %969 }
  0x94   : > { %v2688_v40 = vpop.permute.xlu0 %1124  ;;  %v2694_v43 = vpop.permute.xlu1 %1129 }
  0x98   : > { %v2692_v42 = vpop.permute.xlu0 %974  ;;  %v2698_v45 = vpop.permute.xlu1 %979 }
  0x9c   : > { %v2696_v44 = vpop.permute.xlu0 %1134  ;;  %v2702_v47 = vpop.permute.xlu1 %1139 }
  0xa0   : > { %v2700_v46 = vpop.permute.xlu0 %984  ;;  %v2706_v49 = vpop.permute.xlu1 %989 }
  0xa4   : > { %v2704_v48 = vpop.permute.xlu0 %1144  ;;  %v2710_v51 = vpop.permute.xlu1 %1149 }
  0xa8   : > { %v2708_v50 = vpop.permute.xlu0 %994  ;;  %v2714_v14 = vpop.permute.xlu1 %999 }
  0xac   : > { %v2712_v13 = vpop.permute.xlu0 %1154 }
 0x105   : > { %v744_v52 = vpop.f32.mrb[0].mxu0  ;;  %v857_v53 = vpop.f32.mrb[0].mxu1 }
 0x106   : > { %v1032_v54 = vmul.f32 %v955_v35, %v744_v52  ;;  %v1034_v55 = vmul.f32 %v955_v35, %v857_v53  ;;  %v746_v56 = vpop.f32.mrb[1].mxu0  ;;  %v859_v57 = vpop.f32.mrb[1].mxu1 }
 0x107   : > { %v1033_v58 = vmul.f32 %v955_v35, %v746_v56  ;;  %v1035_v59 = vmul.f32 %v955_v35, %v859_v57  ;;  %v748_v60 = vpop.f32.mrb[2].mxu0  ;;  %v861_v61 = vpop.f32.mrb[2].mxu1 }
 0x108   : > { %v1192_v62 = vadd.f32 %v1115_v37, %v1032_v54  ;;  %v1194_v63 = vadd.f32 %v1115_v37, %v1034_v55  ;;  %v1036_v0 = vmul.f32 %v960_v36, %v748_v60  ;;  %v1038_v1 = vmul.f32 %v960_v36, %v861_v61  ;;  %v750_v3 = vpop.f32.mrb[3].mxu0  ;;  %v863_v4 = vpop.f32.mrb[3].mxu1 }
 0x109   : > { %v1193_v5 = vadd.f32 %v1115_v37, %v1033_v58  ;;  %v1195_v6 = vadd.f32 %v1115_v37, %v1035_v59  ;;  %v1037_v7 = vmul.f32 %v960_v36, %v750_v3  ;;  %v1039_v8 = vmul.f32 %v960_v36, %v863_v4 }
 0x10a   : > { %v1196_v9 = vadd.f32 %v1120_v39, %v1036_v0  ;;  %v1198_v10 = vadd.f32 %v1120_v39, %v1038_v1  ;;  %v1256_v15 = vmax.f32 %v1192_v62, 0.0  ;;  %v1258_v16 = vmax.f32 %v1194_v63, 0.0  ;;  %v2728_v63 = vpop.permute.xlu0 %1004  ;;  %v2730_v0 = vpop.permute.xlu1 %1159 }
 0x10b   : > { %v1197_v11 = vadd.f32 %v1120_v39, %v1037_v7  ;;  %v1199_v12 = vadd.f32 %v1120_v39, %v1039_v8  ;;  %v1257_v19 = vmax.f32 %v1193_v5, 0.0  ;;  %v1259_v20 = vmax.f32 %v1195_v6, 0.0 }
 0x10c   : > { %v1260_v17 = vmax.f32 %v1196_v9, 0.0  ;;  %v1262_v18 = vmax.f32 %v1198_v10, 0.0 }
 0x10d   : > { %v1261_v21 = vmax.f32 %v1197_v11, 0.0  ;;  %v1263_v22 = vmax.f32 %v1199_v12, 0.0  ;;  %v754_v23 = vpop.f32.mrb[4].mxu0  ;;  %v867_v24 = vpop.f32.mrb[4].mxu1 }
 0x10e   : > { %v1320_v25 = vpack.c.bf16 %v1260_v17, %v1256_v15  ;;  %v1322_v26 = vpack.c.bf16 %v1262_v18, %v1258_v16  ;;  %v1040_v27 = vmul.f32 %v965_v38, %v754_v23  ;;  %v1042_v28 = vmul.f32 %v965_v38, %v867_v24  ;;  %v756_v29 = vpop.f32.mrb[5].mxu0  ;;  %v869_v30 = vpop.f32.mrb[5].mxu1 }
 0x10f   : > { %v1041_v31 = vmul.f32 %v965_v38, %v756_v29  ;;  %v1043_v32 = vmul.f32 %v965_v38, %v869_v30  ;;  %v758_v33 = vpop.f32.mrb[6].mxu0  ;;  %v871_v34 = vpop.f32.mrb[6].mxu1  ;;  %v1321_v35 = vpack.c.bf16 %v1261_v21, %v1257_v19  ;;  %v1323_v36 = vpack.c.bf16 %v1263_v22, %v1259_v20 }
 0x110   : > { %v1200_v37 = vadd.f32 %v2688_v40, %v1040_v27  ;;  %v1202_v39 = vadd.f32 %v2688_v40, %v1042_v28  ;;  %v1044_v52 = vmul.f32 %v2690_v41, %v758_v33  ;;  %v1046_v53 = vmul.f32 %v2690_v41, %v871_v34  ;;  %v760_v54 = vpop.f32.mrb[7].mxu0  ;;  %v873_v55 = vpop.f32.mrb[7].mxu1 }
 0x111   : > { %v1201_v56 = vadd.f32 %v2688_v40, %v1041_v31  ;;  %v1203_v57 = vadd.f32 %v2688_v40, %v1043_v32  ;;  %v1045_v38 = vmul.f32 %v2690_v41, %v760_v54  ;;  %v1047_v58 = vmul.f32 %v2690_v41, %v873_v55  ;;  %1384 = vmatprep.subr.bf16.mxu0 %v1321_v35 }
 0x112   : > { %v1204_v59 = vadd.f32 %v2694_v43, %v1044_v52  ;;  %v1206_v60 = vadd.f32 %v2694_v43, %v1046_v53  ;;  %1457 = vmatprep.subr.bf16.mxu1 %v1323_v36  ;;  %1385 = vmatpush1.bf16.msra.mxu0 %v1320_v25  ;;  %v1264_v40 = vmax.f32 %v1200_v37, 0.0  ;;  %v1266_v1 = vmax.f32 %v1202_v39, 0.0  ;;  %v2748_v36 = vpop.permute.xlu0 %1164  ;;  %v2750_v37 = vpop.permute.xlu1 %1009 }
 0x113   : > { %v1205_v61 = vadd.f32 %v2694_v43, %v1045_v38  ;;  %v1207_v62 = vadd.f32 %v2694_v43, %v1047_v58  ;;  %1458 = vmatpush1.bf16.msra.mxu1 %v1322_v26  ;;  %v1265_v4 = vmax.f32 %v1201_v56, 0.0  ;;  %v1267_v5 = vmax.f32 %v1203_v57, 0.0 }
 0x114   : > { %v1268_v3 = vmax.f32 %v1204_v59, 0.0  ;;  %v1270_v41 = vmax.f32 %v1206_v60, 0.0 }
 0x115   : > { %v1269_v6 = vmax.f32 %v1205_v61, 0.0  ;;  %v1271_v7 = vmax.f32 %v1207_v62, 0.0  ;;  %v764_v8 = vpop.f32.mrb[8].mxu0  ;;  %v877_v9 = vpop.f32.mrb[8].mxu1 }
 0x116   : > { %v1324_v10 = vpack.c.bf16 %v1268_v3, %v1264_v40  ;;  %v1326_v11 = vpack.c.bf16 %v1270_v41, %v1266_v1  ;;  %v1048_v12 = vmul.f32 %v2692_v42, %v764_v8  ;;  %v1050_v43 = vmul.f32 %v2692_v42, %v877_v9  ;;  %v766_v15 = vpop.f32.mrb[9].mxu0  ;;  %v879_v16 = vpop.f32.mrb[9].mxu1 }
 0x117   : > { %v1049_v17 = vmul.f32 %v2692_v42, %v766_v15  ;;  %v1051_v18 = vmul.f32 %v2692_v42, %v879_v16  ;;  %v768_v19 = vpop.f32.mrb[10].mxu0  ;;  %v881_v20 = vpop.f32.mrb[10].mxu1  ;;  %v1325_v21 = vpack.c.bf16 %v1269_v6, %v1265_v4  ;;  %v1327_v22 = vpack.c.bf16 %v1271_v7, %v1267_v5 }
 0x118   : > { %v1208_v23 = vadd.f32 %v2696_v44, %v1048_v12  ;;  %v1210_v24 = vadd.f32 %v2696_v44, %v1050_v43  ;;  %v1052_v25 = vmul.f32 %v2698_v45, %v768_v19  ;;  %v1054_v26 = vmul.f32 %v2698_v45, %v881_v20  ;;  %v770_v27 = vpop.f32.mrb[11].mxu0  ;;  %v883_v28 = vpop.f32.mrb[11].mxu1 }
 0x119   : > { %v1209_v29 = vadd.f32 %v2696_v44, %v1049_v17  ;;  %v1211_v30 = vadd.f32 %v2696_v44, %v1051_v18  ;;  %v1053_v42 = vmul.f32 %v2698_v45, %v770_v27  ;;  %v1055_v31 = vmul.f32 %v2698_v45, %v883_v28  ;;  %1386 = vmatprep.subr.bf16.mxu0 %v1325_v21  ;;  %v2768_v20 = vpop.permute.xlu0 %1014  ;;  %v2770_v21 = vpop.permute.xlu1 %1169 }
 0x11a   : > { %v1212_v32 = vadd.f32 %v2702_v47, %v1052_v25  ;;  %v1214_v33 = vadd.f32 %v2702_v47, %v1054_v26  ;;  %1459 = vmatprep.subr.bf16.mxu1 %v1327_v22  ;;  %1387 = vmatpush1.bf16.msra.mxu0 %v1324_v10  ;;  %v1272_v44 = vmax.f32 %v1208_v23, 0.0  ;;  %v1274_v39 = vmax.f32 %v1210_v24, 0.0 }
 0x11b   : > { %v1213_v34 = vadd.f32 %v2702_v47, %v1053_v42  ;;  %v1215_v35 = vadd.f32 %v2702_v47, %v1055_v31  ;;  %1460 = vmatpush1.bf16.msra.mxu1 %v1326_v11  ;;  %v1273_v53 = vmax.f32 %v1209_v29, 0.0  ;;  %v1275_v54 = vmax.f32 %v1211_v30, 0.0 }
 0x11c   : > { %v1276_v52 = vmax.f32 %v1212_v32, 0.0  ;;  %v1278_v45 = vmax.f32 %v1214_v33, 0.0 }
 0x11d   : > { %v1277_v55 = vmax.f32 %v1213_v34, 0.0  ;;  %v1279_v56 = vmax.f32 %v1215_v35, 0.0  ;;  %v774_v57 = vpop.f32.mrb[12].mxu0  ;;  %v887_v38 = vpop.f32.mrb[12].mxu1 }
 0x11e   : > { %v1328_v58 = vpack.c.bf16 %v1276_v52, %v1272_v44  ;;  %v1330_v59 = vpack.c.bf16 %v1278_v45, %v1274_v39  ;;  %v1056_v60 = vmul.f32 %v2700_v46, %v774_v57  ;;  %v1058_v47 = vmul.f32 %v2700_v46, %v887_v38  ;;  %v776_v61 = vpop.f32.mrb[13].mxu0  ;;  %v889_v62 = vpop.f32.mrb[13].mxu1 }
 0x11f   : > { %v1057_v40 = vmul.f32 %v2700_v46, %v776_v61  ;;  %v1059_v1 = vmul.f32 %v2700_v46, %v889_v62  ;;  %v778_v3 = vpop.f32.mrb[14].mxu0  ;;  %v891_v41 = vpop.f32.mrb[14].mxu1  ;;  %v1329_v4 = vpack.c.bf16 %v1277_v55, %v1273_v53  ;;  %v1331_v5 = vpack.c.bf16 %v1279_v56, %v1275_v54 }
 0x120   : > { %v1216_v6 = vadd.f32 %v2704_v48, %v1056_v60  ;;  %v1218_v7 = vadd.f32 %v2704_v48, %v1058_v47  ;;  %v1060_v8 = vmul.f32 %v2706_v49, %v778_v3  ;;  %v1062_v9 = vmul.f32 %v2706_v49, %v891_v41  ;;  %v780_v10 = vpop.f32.mrb[15].mxu0  ;;  %v893_v11 = vpop.f32.mrb[15].mxu1 }
 0x121   : > { %v1217_v12 = vadd.f32 %v2704_v48, %v1057_v40  ;;  %v1219_v43 = vadd.f32 %v2704_v48, %v1059_v1  ;;  %v1061_v46 = vmul.f32 %v2706_v49, %v780_v10  ;;  %v1063_v15 = vmul.f32 %v2706_v49, %v893_v11  ;;  %1388 = vmatprep.subr.bf16.mxu0 %v1329_v4  ;;  %v2788_v1 = vpop.permute.xlu0 %1174  ;;  %v2790_v3 = vpop.permute.xlu1 %1019 }
 0x122   : > { %v1220_v16 = vadd.f32 %v2710_v51, %v1060_v8  ;;  %v1222_v17 = vadd.f32 %v2710_v51, %v1062_v9  ;;  %1461 = vmatprep.subr.bf16.mxu1 %v1331_v5  ;;  %1389 = vmatpush1.bf16.msra.mxu0 %v1328_v58  ;;  %v1280_v48 = vmax.f32 %v1216_v6, 0.0  ;;  %v1282_v22 = vmax.f32 %v1218_v7, 0.0 }
 0x123   : > { %v1221_v18 = vadd.f32 %v2710_v51, %v1061_v46  ;;  %v1223_v19 = vadd.f32 %v2710_v51, %v1063_v15  ;;  %1462 = vmatpush1.bf16.msra.mxu1 %v1330_v59  ;;  %v1281_v24 = vmax.f32 %v1217_v12, 0.0  ;;  %v1283_v25 = vmax.f32 %v1219_v43, 0.0 }
 0x124   : > { %v1284_v23 = vmax.f32 %v1220_v16, 0.0  ;;  %v1286_v49 = vmax.f32 %v1222_v17, 0.0 }
 0x125   : > { %v1285_v26 = vmax.f32 %v1221_v18, 0.0  ;;  %v1287_v27 = vmax.f32 %v1223_v19, 0.0  ;;  %v784_v28 = vpop.f32.mrb[16].mxu0  ;;  %v897_v29 = vpop.f32.mrb[16].mxu1 }
 0x126   : > { %v1332_v30 = vpack.c.bf16 %v1284_v23, %v1280_v48  ;;  %v1334_v42 = vpack.c.bf16 %v1286_v49, %v1282_v22  ;;  %v1064_v31 = vmul.f32 %v2708_v50, %v784_v28  ;;  %v1066_v51 = vmul.f32 %v2708_v50, %v897_v29  ;;  %v786_v32 = vpop.f32.mrb[17].mxu0  ;;  %v899_v33 = vpop.f32.mrb[17].mxu1 }
 0x127   : > { %v1065_v34 = vmul.f32 %v2708_v50, %v786_v32  ;;  %v1067_v35 = vmul.f32 %v2708_v50, %v899_v33  ;;  %v788_v44 = vpop.f32.mrb[18].mxu0  ;;  %v901_v39 = vpop.f32.mrb[18].mxu1  ;;  %v1333_v52 = vpack.c.bf16 %v1285_v26, %v1281_v24  ;;  %v1335_v45 = vpack.c.bf16 %v1287_v27, %v1283_v25 }
 0x128   : > { %v1224_v53 = vadd.f32 %v2712_v13, %v1064_v31  ;;  %v1226_v54 = vadd.f32 %v2712_v13, %v1066_v51  ;;  %v1068_v55 = vmul.f32 %v2714_v14, %v788_v44  ;;  %v1070_v56 = vmul.f32 %v2714_v14, %v901_v39  ;;  %v790_v57 = vpop.f32.mrb[19].mxu0  ;;  %v903_v38 = vpop.f32.mrb[19].mxu1 }
 0x129   : > { %v1225_v58 = vadd.f32 %v2712_v13, %v1065_v34  ;;  %v1227_v59 = vadd.f32 %v2712_v13, %v1067_v35  ;;  %v1069_v50 = vmul.f32 %v2714_v14, %v790_v57  ;;  %v1071_v60 = vmul.f32 %v2714_v14, %v903_v38  ;;  %1390 = vmatprep.subr.bf16.mxu0 %v1333_v52  ;;  %v1025_v33 = vpop.permute.xlu0 %1024  ;;  %v1180_v34 = vpop.permute.xlu1 %1179 }
 0x12a   : > { %v1228_v47 = vadd.f32 %v2730_v0, %v1068_v55  ;;  %v1230_v61 = vadd.f32 %v2730_v0, %v1070_v56  ;;  %1463 = vmatprep.subr.bf16.mxu1 %v1335_v45  ;;  %1391 = vmatpush1.bf16.msra.mxu0 %v1332_v30  ;;  %v1288_v13 = vmax.f32 %v1224_v53, 0.0  ;;  %v1290_v41 = vmax.f32 %v1226_v54, 0.0 }
 0x12b   : > { %v1229_v62 = vadd.f32 %v2730_v0, %v1069_v50  ;;  %v1231_v40 = vadd.f32 %v2730_v0, %v1071_v60  ;;  %1464 = vmatpush1.bf16.msra.mxu1 %v1334_v42  ;;  %v1289_v5 = vmax.f32 %v1225_v58, 0.0  ;;  %v1291_v6 = vmax.f32 %v1227_v59, 0.0 }
 0x12c   : > { %v1292_v4 = vmax.f32 %v1228_v47, 0.0  ;;  %v1294_v14 = vmax.f32 %v1230_v61, 0.0 }
 0x12d   : > { %v1293_v7 = vmax.f32 %v1229_v62, 0.0  ;;  %v1295_v8 = vmax.f32 %v1231_v40, 0.0  ;;  %v794_v9 = vpop.f32.mrb[20].mxu0  ;;  %v907_v10 = vpop.f32.mrb[20].mxu1 }
 0x12e   : > { %v1336_v11 = vpack.c.bf16 %v1292_v4, %v1288_v13  ;;  %v1338_v12 = vpack.c.bf16 %v1294_v14, %v1290_v41  ;;  %v1072_v43 = vmul.f32 %v2728_v63, %v794_v9  ;;  %v1074_v0 = vmul.f32 %v2728_v63, %v907_v10  ;;  %v796_v46 = vpop.f32.mrb[21].mxu0  ;;  %v909_v15 = vpop.f32.mrb[21].mxu1 }
 0x12f   : > { %v1073_v16 = vmul.f32 %v2728_v63, %v796_v46  ;;  %v1075_v17 = vmul.f32 %v2728_v63, %v909_v15  ;;  %v798_v18 = vpop.f32.mrb[22].mxu0  ;;  %v911_v19 = vpop.f32.mrb[22].mxu1  ;;  %v1337_v48 = vpack.c.bf16 %v1293_v7, %v1289_v5  ;;  %v1339_v22 = vpack.c.bf16 %v1295_v8, %v1291_v6 }
 0x130   : > { %v1232_v23 = vadd.f32 %v2748_v36, %v1072_v43  ;;  %v1234_v49 = vadd.f32 %v2748_v36, %v1074_v0  ;;  %v1076_v24 = vmul.f32 %v2750_v37, %v798_v18  ;;  %v1078_v25 = vmul.f32 %v2750_v37, %v911_v19  ;;  %v800_v26 = vpop.f32.mrb[23].mxu0  ;;  %v913_v27 = vpop.f32.mrb[23].mxu1 }
 0x131   : > { %v1233_v28 = vadd.f32 %v2748_v36, %v1073_v16  ;;  %v1235_v29 = vadd.f32 %v2748_v36, %v1075_v17  ;;  %v1077_v63 = vmul.f32 %v2750_v37, %v800_v26  ;;  %v1079_v30 = vmul.f32 %v2750_v37, %v913_v27  ;;  %1392 = vmatprep.subr.bf16.mxu0 %v1337_v48  ;;  %v1185_v46 = vpop.permute.xlu0 %1184 }
 0x132   : > { %v1236_v42 = vadd.f32 %v2770_v21, %v1076_v24  ;;  %v1238_v31 = vadd.f32 %v2770_v21, %v1078_v25  ;;  %1465 = vmatprep.subr.bf16.mxu1 %v1339_v22  ;;  %1393 = vmatpush1.bf16.msra.mxu0 %v1336_v11  ;;  %v1296_v35 = vmax.f32 %v1232_v23, 0.0  ;;  %v1298_v36 = vmax.f32 %v1234_v49, 0.0 }
 0x133   : > { %v1237_v51 = vadd.f32 %v2770_v21, %v1077_v63  ;;  %v1239_v32 = vadd.f32 %v2770_v21, %v1079_v30  ;;  %1466 = vmatpush1.bf16.msra.mxu1 %v1338_v12  ;;  %v1297_v52 = vmax.f32 %v1233_v28, 0.0  ;;  %v1299_v37 = vmax.f32 %v1235_v29, 0.0  ;;  %v1030_v12 = vpop.permute.xlu1 %1029 }
 0x134   : > { %v1300_v44 = vmax.f32 %v1236_v42, 0.0  ;;  %v1302_v39 = vmax.f32 %v1238_v31, 0.0 }
 0x135   : > { %v1301_v45 = vmax.f32 %v1237_v51, 0.0  ;;  %v1303_v53 = vmax.f32 %v1239_v32, 0.0  ;;  %v804_v54 = vpop.f32.mrb[24].mxu0  ;;  %v917_v55 = vpop.f32.mrb[24].mxu1 }
 0x136   : > { %v1340_v56 = vpack.c.bf16 %v1300_v44, %v1296_v35  ;;  %v1342_v57 = vpack.c.bf16 %v1302_v39, %v1298_v36  ;;  %v1080_v38 = vmul.f32 %v2768_v20, %v804_v54  ;;  %v1082_v58 = vmul.f32 %v2768_v20, %v917_v55  ;;  %v806_v21 = vpop.f32.mrb[25].mxu0  ;;  %v919_v59 = vpop.f32.mrb[25].mxu1 }
 0x137   : > { %v1081_v50 = vmul.f32 %v2768_v20, %v806_v21  ;;  %v1083_v60 = vmul.f32 %v2768_v20, %v919_v59  ;;  %v808_v47 = vpop.f32.mrb[26].mxu0  ;;  %v921_v61 = vpop.f32.mrb[26].mxu1  ;;  %v1341_v62 = vpack.c.bf16 %v1301_v45, %v1297_v52  ;;  %v1343_v40 = vpack.c.bf16 %v1303_v53, %v1299_v37 }
 0x138   : > { %v1240_v13 = vadd.f32 %v2788_v1, %v1080_v38  ;;  %v1242_v41 = vadd.f32 %v2788_v1, %v1082_v58  ;;  %v1084_v4 = vmul.f32 %v2790_v3, %v808_v47  ;;  %v1086_v14 = vmul.f32 %v2790_v3, %v921_v61  ;;  %v810_v5 = vpop.f32.mrb[27].mxu0  ;;  %v923_v6 = vpop.f32.mrb[27].mxu1 }
 0x139   : > { %v1241_v7 = vadd.f32 %v2788_v1, %v1081_v50  ;;  %v1243_v8 = vadd.f32 %v2788_v1, %v1083_v60  ;;  %v1085_v20 = vmul.f32 %v2790_v3, %v810_v5  ;;  %v1087_v9 = vmul.f32 %v2790_v3, %v923_v6  ;;  %1394 = vmatprep.subr.bf16.mxu0 %v1341_v62  ;;  %v1190_v52 = vpop.permute.xlu1 %1189  ;;  %v2313_v5 = vld [vmem:[%s2894_s4 + $0x10] sm:$0xff]   ;;  %v2314_v6 = vld [vmem:[%s2894_s4 + $0x18] sm:$0xff]  }
 0x13a   : > { %v1244_v10 = vadd.f32 %v1180_v34, %v1084_v4  ;;  %v1246_v11 = vadd.f32 %v1180_v34, %v1086_v14  ;;  %1467 = vmatprep.subr.bf16.mxu1 %v1343_v40  ;;  %1395 = vmatpush1.bf16.msra.mxu0 %v1340_v56  ;;  %v1304_v15 = vmax.f32 %v1240_v13, 0.0  ;;  %v1306_v16 = vmax.f32 %v1242_v41, 0.0  ;;  %v2311_v4 = vld [vmem:[%s2894_s4] sm:$0xff]   ;;  %v2312_v14 = vld [vmem:[%s2894_s4 + $0x8] sm:$0xff]  }
 0x13b   : > { %v1245_v43 = vadd.f32 %v1180_v34, %v1085_v20  ;;  %v1247_v0 = vadd.f32 %v1180_v34, %v1087_v9  ;;  %1468 = vmatpush1.bf16.msra.mxu1 %v1342_v57  ;;  %v1305_v19 = vmax.f32 %v1241_v7, 0.0  ;;  %v1307_v1 = vmax.f32 %v1243_v8, 0.0  ;;  %v1541_v7 = vpop.permute.xlu0 %1540 }
 0x13c   : > { %v1308_v17 = vmax.f32 %v1244_v10, 0.0  ;;  %v1310_v18 = vmax.f32 %v1246_v11, 0.0 }
 0x13d   : > { %v1309_v48 = vmax.f32 %v1245_v43, 0.0  ;;  %v1311_v22 = vmax.f32 %v1247_v0, 0.0  ;;  %v814_v23 = vpop.f32.mrb[28].mxu0  ;;  %v927_v3 = vpop.f32.mrb[28].mxu1 }
 0x13e   : > { %v1344_v49 = vpack.c.bf16 %v1308_v17, %v1304_v15  ;;  %v1346_v24 = vpack.c.bf16 %v1310_v18, %v1306_v16  ;;  %v1088_v25 = vmul.f32 %v1025_v33, %v814_v23  ;;  %v1090_v26 = vmul.f32 %v1025_v33, %v927_v3  ;;  %v816_v27 = vpop.f32.mrb[29].mxu0  ;;  %v929_v28 = vpop.f32.mrb[29].mxu1 }
 0x13f   : > { %v1089_v29 = vmul.f32 %v1025_v33, %v816_v27  ;;  %v1091_v63 = vmul.f32 %v1025_v33, %v929_v28  ;;  %v818_v30 = vpop.f32.mrb[30].mxu0  ;;  %v931_v42 = vpop.f32.mrb[30].mxu1  ;;  %v1345_v31 = vpack.c.bf16 %v1309_v48, %v1305_v19  ;;  %v1347_v51 = vpack.c.bf16 %v1311_v22, %v1307_v1 }
 0x140   : > { %v1248_v32 = vadd.f32 %v1185_v46, %v1088_v25  ;;  %v1250_v34 = vadd.f32 %v1185_v46, %v1090_v26  ;;  %v1092_v35 = vmul.f32 %v1030_v12, %v818_v30  ;;  %v1094_v36 = vmul.f32 %v1030_v12, %v931_v42  ;;  %v820_v44 = vpop.f32.mrb[31].mxu0  ;;  %v933_v39 = vpop.f32.mrb[31].mxu1 }
 0x141   : > { %v1249_v37 = vadd.f32 %v1185_v46, %v1089_v29  ;;  %v1251_v45 = vadd.f32 %v1185_v46, %v1091_v63  ;;  %v1093_v53 = vmul.f32 %v1030_v12, %v820_v44  ;;  %v1095_v54 = vmul.f32 %v1030_v12, %v933_v39  ;;  %1396 = vmatprep.subr.bf16.mxu0 %v1345_v31  ;;  %v1621_v8 = vpop.permute.xlu0 %1620  ;;  %v1546_v20 = vpop.permute.xlu1 %1545 }
 0x142   : > { %v1252_v55 = vadd.f32 %v1190_v52, %v1092_v35  ;;  %v1254_v56 = vadd.f32 %v1190_v52, %v1094_v36  ;;  %1469 = vmatprep.subr.bf16.mxu1 %v1347_v51  ;;  %1397 = vmatpush1.bf16.msra.mxu0 %v1344_v49  ;;  %v1312_v38 = vmax.f32 %v1248_v32, 0.0  ;;  %v1314_v58 = vmax.f32 %v1250_v34, 0.0 }
 0x143   : > { %v1253_v33 = vadd.f32 %v1190_v52, %v1093_v53  ;;  %v1255_v57 = vadd.f32 %v1190_v52, %v1095_v54  ;;  %1470 = vmatpush1.bf16.msra.mxu1 %v1346_v24  ;;  %v1313_v50 = vmax.f32 %v1249_v37, 0.0  ;;  %v1315_v60 = vmax.f32 %v1251_v45, 0.0 }
 0x144   : > { %v1316_v21 = vmax.f32 %v1252_v55, 0.0  ;;  %v1318_v59 = vmax.f32 %v1254_v56, 0.0 }
 0x145   : > { %v1317_v47 = vmax.f32 %v1253_v33, 0.0  ;;  %v1319_v61 = vmax.f32 %v1255_v57, 0.0  ;;  %v1551_v9 = vpop.permute.xlu0 %1550  ;;  %v1626_v10 = vpop.permute.xlu1 %1625 }
 0x146   : > { %v1348_v62 = vpack.c.bf16 %v1316_v21, %v1312_v38  ;;  %v1350_v40 = vpack.c.bf16 %v1318_v59, %v1314_v58 }
 0x147   : > { %v1349_v13 = vpack.c.bf16 %v1317_v47, %v1313_v50  ;;  %v1351_v41 = vpack.c.bf16 %v1319_v61, %v1315_v60 }
 0x149   : > { %1398 = vmatprep.subr.bf16.mxu0 %v1349_v13  ;;  %1471 = vmatprep.subr.bf16.mxu1 %v1351_v41  ;;  %v1631_v11 = vpop.permute.xlu0 %1630  ;;  %v1556_v12 = vpop.permute.xlu1 %1555 }
 0x14a   : > { %1399 = vmatpush1.bf16.msra.mxu0 %v1348_v62  ;;  %1472 = vmatpush1.bf16.msra.mxu1 %v1350_v40 }
 0x14d   : > { %1417 = vmatmul.mubr.bf16.vlgmr.msra.gmra.mrb[32].mxu0 %v2311_v4  ;;  %1490 = vmatmul.mubr.bf16.vlgmr.msra.gmra.mrb[32].mxu1 %v2311_v4  ;;  %v2840_v43 = vpop.permute.xlu0 %1560  ;;  %v2842_v0 = vpop.permute.xlu1 %1635 }
 0x14e   : > { %1426 = vmatprep.mubr.bf16.mxu0 %v2349_v2  ;;  %1499 = vmatprep.mubr.bf16.mxu1 %v2349_v2 }
 0x151   : > { %v2844_v34 = vpop.permute.xlu0 %1640  ;;  %v2846_v35 = vpop.permute.xlu1 %1565 }
 0x155   : > { %1427 = vmatmul.mubr.bf16.gmra.mrb[36].mxu0 %v2312_v14  ;;  %1500 = vmatmul.mubr.bf16.gmra.mrb[36].mxu1 %v2312_v14 }
 0x156   : > { %1436 = vmatprep.mubr.bf16.mxu0 %v2349_v2  ;;  %1509 = vmatprep.mubr.bf16.mxu1 %v2349_v2 }
 0x15d   : > { %1437 = vmatmul.mubr.bf16.gmra.mrb[40].mxu0 %v2313_v5  ;;  %1510 = vmatmul.mubr.bf16.gmra.mrb[40].mxu1 %v2313_v5 }
 0x15e   : > { %1446 = vmatprep.mubr.bf16.mxu0 %v2349_v2  ;;  %1519 = vmatprep.mubr.bf16.mxu1 %v2349_v2 }
 0x165   : > { %1447 = vmatmul.mubr.bf16.gmra.mrb[44].mxu0 %v2314_v6  ;;  %1520 = vmatmul.mubr.bf16.gmra.mrb[44].mxu1 %v2314_v6 }
 0x166   : > { %1791 = vmatprep.mubr.bf16.mxu0 %v2349_v2  ;;  %1844 = vmatprep.mubr.bf16.mxu1 %v2349_v2 }
 0x220   : > { %v1418_v46 = vpop.f32.mrb[32].mxu0  ;;  %v1491_v15 = vpop.f32.mrb[32].mxu1 }
 0x221   : > { %v1578_v16 = vmul.f32 %v1541_v7, %v1418_v46  ;;  %v1580_v17 = vmul.f32 %v1541_v7, %v1491_v15  ;;  %v1420_v18 = vpop.f32.mrb[33].mxu0  ;;  %v1493_v19 = vpop.f32.mrb[33].mxu1 }
 0x222   : > { %v1579_v1 = vmul.f32 %v1541_v7, %v1420_v18  ;;  %v1581_v48 = vmul.f32 %v1541_v7, %v1493_v19  ;;  %v1422_v22 = vpop.f32.mrb[34].mxu0  ;;  %v1495_v23 = vpop.f32.mrb[34].mxu1 }
 0x223   : > { %v1658_v3 = vadd.f32 %v1621_v8, %v1578_v16  ;;  %v1660_v49 = vadd.f32 %v1621_v8, %v1580_v17  ;;  %v1582_v24 = vmul.f32 %v1546_v20, %v1422_v22  ;;  %v1584_v25 = vmul.f32 %v1546_v20, %v1495_v23  ;;  %v1424_v26 = vpop.f32.mrb[35].mxu0  ;;  %v1497_v27 = vpop.f32.mrb[35].mxu1 }
 0x224   : > { %v1659_v28 = vadd.f32 %v1621_v8, %v1579_v1  ;;  %v1661_v29 = vadd.f32 %v1621_v8, %v1581_v48  ;;  %v1583_v63 = vmul.f32 %v1546_v20, %v1424_v26  ;;  %v1585_v30 = vmul.f32 %v1546_v20, %v1497_v27  ;;  %v1571_v17 = vpop.permute.xlu0 %1570  ;;  %v1646_v18 = vpop.permute.xlu1 %1645 }
 0x225   : > { %v1662_v42 = vadd.f32 %v1626_v10, %v1582_v24  ;;  %v1664_v31 = vadd.f32 %v1626_v10, %v1584_v25  ;;  %v1690_v36 = vmax.f32 %v1658_v3, 0.0  ;;  %v1692_v44 = vmax.f32 %v1660_v49, 0.0 }
 0x226   : > { %v1663_v51 = vadd.f32 %v1626_v10, %v1583_v63  ;;  %v1665_v32 = vadd.f32 %v1626_v10, %v1585_v30  ;;  %v1691_v37 = vmax.f32 %v1659_v28, 0.0  ;;  %v1693_v45 = vmax.f32 %v1661_v29, 0.0 }
 0x227   : > { %v1694_v39 = vmax.f32 %v1662_v42, 0.0  ;;  %v1696_v52 = vmax.f32 %v1664_v31, 0.0 }
 0x228   : > { %v1695_v53 = vmax.f32 %v1663_v51, 0.0  ;;  %v1697_v54 = vmax.f32 %v1665_v32, 0.0  ;;  %v1428_v55 = vpop.f32.mrb[36].mxu0  ;;  %v1501_v56 = vpop.f32.mrb[36].mxu1 }
 0x229   : > { %v1722_v33 = vpack.c.bf16 %v1694_v39, %v1690_v36  ;;  %v1724_v57 = vpack.c.bf16 %v1696_v52, %v1692_v44  ;;  %v1586_v38 = vmul.f32 %v1551_v9, %v1428_v55  ;;  %v1588_v58 = vmul.f32 %v1551_v9, %v1501_v56  ;;  %v1430_v21 = vpop.f32.mrb[37].mxu0  ;;  %v1503_v59 = vpop.f32.mrb[37].mxu1 }
 0x22a   : > { %v1587_v50 = vmul.f32 %v1551_v9, %v1430_v21  ;;  %v1589_v60 = vmul.f32 %v1551_v9, %v1503_v59  ;;  %v1432_v47 = vpop.f32.mrb[38].mxu0  ;;  %v1505_v61 = vpop.f32.mrb[38].mxu1  ;;  %v1723_v62 = vpack.c.bf16 %v1695_v53, %v1691_v37  ;;  %v1725_v40 = vpack.c.bf16 %v1697_v54, %v1693_v45 }
 0x22b   : > { %v1666_v13 = vadd.f32 %v1631_v11, %v1586_v38  ;;  %v1668_v41 = vadd.f32 %v1631_v11, %v1588_v58  ;;  %v1590_v4 = vmul.f32 %v1556_v12, %v1432_v47  ;;  %v1592_v14 = vmul.f32 %v1556_v12, %v1505_v61  ;;  %v1434_v5 = vpop.f32.mrb[39].mxu0  ;;  %v1507_v6 = vpop.f32.mrb[39].mxu1 }
 0x22c   : > { %v1667_v7 = vadd.f32 %v1631_v11, %v1587_v50  ;;  %v1669_v8 = vadd.f32 %v1631_v11, %v1589_v60  ;;  %v1591_v20 = vmul.f32 %v1556_v12, %v1434_v5  ;;  %v1593_v10 = vmul.f32 %v1556_v12, %v1507_v6  ;;  %1759 = vmatprep.subr.bf16.mxu0 %v1723_v62  ;;  %v1651_v21 = vpop.permute.xlu0 %1650 }
 0x22d   : > { %v1670_v46 = vadd.f32 %v2842_v0, %v1590_v4  ;;  %v1672_v15 = vadd.f32 %v2842_v0, %v1592_v14  ;;  %1812 = vmatprep.subr.bf16.mxu1 %v1725_v40  ;;  %1760 = vmatpush1.bf16.msra.mxu0 %v1722_v33  ;;  %v1698_v19 = vmax.f32 %v1666_v13, 0.0  ;;  %v1700_v1 = vmax.f32 %v1668_v41, 0.0 }
 0x22e   : > { %v1671_v9 = vadd.f32 %v2842_v0, %v1591_v20  ;;  %v1673_v16 = vadd.f32 %v2842_v0, %v1593_v10  ;;  %1813 = vmatpush1.bf16.msra.mxu1 %v1724_v57  ;;  %v1699_v22 = vmax.f32 %v1667_v7, 0.0  ;;  %v1701_v12 = vmax.f32 %v1669_v8, 0.0  ;;  %v1576_v57 = vpop.permute.xlu1 %1575 }
 0x22f   : > { %v1702_v48 = vmax.f32 %v1670_v46, 0.0  ;;  %v1704_v11 = vmax.f32 %v1672_v15, 0.0 }
 0x230   : > { %v1703_v23 = vmax.f32 %v1671_v9, 0.0  ;;  %v1705_v3 = vmax.f32 %v1673_v16, 0.0  ;;  %v1438_v49 = vpop.f32.mrb[40].mxu0  ;;  %v1511_v24 = vpop.f32.mrb[40].mxu1 }
 0x231   : > { %v1726_v25 = vpack.c.bf16 %v1702_v48, %v1698_v19  ;;  %v1728_v26 = vpack.c.bf16 %v1704_v11, %v1700_v1  ;;  %v1594_v27 = vmul.f32 %v2840_v43, %v1438_v49  ;;  %v1596_v28 = vmul.f32 %v2840_v43, %v1511_v24  ;;  %v1440_v0 = vpop.f32.mrb[41].mxu0  ;;  %v1513_v29 = vpop.f32.mrb[41].mxu1 }
 0x232   : > { %v1595_v63 = vmul.f32 %v2840_v43, %v1440_v0  ;;  %v1597_v30 = vmul.f32 %v2840_v43, %v1513_v29  ;;  %v1442_v42 = vpop.f32.mrb[42].mxu0  ;;  %v1515_v31 = vpop.f32.mrb[42].mxu1  ;;  %v1727_v51 = vpack.c.bf16 %v1703_v23, %v1699_v22  ;;  %v1729_v32 = vpack.c.bf16 %v1705_v3, %v1701_v12 }
 0x233   : > { %v1674_v36 = vadd.f32 %v2844_v34, %v1594_v27  ;;  %v1676_v44 = vadd.f32 %v2844_v34, %v1596_v28  ;;  %v1598_v39 = vmul.f32 %v2846_v35, %v1442_v42  ;;  %v1600_v52 = vmul.f32 %v2846_v35, %v1515_v31  ;;  %v1444_v37 = vpop.f32.mrb[43].mxu0  ;;  %v1517_v45 = vpop.f32.mrb[43].mxu1 }
 0x234   : > { %v1675_v53 = vadd.f32 %v2844_v34, %v1595_v63  ;;  %v1677_v54 = vadd.f32 %v2844_v34, %v1597_v30  ;;  %v1599_v43 = vmul.f32 %v2846_v35, %v1444_v37  ;;  %v1601_v55 = vmul.f32 %v2846_v35, %v1517_v45  ;;  %1761 = vmatprep.subr.bf16.mxu0 %v1727_v51  ;;  %v1656_v22 = vpop.permute.xlu1 %1655  ;;  %v1872_v37 = vpop.permute.xlu0 %1871 }
 0x235   : > { %v1678_v56 = vadd.f32 %v1646_v18, %v1598_v39  ;;  %v1680_v33 = vadd.f32 %v1646_v18, %v1600_v52  ;;  %1814 = vmatprep.subr.bf16.mxu1 %v1729_v32  ;;  %1762 = vmatpush1.bf16.msra.mxu0 %v1726_v25  ;;  %v1706_v59 = vmax.f32 %v1674_v36, 0.0  ;;  %v1708_v50 = vmax.f32 %v1676_v44, 0.0  ;;  %v2315_v39 = vld [vmem:[%s2897_s7] sm:$0xff]   ;;  %v2316_v52 = vld [vmem:[%s2897_s7 + $0x8] sm:$0xff]  }
 0x236   : > { %v1679_v38 = vadd.f32 %v1646_v18, %v1599_v43  ;;  %v1681_v58 = vadd.f32 %v1646_v18, %v1601_v55  ;;  %1815 = vmatpush1.bf16.msra.mxu1 %v1728_v26  ;;  %v1707_v61 = vmax.f32 %v1675_v53, 0.0  ;;  %v1709_v34 = vmax.f32 %v1677_v54, 0.0 }
 0x237   : > { %v1710_v60 = vmax.f32 %v1678_v56, 0.0  ;;  %v1712_v47 = vmax.f32 %v1680_v33, 0.0 }
 0x238   : > { %v1711_v62 = vmax.f32 %v1679_v38, 0.0  ;;  %v1713_v40 = vmax.f32 %v1681_v58, 0.0  ;;  %v1448_v13 = vpop.f32.mrb[44].mxu0  ;;  %v1521_v35 = vpop.f32.mrb[44].mxu1 }
 0x239   : > { %v1730_v41 = vpack.c.bf16 %v1710_v60, %v1706_v59  ;;  %v1732_v4 = vpack.c.bf16 %v1712_v47, %v1708_v50  ;;  %v1602_v14 = vmul.f32 %v1571_v17, %v1448_v13  ;;  %v1604_v5 = vmul.f32 %v1571_v17, %v1521_v35  ;;  %v1450_v6 = vpop.f32.mrb[45].mxu0  ;;  %v1523_v7 = vpop.f32.mrb[45].mxu1 }
 0x23a   : > { %v1603_v8 = vmul.f32 %v1571_v17, %v1450_v6  ;;  %v1605_v20 = vmul.f32 %v1571_v17, %v1523_v7  ;;  %v1452_v10 = vpop.f32.mrb[46].mxu0  ;;  %v1525_v46 = vpop.f32.mrb[46].mxu1  ;;  %v1731_v15 = vpack.c.bf16 %v1711_v62, %v1707_v61  ;;  %v1733_v9 = vpack.c.bf16 %v1713_v40, %v1709_v34 }
 0x23b   : > { %v1682_v16 = vadd.f32 %v1651_v21, %v1602_v14  ;;  %v1684_v18 = vadd.f32 %v1651_v21, %v1604_v5  ;;  %v1606_v19 = vmul.f32 %v1576_v57, %v1452_v10  ;;  %v1608_v1 = vmul.f32 %v1576_v57, %v1525_v46  ;;  %v1454_v48 = vpop.f32.mrb[47].mxu0  ;;  %v1527_v11 = vpop.f32.mrb[47].mxu1 }
 0x23c   : > { %v1683_v12 = vadd.f32 %v1651_v21, %v1603_v8  ;;  %v1685_v23 = vadd.f32 %v1651_v21, %v1605_v20  ;;  %v1607_v3 = vmul.f32 %v1576_v57, %v1454_v48  ;;  %v1609_v49 = vmul.f32 %v1576_v57, %v1527_v11  ;;  %1763 = vmatprep.subr.bf16.mxu0 %v1731_v15  ;;  %v1912_v45 = vpop.permute.xlu0 %1911  ;;  %v1877_v53 = vpop.permute.xlu1 %1876 }
 0x23d   : > { %v1686_v24 = vadd.f32 %v1656_v22, %v1606_v19  ;;  %v1688_v25 = vadd.f32 %v1656_v22, %v1608_v1  ;;  %1816 = vmatprep.subr.bf16.mxu1 %v1733_v9  ;;  %1764 = vmatpush1.bf16.msra.mxu0 %v1730_v41  ;;  %v1714_v27 = vmax.f32 %v1682_v16, 0.0  ;;  %v1716_v28 = vmax.f32 %v1684_v18, 0.0 }
 0x23e   : > { %v1687_v17 = vadd.f32 %v1656_v22, %v1607_v3  ;;  %v1689_v26 = vadd.f32 %v1656_v22, %v1609_v49  ;;  %1817 = vmatpush1.bf16.msra.mxu1 %v1732_v4  ;;  %v1715_v63 = vmax.f32 %v1683_v12, 0.0  ;;  %v1717_v30 = vmax.f32 %v1685_v23, 0.0 }
 0x23f   : > { %v1718_v0 = vmax.f32 %v1686_v24, 0.0  ;;  %v1720_v29 = vmax.f32 %v1688_v25, 0.0 }
 0x240   : > { %v1719_v42 = vmax.f32 %v1687_v17, 0.0  ;;  %v1721_v31 = vmax.f32 %v1689_v26, 0.0  ;;  %v1882_v54 = vpop.permute.xlu0 %1881  ;;  %v1917_v43 = vpop.permute.xlu1 %1916 }
 0x241   : > { %v1734_v51 = vpack.c.bf16 %v1718_v0, %v1714_v27  ;;  %v1736_v32 = vpack.c.bf16 %v1720_v29, %v1716_v28 }
 0x242   : > { %v1735_v36 = vpack.c.bf16 %v1719_v42, %v1715_v63  ;;  %v1737_v44 = vpack.c.bf16 %v1721_v31, %v1717_v30 }
 0x244   : > { %1765 = vmatprep.subr.bf16.mxu0 %v1735_v36  ;;  %1818 = vmatprep.subr.bf16.mxu1 %v1737_v44  ;;  %v1887_v6 = vpop.permute.xlu1 %1886  ;;  %v1922_v20 = vpop.permute.xlu0 %1921 }
 0x245   : > { %1766 = vmatpush1.bf16.msra.mxu0 %v1734_v51  ;;  %1819 = vmatpush1.bf16.msra.mxu1 %v1736_v32 }
 0x248   : > { %2218 = vmatmul.mubr.msk.bf16.vlgmr.msra.gmra.mrb[48].mxu0 %vm1752_vm0, %v2315_v39  ;;  %2220 = vmatmul.mubr.msk.bf16.vlgmr.msra.gmra.mrb[48].mxu1 %vm1752_vm0, %v2315_v39  ;;  %v1927_v32 = vpop.permute.xlu1 %1926 }
 0x249   : > { %1801 = vmatprep.mubr.bf16.mxu0 %v2349_v2  ;;  %1854 = vmatprep.mubr.bf16.mxu1 %v2349_v2 }
 0x250   : > { %2219 = vmatmul.mubr.msk.bf16.gmra.mrb[52].mxu0 %vm1752_vm0, %v2316_v52  ;;  %2221 = vmatmul.mubr.msk.bf16.gmra.mrb[52].mxu1 %vm1752_vm0, %v2316_v52 }
 0x251   : > { %2012 = vmatprep.mubr.bf16.mxu0 %v2349_v2  ;;  %2053 = vmatprep.mubr.bf16.mxu1 %v2349_v2 }
 0x31b   : > { %v1793_v55 = vpop.f32.mrb[48].mxu0  ;;  %v1846_v56 = vpop.f32.mrb[48].mxu1 }
 0x31c   : > { %v1889_v33 = vmul.f32 %v1872_v37, %v1793_v55  ;;  %v1891_v57 = vmul.f32 %v1872_v37, %v1846_v56  ;;  %v1795_v38 = vpop.f32.mrb[49].mxu0  ;;  %v1848_v58 = vpop.f32.mrb[49].mxu1 }
 0x31d   : > { %v1890_v21 = vmul.f32 %v1872_v37, %v1795_v38  ;;  %v1892_v59 = vmul.f32 %v1872_v37, %v1848_v58  ;;  %v1797_v50 = vpop.f32.mrb[50].mxu0  ;;  %v1850_v60 = vpop.f32.mrb[50].mxu1 }
 0x31e   : > { %v1929_v47 = vadd.f32 %v1912_v45, %v1889_v33  ;;  %v1931_v61 = vadd.f32 %v1912_v45, %v1891_v57  ;;  %v1893_v34 = vmul.f32 %v1877_v53, %v1797_v50  ;;  %v1895_v62 = vmul.f32 %v1877_v53, %v1850_v60  ;;  %v1799_v2 = vpop.f32.mrb[51].mxu0  ;;  %v1852_v40 = vpop.f32.mrb[51].mxu1 }
 0x31f   : > { %v1930_v13 = vadd.f32 %v1912_v45, %v1890_v21  ;;  %v1932_v35 = vadd.f32 %v1912_v45, %v1892_v59  ;;  %v1894_v41 = vmul.f32 %v1877_v53, %v1799_v2  ;;  %v1896_v4 = vmul.f32 %v1877_v53, %v1852_v40 }
 0x320   : > { %v1933_v14 = vadd.f32 %v1917_v43, %v1893_v34  ;;  %v1935_v5 = vadd.f32 %v1917_v43, %v1895_v62  ;;  %v1945_v10 = vmax.f32 %v1929_v47, 0.0  ;;  %v1947_v46 = vmax.f32 %v1931_v61, 0.0  ;;  %v1969_v61 = vld [vmem:[%s2900_s10] sm:$0x3]  ;;  %v1974_v34 = vpop.permute.xlu0 %1973 }
 0x321   : > { %v1934_v7 = vadd.f32 %v1917_v43, %v1894_v41  ;;  %v1936_v8 = vadd.f32 %v1917_v43, %v1896_v4  ;;  %v1946_v16 = vmax.f32 %v1930_v13, 0.0  ;;  %v1948_v18 = vmax.f32 %v1932_v35, 0.0 }
 0x322   : > { %v1949_v15 = vmax.f32 %v1933_v14, 0.0  ;;  %v1951_v9 = vmax.f32 %v1935_v5, 0.0 }
 0x323   : > { %v1950_v19 = vmax.f32 %v1934_v7, 0.0  ;;  %v1952_v1 = vmax.f32 %v1936_v8, 0.0  ;;  %v1803_v48 = vpop.f32.mrb[52].mxu0  ;;  %v1856_v11 = vpop.f32.mrb[52].mxu1 }
 0x324   : > { %v1961_v22 = vpack.c.bf16 %v1949_v15, %v1945_v10  ;;  %v1963_v12 = vpack.c.bf16 %v1951_v9, %v1947_v46  ;;  %v1897_v23 = vmul.f32 %v1882_v54, %v1803_v48  ;;  %v1899_v3 = vmul.f32 %v1882_v54, %v1856_v11  ;;  %v1805_v49 = vpop.f32.mrb[53].mxu0  ;;  %v1858_v24 = vpop.f32.mrb[53].mxu1 }
 0x325   : > { %v1898_v25 = vmul.f32 %v1882_v54, %v1805_v49  ;;  %v1900_v17 = vmul.f32 %v1882_v54, %v1858_v24  ;;  %v1807_v26 = vpop.f32.mrb[54].mxu0  ;;  %v1860_v27 = vpop.f32.mrb[54].mxu1  ;;  %v1962_v28 = vpack.c.bf16 %v1950_v19, %v1946_v16  ;;  %v1964_v0 = vpack.c.bf16 %v1952_v1, %v1948_v18 }
 0x326   : > { %v1937_v29 = vadd.f32 %v1922_v20, %v1897_v23  ;;  %v1939_v63 = vadd.f32 %v1922_v20, %v1899_v3  ;;  %v1901_v30 = vmul.f32 %v1887_v6, %v1807_v26  ;;  %v1903_v42 = vmul.f32 %v1887_v6, %v1860_v27  ;;  %v1809_v31 = vpop.f32.mrb[55].mxu0  ;;  %v1862_v51 = vpop.f32.mrb[55].mxu1 }
 0x327   : > { %v1938_v36 = vadd.f32 %v1922_v20, %v1898_v25  ;;  %v1940_v44 = vadd.f32 %v1922_v20, %v1900_v17  ;;  %v1902_v39 = vmul.f32 %v1887_v6, %v1809_v31  ;;  %v1904_v52 = vmul.f32 %v1887_v6, %v1862_v51  ;;  %1980 = vmatprep.subr.bf16.mxu0 %v1962_v28 }
 0x328   : > { %v1941_v37 = vadd.f32 %v1927_v32, %v1901_v30  ;;  %v1943_v45 = vadd.f32 %v1927_v32, %v1903_v42  ;;  %2021 = vmatprep.subr.bf16.mxu1 %v1964_v0  ;;  %1981 = vmatpush1.bf16.msra.mxu0 %v1961_v22  ;;  %v1953_v43 = vmax.f32 %v1937_v29, 0.0  ;;  %v1955_v55 = vmax.f32 %v1939_v63, 0.0 }
 0x329   : > { %v1942_v53 = vadd.f32 %v1927_v32, %v1902_v39  ;;  %v1944_v54 = vadd.f32 %v1927_v32, %v1904_v52  ;;  %2022 = vmatpush1.bf16.msra.mxu1 %v1963_v12  ;;  %v1954_v57 = vmax.f32 %v1938_v36, 0.0  ;;  %v1956_v38 = vmax.f32 %v1940_v44, 0.0 }
 0x32a   : > { %v1957_v56 = vmax.f32 %v1941_v37, 0.0  ;;  %v1959_v33 = vmax.f32 %v1943_v45, 0.0 }
 0x32b   : > { %v1958_v58 = vmax.f32 %v1942_v53, 0.0  ;;  %v1960_v21 = vmax.f32 %v1944_v54, 0.0 }
 0x32c   : > { %v1965_v59 = vpack.c.bf16 %v1957_v56, %v1953_v43  ;;  %v1967_v50 = vpack.c.bf16 %v1959_v33, %v1955_v55 }
 0x32d   : > { %v1966_v60 = vpack.c.bf16 %v1958_v58, %v1954_v57  ;;  %v1968_v47 = vpack.c.bf16 %v1960_v21, %v1956_v38 }
 0x32f   : > { %1982 = vmatprep.subr.bf16.mxu0 %v1966_v60  ;;  %2023 = vmatprep.subr.bf16.mxu1 %v1968_v47 }
 0x330   : > { %1983 = vmatpush1.bf16.msra.mxu0 %v1965_v59  ;;  %2024 = vmatpush1.bf16.msra.mxu1 %v1967_v50 }
 0x333   : > { %2222 = vmatmul.mubr.msk.bf16.vlgmr.msra.gmra.mrb[56].mxu0 %vm1976_vm1, %v1969_v61  ;;  %2223 = vmatmul.mubr.msk.bf16.vlgmr.msra.gmra.mrb[56].mxu1 %vm1976_vm1, %v1969_v61 }
 0x406   : > { %v2014_v62 = vpop.f32.mrb[56].mxu0  ;;  %v2055_v2 = vpop.f32.mrb[56].mxu1 }
 0x407   : > { %v2015_v40 = vadd.f32 %v2014_v62, %v1974_v34  ;;  %v2056_v13 = vadd.f32 %v2055_v2, %v1974_v34  ;;  %v2016_v35 = vpop.f32.mrb[57].mxu0  ;;  %v2057_v41 = vpop.f32.mrb[57].mxu1 }
 0x408   : > { %v2017_v4 = vadd.f32 %v2016_v35, %v1974_v34  ;;  %v2058_v14 = vadd.f32 %v2057_v41, %v1974_v34  ;;  %v2018_v5 = vpop.f32.mrb[58].mxu0  ;;  %v2059_v6 = vpop.f32.mrb[58].mxu1 }
 0x409   : > { %2317 = vtanh.f32 %v2015_v40  ;;  %v2019_v7 = vpop.f32.mrb[59].mxu0  ;;  %v2060_v8 = vpop.f32.mrb[59].mxu1 }
 0x40a   : > { %2319 = vtanh.f32 %v2056_v13 }
 0x40b   : > { %2321 = vtanh.f32 %v2017_v4 }
 0x40c   : > { %2323 = vtanh.f32 %v2058_v14 }
 0x413   : > { %v2318_v20 = vpop.eup %2317 }
 0x414   : > { %v2320_v10 = vpop.eup %2319 }
 0x415   : > { %v2322_v46 = vpop.eup %2321 }
 0x416   : > { %v2324_v15 = vpop.eup %2323  ;;  %v2070_v9 = vcombine.low %v2318_v20, %v2322_v46 }
 0x417   : > { %v2071_v16 = vcombine.low %v2320_v10, %v2324_v15 }
 0x418   : > { %2074 = vst [vmem:[%s451_s20] sm:$0x77] %v2070_v9 }
 0x419   : > { %2075 = vst [vmem:[%s451_s20 + $0x8] sm:$0x77] %v2071_v16 }
 0x41a PF: > { %s22_s23 = sadd.s32 1, %s2347_s23   ;;  %s2903_s21 = smov %s2343_s22 }
 0x41b   : > { %p19_p5 = scmp.ge.s32.totalorder %s22_s23, 4   ;;  %s2904_s22 = smov %s2906_s24 }
 0x41d   :  { %21 = sbr.rel (!%p19_p5) target bundleno = 2 (0x2), region = 98 }

</bundles_post_ra>
